<compile_context>
chip_gen: v7x
topology: tpu7x:2x2x1
jax: 0.10.0
libtpu: 0.0.40
codegen_flags: <defaults>
</compile_context>

<pallas_src>
import functools
import math

import jax
import jax.numpy as jnp
from jax import lax
from jax.experimental import pallas as pl
from jax.experimental.pallas import tpu as pltpu  # noqa: F401  (TPU backend assumed)


# ----------------------------------------------------------------------------
# In-kernel helpers
# ----------------------------------------------------------------------------

def _erf_poly(x):
    """erf via Abramowitz & Stegun 7.1.26 (|error| <= 1.5e-7): exp/mul/add only."""
    a1 = 0.254829592
    a2 = -0.284496736
    a3 = 1.421413741
    a4 = -1.453152027
    a5 = 1.061405429
    p = 0.3275911
    ax = jnp.abs(x)
    t = 1.0 / (1.0 + p * ax)
    poly = ((((a5 * t + a4) * t + a3) * t + a2) * t + a1) * t
    y = 1.0 - poly * jnp.exp(-(ax * ax))
    return jnp.where(x < 0.0, -y, y)


# NT matmul (A @ B^T) expressed directly as dot_general (maps to MXU trans_b).
_NT_DIMS = (((1,), (1,)), ((), ()))


# ----------------------------------------------------------------------------
# Fused whole-stack kernel
# ----------------------------------------------------------------------------

def _t5_stack_kernel(h_ref, bias_ref, hmask_ref, wqkv_ref, wo_ref, ln1_ref,
                     wi_ref, wout_ref, ln2_ref, fln_ref, out_ref,
                     *, num_layers, H, M, D, dff, eps):
    eps_f = jnp.float32(eps)
    inv_sqrt2 = jnp.float32(1.0 / math.sqrt(2.0))

    h = h_ref[...]          # [M, D]      residual stream (VMEM resident)
    bias = bias_ref[...]    # [H*M, M]    pos-bias + cross-batch/attention mask (additive)
    hmask = hmask_ref[...]  # [H*M, D]    0/1: row block h keeps only head-h feature cols

    def rms(x, w):
        # T5LayerNorm: RMS norm (no mean subtraction), per-feature scale.
        var = jnp.mean(x * x, axis=-1, keepdims=True)
        return (x * jax.lax.rsqrt(var + eps_f)) * w

    for l in range(num_layers):
        # ---------------- self-attention sublayer ----------------
        normed = rms(h, ln1_ref[l])                                       # [M, D]
        qkv = jnp.dot(normed, wqkv_ref[l],
                      preferred_element_type=jnp.float32)                 # [M, 3D]
        q = qkv[:, :D]
        k = qkv[:, D:2 * D]
        v = qkv[:, 2 * D:3 * D]

        # Head-batched scores via block-diagonal masking: one NT matmul for all heads.
        q_bd = jnp.concatenate([q] * H, axis=0) * hmask                   # [H*M, D]
        scores = lax.dot_general(q_bd, k, _NT_DIMS,
                                 preferred_element_type=jnp.float32)      # [H*M, M]
        # NOTE: T5 does NOT scale scores by 1/sqrt(d_kv).
        scores = scores + bias                                            # pos bias / masks

        m = jnp.max(scores, axis=-1, keepdims=True)
        e = jnp.exp(scores - m)
        p = e * pl.reciprocal(jnp.sum(e, axis=-1, keepdims=True), approx=True)

        # P @ V for all heads at once; keep only head-h columns per row block, then
        # sum the row blocks -> standard concat-of-heads layout [M, D].
        y = jnp.dot(p, v, preferred_element_type=jnp.float32) * hmask     # [H*M, D]
        attn_concat = jnp.sum(y.reshape(H, M, D), axis=0)                 # [M, D]

        # Single o-projection matmul.
        h = h + jnp.dot(attn_concat, wo_ref[l],
                        preferred_element_type=jnp.float32)               # residual

        # ---------------- feed-forward sublayer ----------------
        normed = rms(h, ln2_ref[l])
        wi_out = jnp.dot(normed, wi_ref[l],
                         preferred_element_type=jnp.float32)              # [M, 2F]
        g = wi_out[:, :dff]
        lin = wi_out[:, dff:]
        gelu = 0.5 * g * (1.0 + _erf_poly(g * inv_sqrt2))                 # exact-erf GELU
        h = h + jnp.dot(gelu * lin, wout_ref[l],
                        preferred_element_type=jnp.float32)               # residual

    # ---------------- final layer norm ----------------
    out_ref[...] = rms(h, fln_ref[...])


def _full_block(shape):
    n = len(shape)
    return pl.BlockSpec(shape, lambda *_, n=n: (0,) * n)


# ----------------------------------------------------------------------------
# Plain-JAX glue: relative-position bias / masks (tiny int math + gather)
# ----------------------------------------------------------------------------

def compute_position_bias(rel_emb, seq_len, num_buckets, max_distance):
    """rel_emb: [num_buckets, H] -> bias [H, S, S] (bidirectional / encoder)."""
    ctx = jnp.arange(seq_len, dtype=jnp.int32)[:, None]
    mem = jnp.arange(seq_len, dtype=jnp.int32)[None, :]
    rp = mem - ctx                                          # [S, S]
    nb = num_buckets // 2                                   # bidirectional
    buckets = (rp > 0).astype(jnp.int32) * nb
    rp_abs = jnp.abs(rp)
    max_exact = nb // 2
    is_small = rp_abs < max_exact
    # clamp away from 0 so log() never sees 0 (value is discarded by the where anyway)
    rp_safe = jnp.maximum(rp_abs, 1).astype(jnp.float32)
    rp_large = max_exact + (
        jnp.log(rp_safe / max_exact)
        / math.log(max_distance / max_exact) * (nb - max_exact)
    ).astype(jnp.int32)
    rp_large = jnp.minimum(rp_large, nb - 1)
    buckets = buckets + jnp.where(is_small, rp_abs, rp_large)
    values = rel_emb[buckets]                               # [S, S, H]
    return jnp.transpose(values, (2, 0, 1))                 # [H, S, S]


def build_attention_bias(rel_emb, B, S, H, num_buckets, max_distance,
                         attention_mask=None):
    """Additive bias [H*B*S, B*S]: position bias within a batch, -1e9 across batches."""
    pb = compute_position_bias(rel_emb, S, num_buckets, max_distance)     # [H, S, S]
    same = (jnp.arange(B)[:, None] == jnp.arange(B)[None, :])
    cross = jnp.where(same, 0.0, -1e9).astype(jnp.float32)                # [B, B]
    bias = pb[:, None, :, None, :] + cross[None, :, None, :, None]        # [H,B,S,B,S]
    if attention_mask is not None:
        # TODO(synk): expects an ADDITIVE mask [B, S] (0 attended, large negative
        # masked); a raw 0/1 mask must be converted first (get_extended_attention_mask).
        bias = bias + attention_mask[None, None, None, :, :].astype(jnp.float32)
    return bias.reshape(H * B * S, B * S)


def build_head_mask(H, M, D):
    """0/1 mask [H*M, D]: row block h keeps only columns of head h."""
    Dh = D // H
    row_h = jnp.arange(H * M, dtype=jnp.int32) // M
    col_h = jnp.arange(D, dtype=jnp.int32) // Dh
    return (row_h[:, None] == col_h[None, :]).astype(jnp.float32)


# ----------------------------------------------------------------------------
# Parameter init (deterministic, synthetic) — weights pre-packed for the kernel
# ----------------------------------------------------------------------------

class SmallT5Config:
    vocab_size = 256
    d_model = 64
    num_heads = 8            # d_kv = d_model // num_heads = 8
    d_ff = 128
    num_layers = 2
    relative_attention_num_buckets = 32
    relative_attention_max_distance = 128
    layer_norm_epsilon = 1e-6


def init_params(cfg, key):
    D, Fd, L, H = cfg.d_model, cfg.d_ff, cfg.num_layers, cfg.num_heads

    def nrm(k, shape, scale=0.02):
        return scale * jax.random.normal(k, shape, dtype=jnp.float32)

    keys = jax.random.split(key, 2 + L)
    wqkv, wo, wi, wout = [], [], [], []
    for i in range(L):
        ks = jax.random.split(keys[2 + i], 7)
        # weights stored as [in, out] so that x @ W == torch's x @ W.T
        q = nrm(ks[0], (D, D))
        k_ = nrm(ks[1], (D, D))
        v = nrm(ks[2], (D, D))
        wqkv.append(jnp.concatenate([q, k_, v], axis=1))      # [D, 3D]  fused Q|K|V
        wo.append(nrm(ks[3], (D, D)))
        wi0 = nrm(ks[4], (D, Fd))
        wi1 = nrm(ks[5], (D, Fd))
        wi.append(jnp.concatenate([wi0, wi1], axis=1))        # [D, 2F]  fused wi_0|wi_1
        wout.append(nrm(ks[6], (Fd, D)))

    return {
        "embed": nrm(keys[0], (cfg.vocab_size, D)),
        "rel_bias": nrm(keys[1], (cfg.relative_attention_num_buckets, H)),
        "wqkv": jnp.stack(wqkv),                     # [L, D, 3D]
        "wo": jnp.stack(wo),                         # [L, D, D]
        "ln1": jnp.ones((L, 1, D), jnp.float32),
        "wi": jnp.stack(wi),                         # [L, D, 2F]
        "wout": jnp.stack(wout),                     # [L, F, D]
        "ln2": jnp.ones((L, 1, D), jnp.float32),
        "final_ln": jnp.ones((1, D), jnp.float32),
    }


# ----------------------------------------------------------------------------
# T5Stack forward (encoder path; dropout = identity)
# ----------------------------------------------------------------------------

def t5_stack_forward(params, input_ids, cfg, attention_mask=None):
    B, S = input_ids.shape
    D = cfg.d_model
    H = cfg.num_heads
    L = cfg.num_layers
    Fd = cfg.d_ff
    M = B * S

    # TODO(synk): embedding gather stays in plain JAX (data-dependent gather).
    h = params["embed"][input_ids].reshape(M, D).astype(jnp.float32)

    # Loop-invariant additive bias (only block 0 has relative_attention_bias; the same
    # bias is reused by every later block, exactly as in torch T5Stack) + head mask.
    bias = build_attention_bias(params["rel_bias"], B, S, H,
                                cfg.relative_attention_num_buckets,
                                cfg.relative_attention_max_distance,
                                attention_mask)              # [H*M, M]
    hmask = build_head_mask(H, M, D)                         # [H*M, D]

    kernel = functools.partial(_t5_stack_kernel, num_layers=L, H=H, M=M, D=D,
                               dff=Fd, eps=cfg.layer_norm_epsilon)
    inputs = (h, bias, hmask, params["wqkv"], params["wo"], params["ln1"],
              params["wi"], params["wout"], params["ln2"], params["final_ln"])

    out = pl.pallas_call(
        kernel,
        out_shape=jax.ShapeDtypeStruct((M, D), jnp.float32),
        in_specs=[_full_block(a.shape) for a in inputs],
        out_specs=_full_block((M, D)),
    )(*inputs)

    return out.reshape(B, S, D)


# ----------------------------------------------------------------------------
# Main
# ----------------------------------------------------------------------------

if __name__ == "__main__":
    cfg = SmallT5Config()
    key = jax.random.PRNGKey(0)
    pkey, ikey = jax.random.split(key)

    params = init_params(cfg, pkey)

    B, S = 2, 16
    input_ids = jax.random.randint(ikey, (B, S), 0, cfg.vocab_size,
                                   dtype=jnp.int32)

    fwd = jax.jit(functools.partial(t5_stack_forward, cfg=cfg))
    out = jax.block_until_ready(fwd(params, input_ids))

    assert out.shape == (B, S, cfg.d_model)
    assert out.dtype == jnp.float32
    assert bool(jnp.all(jnp.isfinite(out)))
    print("KERNEL_OK")
</pallas_src>

<mosaic_0001>
module attributes {stable_mosaic.version = 11 : i64} {
  func.func @_t5_stack_kernel(%arg0: memref<32x64xf32, #tpu.memory_space<vmem>>, %arg1: memref<256x32xf32, #tpu.memory_space<vmem>>, %arg2: memref<256x64xf32, #tpu.memory_space<vmem>>, %arg3: memref<2x64x192xf32, #tpu.memory_space<vmem>>, %arg4: memref<2x64x64xf32, #tpu.memory_space<vmem>>, %arg5: memref<2x1x64xf32, #tpu.memory_space<vmem>>, %arg6: memref<2x64x256xf32, #tpu.memory_space<vmem>>, %arg7: memref<2x128x64xf32, #tpu.memory_space<vmem>>, %arg8: memref<2x1x64xf32, #tpu.memory_space<vmem>>, %arg9: memref<1x64xf32, #tpu.memory_space<vmem>>, %arg10: memref<32x64xf32, #tpu.memory_space<vmem>>) attributes {dimension_semantics = [], scalar_prefetch = 0 : i64, scratch_operands = 0 : i64, tpu.core_type = #tpu.core_type<tc>} {
    %c0 = arith.constant 0 : index
    %c0_0 = arith.constant 0 : index
    %0 = vector.load %arg0[%c0, %c0_0] : memref<32x64xf32, #tpu.memory_space<vmem>>, vector<32x64xf32>
    %c0_1 = arith.constant 0 : index
    %c0_2 = arith.constant 0 : index
    %1 = vector.load %arg1[%c0_1, %c0_2] : memref<256x32xf32, #tpu.memory_space<vmem>>, vector<256x32xf32>
    %c0_3 = arith.constant 0 : index
    %c0_4 = arith.constant 0 : index
    %2 = vector.load %arg2[%c0_3, %c0_4] : memref<256x64xf32, #tpu.memory_space<vmem>>, vector<256x64xf32>
    %c0_5 = arith.constant 0 : index
    %c0_6 = arith.constant 0 : index
    %c0_7 = arith.constant 0 : index
    %3 = vector.load %arg5[%c0_5, %c0_6, %c0_7] : memref<2x1x64xf32, #tpu.memory_space<vmem>>, vector<1x1x64xf32>
    %4 = vector.shape_cast %3 : vector<1x1x64xf32> to vector<1x64xf32>
    %5 = arith.mulf %0, %0 : vector<32x64xf32>
    %cst = arith.constant dense<0.000000e+00> : vector<32xf32>
    %6 = vector.multi_reduction <add>, %5, %cst [1] : vector<32x64xf32> to vector<32xf32>
    %7 = vector.shape_cast %6 : vector<32xf32> to vector<32x1xf32>
    %cst_8 = arith.constant 6.400000e+01 : f32
    %8 = vector.broadcast %cst_8 : f32 to vector<32x1xf32>
    %9 = arith.divf %7, %8 : vector<32x1xf32>
    %cst_9 = arith.constant 9.99999997E-7 : f32
    %10 = vector.broadcast %cst_9 : f32 to vector<32x1xf32>
    %11 = arith.addf %9, %10 : vector<32x1xf32>
    %12 = math.rsqrt %11 : vector<32x1xf32>
    %13 = vector.broadcast %12 : vector<32x1xf32> to vector<32x64xf32>
    %14 = arith.mulf %0, %13 : vector<32x64xf32>
    %15 = vector.broadcast %4 : vector<1x64xf32> to vector<32x64xf32>
    %16 = arith.mulf %14, %15 : vector<32x64xf32>
    %c0_10 = arith.constant 0 : index
    %c0_11 = arith.constant 0 : index
    %c0_12 = arith.constant 0 : index
    %17 = vector.load %arg3[%c0_10, %c0_11, %c0_12] : memref<2x64x192xf32, #tpu.memory_space<vmem>>, vector<1x64x192xf32>
    %18 = vector.shape_cast %17 : vector<1x64x192xf32> to vector<64x192xf32>
    %cst_13 = arith.constant dense<0.000000e+00> : vector<32x192xf32>
    %19 = tpu.matmul %16, %18, %cst_13 {dimension_numbers = #tpu.dot_dimension_numbers<[1], [0], [0], [1], [0, 0, 1, 1], [], []>} : vector<32x64xf32>, vector<64x192xf32>, vector<32x192xf32> -> vector<32x192xf32>
    %20 = vector.extract_strided_slice %19 {offsets = [0, 0], sizes = [32, 64], strides = [1, 1]} : vector<32x192xf32> to vector<32x64xf32>
    %21 = vector.extract_strided_slice %19 {offsets = [0, 64], sizes = [32, 64], strides = [1, 1]} : vector<32x192xf32> to vector<32x64xf32>
    %22 = vector.extract_strided_slice %19 {offsets = [0, 128], sizes = [32, 64], strides = [1, 1]} : vector<32x192xf32> to vector<32x64xf32>
    %23 = tpu.concatenate %20, %20, %20, %20, %20, %20, %20, %20 in 0 : vector<32x64xf32>, vector<32x64xf32>, vector<32x64xf32>, vector<32x64xf32>, vector<32x64xf32>, vector<32x64xf32>, vector<32x64xf32>, vector<32x64xf32> -> vector<256x64xf32>
    %24 = arith.mulf %23, %2 : vector<256x64xf32>
    %cst_14 = arith.constant dense<0.000000e+00> : vector<256x32xf32>
    %25 = tpu.matmul %24, %21, %cst_14 {dimension_numbers = #tpu.dot_dimension_numbers<[1], [1], [0], [0], [0, 0, 1, 0], [], []>} : vector<256x64xf32>, vector<32x64xf32>, vector<256x32xf32> -> vector<256x32xf32>
    %26 = arith.addf %25, %1 : vector<256x32xf32>
    %cst_15 = arith.constant dense<0xFF800000> : vector<256xf32>
    %27 = vector.multi_reduction <maximumf>, %26, %cst_15 [1] : vector<256x32xf32> to vector<256xf32>
    %28 = vector.shape_cast %27 : vector<256xf32> to vector<256x1xf32>
    %29 = vector.broadcast %28 : vector<256x1xf32> to vector<256x32xf32>
    %30 = arith.subf %26, %29 : vector<256x32xf32>
    %31 = math.exp %30 : vector<256x32xf32>
    %cst_16 = arith.constant dense<0.000000e+00> : vector<256xf32>
    %32 = vector.multi_reduction <add>, %31, %cst_16 [1] : vector<256x32xf32> to vector<256xf32>
    %33 = vector.shape_cast %32 : vector<256xf32> to vector<256x1xf32>
    %34 = tpu.reciprocal %33 {approx = true} : vector<256x1xf32> -> vector<256x1xf32>
    %35 = vector.broadcast %34 : vector<256x1xf32> to vector<256x32xf32>
    %36 = arith.mulf %31, %35 : vector<256x32xf32>
    %cst_17 = arith.constant dense<0.000000e+00> : vector<256x64xf32>
    %37 = tpu.matmul %36, %22, %cst_17 {dimension_numbers = #tpu.dot_dimension_numbers<[1], [0], [0], [1], [0, 0, 1, 1], [], []>} : vector<256x32xf32>, vector<32x64xf32>, vector<256x64xf32> -> vector<256x64xf32>
    %38 = arith.mulf %37, %2 : vector<256x64xf32>
    %39 = vector.shape_cast %38 : vector<256x64xf32> to vector<8x32x64xf32>
    %cst_18 = arith.constant dense<0.000000e+00> : vector<32x64xf32>
    %40 = vector.multi_reduction <add>, %39, %cst_18 [0] : vector<8x32x64xf32> to vector<32x64xf32>
    %c0_19 = arith.constant 0 : index
    %c0_20 = arith.constant 0 : index
    %c0_21 = arith.constant 0 : index
    %41 = vector.load %arg4[%c0_19, %c0_20, %c0_21] : memref<2x64x64xf32, #tpu.memory_space<vmem>>, vector<1x64x64xf32>
    %42 = vector.shape_cast %41 : vector<1x64x64xf32> to vector<64x64xf32>
    %cst_22 = arith.constant dense<0.000000e+00> : vector<32x64xf32>
    %43 = tpu.matmul %40, %42, %cst_22 {dimension_numbers = #tpu.dot_dimension_numbers<[1], [0], [0], [1], [0, 0, 1, 1], [], []>} : vector<32x64xf32>, vector<64x64xf32>, vector<32x64xf32> -> vector<32x64xf32>
    %44 = arith.addf %0, %43 : vector<32x64xf32>
    %c0_23 = arith.constant 0 : index
    %c0_24 = arith.constant 0 : index
    %c0_25 = arith.constant 0 : index
    %45 = vector.load %arg8[%c0_23, %c0_24, %c0_25] : memref<2x1x64xf32, #tpu.memory_space<vmem>>, vector<1x1x64xf32>
    %46 = vector.shape_cast %45 : vector<1x1x64xf32> to vector<1x64xf32>
    %47 = arith.mulf %44, %44 : vector<32x64xf32>
    %cst_26 = arith.constant dense<0.000000e+00> : vector<32xf32>
    %48 = vector.multi_reduction <add>, %47, %cst_26 [1] : vector<32x64xf32> to vector<32xf32>
    %49 = vector.shape_cast %48 : vector<32xf32> to vector<32x1xf32>
    %cst_27 = arith.constant 6.400000e+01 : f32
    %50 = vector.broadcast %cst_27 : f32 to vector<32x1xf32>
    %51 = arith.divf %49, %50 : vector<32x1xf32>
    %cst_28 = arith.constant 9.99999997E-7 : f32
    %52 = vector.broadcast %cst_28 : f32 to vector<32x1xf32>
    %53 = arith.addf %51, %52 : vector<32x1xf32>
    %54 = math.rsqrt %53 : vector<32x1xf32>
    %55 = vector.broadcast %54 : vector<32x1xf32> to vector<32x64xf32>
    %56 = arith.mulf %44, %55 : vector<32x64xf32>
    %57 = vector.broadcast %46 : vector<1x64xf32> to vector<32x64xf32>
    %58 = arith.mulf %56, %57 : vector<32x64xf32>
    %c0_29 = arith.constant 0 : index
    %c0_30 = arith.constant 0 : index
    %c0_31 = arith.constant 0 : index
    %59 = vector.load %arg6[%c0_29, %c0_30, %c0_31] : memref<2x64x256xf32, #tpu.memory_space<vmem>>, vector<1x64x256xf32>
    %60 = vector.shape_cast %59 : vector<1x64x256xf32> to vector<64x256xf32>
    %cst_32 = arith.constant dense<0.000000e+00> : vector<32x256xf32>
    %61 = tpu.matmul %58, %60, %cst_32 {dimension_numbers = #tpu.dot_dimension_numbers<[1], [0], [0], [1], [0, 0, 1, 1], [], []>} : vector<32x64xf32>, vector<64x256xf32>, vector<32x256xf32> -> vector<32x256xf32>
    %62 = vector.extract_strided_slice %61 {offsets = [0, 0], sizes = [32, 128], strides = [1, 1]} : vector<32x256xf32> to vector<32x128xf32>
    %63 = vector.extract_strided_slice %61 {offsets = [0, 128], sizes = [32, 128], strides = [1, 1]} : vector<32x256xf32> to vector<32x128xf32>
    %cst_33 = arith.constant 5.000000e-01 : f32
    %64 = vector.broadcast %cst_33 : f32 to vector<32x128xf32>
    %65 = arith.mulf %64, %62 : vector<32x128xf32>
    %cst_34 = arith.constant 0.707106769 : f32
    %66 = vector.broadcast %cst_34 : f32 to vector<32x128xf32>
    %67 = arith.mulf %62, %66 : vector<32x128xf32>
    %68 = math.absf %67 : vector<32x128xf32>
    %cst_35 = arith.constant 0.327591091 : f32
    %69 = vector.broadcast %cst_35 : f32 to vector<32x128xf32>
    %70 = arith.mulf %69, %68 : vector<32x128xf32>
    %cst_36 = arith.constant 1.000000e+00 : f32
    %71 = vector.broadcast %cst_36 : f32 to vector<32x128xf32>
    %72 = arith.addf %71, %70 : vector<32x128xf32>
    %cst_37 = arith.constant 1.000000e+00 : f32
    %73 = vector.broadcast %cst_37 : f32 to vector<32x128xf32>
    %74 = arith.divf %73, %72 : vector<32x128xf32>
    %cst_38 = arith.constant 1.06140542 : f32
    %75 = vector.broadcast %cst_38 : f32 to vector<32x128xf32>
    %76 = arith.mulf %75, %74 : vector<32x128xf32>
    %cst_39 = arith.constant -1.45315206 : f32
    %77 = vector.broadcast %cst_39 : f32 to vector<32x128xf32>
    %78 = arith.addf %76, %77 : vector<32x128xf32>
    %79 = arith.mulf %78, %74 : vector<32x128xf32>
    %cst_40 = arith.constant 1.42141378 : f32
    %80 = vector.broadcast %cst_40 : f32 to vector<32x128xf32>
    %81 = arith.addf %79, %80 : vector<32x128xf32>
    %82 = arith.mulf %81, %74 : vector<32x128xf32>
    %cst_41 = arith.constant -0.284496725 : f32
    %83 = vector.broadcast %cst_41 : f32 to vector<32x128xf32>
    %84 = arith.addf %82, %83 : vector<32x128xf32>
    %85 = arith.mulf %84, %74 : vector<32x128xf32>
    %cst_42 = arith.constant 0.254829586 : f32
    %86 = vector.broadcast %cst_42 : f32 to vector<32x128xf32>
    %87 = arith.addf %85, %86 : vector<32x128xf32>
    %88 = arith.mulf %87, %74 : vector<32x128xf32>
    %89 = arith.mulf %68, %68 : vector<32x128xf32>
    %cst_43 = arith.constant 0.000000e+00 : f32
    %90 = vector.broadcast %cst_43 : f32 to vector<32x128xf32>
    %91 = arith.subf %90, %89 : vector<32x128xf32>
    %92 = math.exp %91 : vector<32x128xf32>
    %93 = arith.mulf %88, %92 : vector<32x128xf32>
    %cst_44 = arith.constant 1.000000e+00 : f32
    %94 = vector.broadcast %cst_44 : f32 to vector<32x128xf32>
    %95 = arith.subf %94, %93 : vector<32x128xf32>
    %cst_45 = arith.constant 0.000000e+00 : f32
    %96 = vector.broadcast %cst_45 : f32 to vector<32x128xf32>
    %97 = arith.cmpf olt, %67, %96 : vector<32x128xf32>
    %cst_46 = arith.constant 0.000000e+00 : f32
    %98 = vector.broadcast %cst_46 : f32 to vector<32x128xf32>
    %99 = arith.subf %98, %95 : vector<32x128xf32>
    %100 = arith.select %97, %99, %95 : vector<32x128xi1>, vector<32x128xf32>
    %cst_47 = arith.constant 1.000000e+00 : f32
    %101 = vector.broadcast %cst_47 : f32 to vector<32x128xf32>
    %102 = arith.addf %101, %100 : vector<32x128xf32>
    %103 = arith.mulf %65, %102 : vector<32x128xf32>
    %104 = arith.mulf %103, %63 : vector<32x128xf32>
    %c0_48 = arith.constant 0 : index
    %c0_49 = arith.constant 0 : index
    %c0_50 = arith.constant 0 : index
    %105 = vector.load %arg7[%c0_48, %c0_49, %c0_50] : memref<2x128x64xf32, #tpu.memory_space<vmem>>, vector<1x128x64xf32>
    %106 = vector.shape_cast %105 : vector<1x128x64xf32> to vector<128x64xf32>
    %cst_51 = arith.constant dense<0.000000e+00> : vector<32x64xf32>
    %107 = tpu.matmul %104, %106, %cst_51 {dimension_numbers = #tpu.dot_dimension_numbers<[1], [0], [0], [1], [0, 0, 1, 1], [], []>} : vector<32x128xf32>, vector<128x64xf32>, vector<32x64xf32> -> vector<32x64xf32>
    %108 = arith.addf %44, %107 : vector<32x64xf32>
    %c1 = arith.constant 1 : index
    %c0_52 = arith.constant 0 : index
    %c0_53 = arith.constant 0 : index
    %109 = vector.load %arg5[%c1, %c0_52, %c0_53] : memref<2x1x64xf32, #tpu.memory_space<vmem>>, vector<1x1x64xf32>
    %110 = vector.shape_cast %109 : vector<1x1x64xf32> to vector<1x64xf32>
    %111 = arith.mulf %108, %108 : vector<32x64xf32>
    %cst_54 = arith.constant dense<0.000000e+00> : vector<32xf32>
    %112 = vector.multi_reduction <add>, %111, %cst_54 [1] : vector<32x64xf32> to vector<32xf32>
    %113 = vector.shape_cast %112 : vector<32xf32> to vector<32x1xf32>
    %cst_55 = arith.constant 6.400000e+01 : f32
    %114 = vector.broadcast %cst_55 : f32 to vector<32x1xf32>
    %115 = arith.divf %113, %114 : vector<32x1xf32>
    %cst_56 = arith.constant 9.99999997E-7 : f32
    %116 = vector.broadcast %cst_56 : f32 to vector<32x1xf32>
    %117 = arith.addf %115, %116 : vector<32x1xf32>
    %118 = math.rsqrt %117 : vector<32x1xf32>
    %119 = vector.broadcast %118 : vector<32x1xf32> to vector<32x64xf32>
    %120 = arith.mulf %108, %119 : vector<32x64xf32>
    %121 = vector.broadcast %110 : vector<1x64xf32> to vector<32x64xf32>
    %122 = arith.mulf %120, %121 : vector<32x64xf32>
    %c1_57 = arith.constant 1 : index
    %c0_58 = arith.constant 0 : index
    %c0_59 = arith.constant 0 : index
    %123 = vector.load %arg3[%c1_57, %c0_58, %c0_59] : memref<2x64x192xf32, #tpu.memory_space<vmem>>, vector<1x64x192xf32>
    %124 = vector.shape_cast %123 : vector<1x64x192xf32> to vector<64x192xf32>
    %cst_60 = arith.constant dense<0.000000e+00> : vector<32x192xf32>
    %125 = tpu.matmul %122, %124, %cst_60 {dimension_numbers = #tpu.dot_dimension_numbers<[1], [0], [0], [1], [0, 0, 1, 1], [], []>} : vector<32x64xf32>, vector<64x192xf32>, vector<32x192xf32> -> vector<32x192xf32>
    %126 = vector.extract_strided_slice %125 {offsets = [0, 0], sizes = [32, 64], strides = [1, 1]} : vector<32x192xf32> to vector<32x64xf32>
    %127 = vector.extract_strided_slice %125 {offsets = [0, 64], sizes = [32, 64], strides = [1, 1]} : vector<32x192xf32> to vector<32x64xf32>
    %128 = vector.extract_strided_slice %125 {offsets = [0, 128], sizes = [32, 64], strides = [1, 1]} : vector<32x192xf32> to vector<32x64xf32>
    %129 = tpu.concatenate %126, %126, %126, %126, %126, %126, %126, %126 in 0 : vector<32x64xf32>, vector<32x64xf32>, vector<32x64xf32>, vector<32x64xf32>, vector<32x64xf32>, vector<32x64xf32>, vector<32x64xf32>, vector<32x64xf32> -> vector<256x64xf32>
    %130 = arith.mulf %129, %2 : vector<256x64xf32>
    %cst_61 = arith.constant dense<0.000000e+00> : vector<256x32xf32>
    %131 = tpu.matmul %130, %127, %cst_61 {dimension_numbers = #tpu.dot_dimension_numbers<[1], [1], [0], [0], [0, 0, 1, 0], [], []>} : vector<256x64xf32>, vector<32x64xf32>, vector<256x32xf32> -> vector<256x32xf32>
    %132 = arith.addf %131, %1 : vector<256x32xf32>
    %cst_62 = arith.constant dense<0xFF800000> : vector<256xf32>
    %133 = vector.multi_reduction <maximumf>, %132, %cst_62 [1] : vector<256x32xf32> to vector<256xf32>
    %134 = vector.shape_cast %133 : vector<256xf32> to vector<256x1xf32>
    %135 = vector.broadcast %134 : vector<256x1xf32> to vector<256x32xf32>
    %136 = arith.subf %132, %135 : vector<256x32xf32>
    %137 = math.exp %136 : vector<256x32xf32>
    %cst_63 = arith.constant dense<0.000000e+00> : vector<256xf32>
    %138 = vector.multi_reduction <add>, %137, %cst_63 [1] : vector<256x32xf32> to vector<256xf32>
    %139 = vector.shape_cast %138 : vector<256xf32> to vector<256x1xf32>
    %140 = tpu.reciprocal %139 {approx = true} : vector<256x1xf32> -> vector<256x1xf32>
    %141 = vector.broadcast %140 : vector<256x1xf32> to vector<256x32xf32>
    %142 = arith.mulf %137, %141 : vector<256x32xf32>
    %cst_64 = arith.constant dense<0.000000e+00> : vector<256x64xf32>
    %143 = tpu.matmul %142, %128, %cst_64 {dimension_numbers = #tpu.dot_dimension_numbers<[1], [0], [0], [1], [0, 0, 1, 1], [], []>} : vector<256x32xf32>, vector<32x64xf32>, vector<256x64xf32> -> vector<256x64xf32>
    %144 = arith.mulf %143, %2 : vector<256x64xf32>
    %145 = vector.shape_cast %144 : vector<256x64xf32> to vector<8x32x64xf32>
    %cst_65 = arith.constant dense<0.000000e+00> : vector<32x64xf32>
    %146 = vector.multi_reduction <add>, %145, %cst_65 [0] : vector<8x32x64xf32> to vector<32x64xf32>
    %c1_66 = arith.constant 1 : index
    %c0_67 = arith.constant 0 : index
    %c0_68 = arith.constant 0 : index
    %147 = vector.load %arg4[%c1_66, %c0_67, %c0_68] : memref<2x64x64xf32, #tpu.memory_space<vmem>>, vector<1x64x64xf32>
    %148 = vector.shape_cast %147 : vector<1x64x64xf32> to vector<64x64xf32>
    %cst_69 = arith.constant dense<0.000000e+00> : vector<32x64xf32>
    %149 = tpu.matmul %146, %148, %cst_69 {dimension_numbers = #tpu.dot_dimension_numbers<[1], [0], [0], [1], [0, 0, 1, 1], [], []>} : vector<32x64xf32>, vector<64x64xf32>, vector<32x64xf32> -> vector<32x64xf32>
    %150 = arith.addf %108, %149 : vector<32x64xf32>
    %c1_70 = arith.constant 1 : index
    %c0_71 = arith.constant 0 : index
    %c0_72 = arith.constant 0 : index
    %151 = vector.load %arg8[%c1_70, %c0_71, %c0_72] : memref<2x1x64xf32, #tpu.memory_space<vmem>>, vector<1x1x64xf32>
    %152 = vector.shape_cast %151 : vector<1x1x64xf32> to vector<1x64xf32>
    %153 = arith.mulf %150, %150 : vector<32x64xf32>
    %cst_73 = arith.constant dense<0.000000e+00> : vector<32xf32>
    %154 = vector.multi_reduction <add>, %153, %cst_73 [1] : vector<32x64xf32> to vector<32xf32>
    %155 = vector.shape_cast %154 : vector<32xf32> to vector<32x1xf32>
    %cst_74 = arith.constant 6.400000e+01 : f32
    %156 = vector.broadcast %cst_74 : f32 to vector<32x1xf32>
    %157 = arith.divf %155, %156 : vector<32x1xf32>
    %cst_75 = arith.constant 9.99999997E-7 : f32
    %158 = vector.broadcast %cst_75 : f32 to vector<32x1xf32>
    %159 = arith.addf %157, %158 : vector<32x1xf32>
    %160 = math.rsqrt %159 : vector<32x1xf32>
    %161 = vector.broadcast %160 : vector<32x1xf32> to vector<32x64xf32>
    %162 = arith.mulf %150, %161 : vector<32x64xf32>
    %163 = vector.broadcast %152 : vector<1x64xf32> to vector<32x64xf32>
    %164 = arith.mulf %162, %163 : vector<32x64xf32>
    %c1_76 = arith.constant 1 : index
    %c0_77 = arith.constant 0 : index
    %c0_78 = arith.constant 0 : index
    %165 = vector.load %arg6[%c1_76, %c0_77, %c0_78] : memref<2x64x256xf32, #tpu.memory_space<vmem>>, vector<1x64x256xf32>
    %166 = vector.shape_cast %165 : vector<1x64x256xf32> to vector<64x256xf32>
    %cst_79 = arith.constant dense<0.000000e+00> : vector<32x256xf32>
    %167 = tpu.matmul %164, %166, %cst_79 {dimension_numbers = #tpu.dot_dimension_numbers<[1], [0], [0], [1], [0, 0, 1, 1], [], []>} : vector<32x64xf32>, vector<64x256xf32>, vector<32x256xf32> -> vector<32x256xf32>
    %168 = vector.extract_strided_slice %167 {offsets = [0, 0], sizes = [32, 128], strides = [1, 1]} : vector<32x256xf32> to vector<32x128xf32>
    %169 = vector.extract_strided_slice %167 {offsets = [0, 128], sizes = [32, 128], strides = [1, 1]} : vector<32x256xf32> to vector<32x128xf32>
    %cst_80 = arith.constant 5.000000e-01 : f32
    %170 = vector.broadcast %cst_80 : f32 to vector<32x128xf32>
    %171 = arith.mulf %170, %168 : vector<32x128xf32>
    %cst_81 = arith.constant 0.707106769 : f32
    %172 = vector.broadcast %cst_81 : f32 to vector<32x128xf32>
    %173 = arith.mulf %168, %172 : vector<32x128xf32>
    %174 = math.absf %173 : vector<32x128xf32>
    %cst_82 = arith.constant 0.327591091 : f32
    %175 = vector.broadcast %cst_82 : f32 to vector<32x128xf32>
    %176 = arith.mulf %175, %174 : vector<32x128xf32>
    %cst_83 = arith.constant 1.000000e+00 : f32
    %177 = vector.broadcast %cst_83 : f32 to vector<32x128xf32>
    %178 = arith.addf %177, %176 : vector<32x128xf32>
    %cst_84 = arith.constant 1.000000e+00 : f32
    %179 = vector.broadcast %cst_84 : f32 to vector<32x128xf32>
    %180 = arith.divf %179, %178 : vector<32x128xf32>
    %cst_85 = arith.constant 1.06140542 : f32
    %181 = vector.broadcast %cst_85 : f32 to vector<32x128xf32>
    %182 = arith.mulf %181, %180 : vector<32x128xf32>
    %cst_86 = arith.constant -1.45315206 : f32
    %183 = vector.broadcast %cst_86 : f32 to vector<32x128xf32>
    %184 = arith.addf %182, %183 : vector<32x128xf32>
    %185 = arith.mulf %184, %180 : vector<32x128xf32>
    %cst_87 = arith.constant 1.42141378 : f32
    %186 = vector.broadcast %cst_87 : f32 to vector<32x128xf32>
    %187 = arith.addf %185, %186 : vector<32x128xf32>
    %188 = arith.mulf %187, %180 : vector<32x128xf32>
    %cst_88 = arith.constant -0.284496725 : f32
    %189 = vector.broadcast %cst_88 : f32 to vector<32x128xf32>
    %190 = arith.addf %188, %189 : vector<32x128xf32>
    %191 = arith.mulf %190, %180 : vector<32x128xf32>
    %cst_89 = arith.constant 0.254829586 : f32
    %192 = vector.broadcast %cst_89 : f32 to vector<32x128xf32>
    %193 = arith.addf %191, %192 : vector<32x128xf32>
    %194 = arith.mulf %193, %180 : vector<32x128xf32>
    %195 = arith.mulf %174, %174 : vector<32x128xf32>
    %cst_90 = arith.constant 0.000000e+00 : f32
    %196 = vector.broadcast %cst_90 : f32 to vector<32x128xf32>
    %197 = arith.subf %196, %195 : vector<32x128xf32>
    %198 = math.exp %197 : vector<32x128xf32>
    %199 = arith.mulf %194, %198 : vector<32x128xf32>
    %cst_91 = arith.constant 1.000000e+00 : f32
    %200 = vector.broadcast %cst_91 : f32 to vector<32x128xf32>
    %201 = arith.subf %200, %199 : vector<32x128xf32>
    %cst_92 = arith.constant 0.000000e+00 : f32
    %202 = vector.broadcast %cst_92 : f32 to vector<32x128xf32>
    %203 = arith.cmpf olt, %173, %202 : vector<32x128xf32>
    %cst_93 = arith.constant 0.000000e+00 : f32
    %204 = vector.broadcast %cst_93 : f32 to vector<32x128xf32>
    %205 = arith.subf %204, %201 : vector<32x128xf32>
    %206 = arith.select %203, %205, %201 : vector<32x128xi1>, vector<32x128xf32>
    %cst_94 = arith.constant 1.000000e+00 : f32
    %207 = vector.broadcast %cst_94 : f32 to vector<32x128xf32>
    %208 = arith.addf %207, %206 : vector<32x128xf32>
    %209 = arith.mulf %171, %208 : vector<32x128xf32>
    %210 = arith.mulf %209, %169 : vector<32x128xf32>
    %c1_95 = arith.constant 1 : index
    %c0_96 = arith.constant 0 : index
    %c0_97 = arith.constant 0 : index
    %211 = vector.load %arg7[%c1_95, %c0_96, %c0_97] : memref<2x128x64xf32, #tpu.memory_space<vmem>>, vector<1x128x64xf32>
    %212 = vector.shape_cast %211 : vector<1x128x64xf32> to vector<128x64xf32>
    %cst_98 = arith.constant dense<0.000000e+00> : vector<32x64xf32>
    %213 = tpu.matmul %210, %212, %cst_98 {dimension_numbers = #tpu.dot_dimension_numbers<[1], [0], [0], [1], [0, 0, 1, 1], [], []>} : vector<32x128xf32>, vector<128x64xf32>, vector<32x64xf32> -> vector<32x64xf32>
    %214 = arith.addf %150, %213 : vector<32x64xf32>
    %c0_99 = arith.constant 0 : index
    %c0_100 = arith.constant 0 : index
    %215 = vector.load %arg9[%c0_99, %c0_100] : memref<1x64xf32, #tpu.memory_space<vmem>>, vector<1x64xf32>
    %216 = arith.mulf %214, %214 : vector<32x64xf32>
    %cst_101 = arith.constant dense<0.000000e+00> : vector<32xf32>
    %217 = vector.multi_reduction <add>, %216, %cst_101 [1] : vector<32x64xf32> to vector<32xf32>
    %218 = vector.shape_cast %217 : vector<32xf32> to vector<32x1xf32>
    %cst_102 = arith.constant 6.400000e+01 : f32
    %219 = vector.broadcast %cst_102 : f32 to vector<32x1xf32>
    %220 = arith.divf %218, %219 : vector<32x1xf32>
    %cst_103 = arith.constant 9.99999997E-7 : f32
    %221 = vector.broadcast %cst_103 : f32 to vector<32x1xf32>
    %222 = arith.addf %220, %221 : vector<32x1xf32>
    %223 = math.rsqrt %222 : vector<32x1xf32>
    %224 = vector.broadcast %223 : vector<32x1xf32> to vector<32x64xf32>
    %225 = arith.mulf %214, %224 : vector<32x64xf32>
    %226 = vector.broadcast %215 : vector<1x64xf32> to vector<32x64xf32>
    %227 = arith.mulf %225, %226 : vector<32x64xf32>
    %c0_104 = arith.constant 0 : index
    %c0_105 = arith.constant 0 : index
    %228 = vector.load %arg10[%c0_104, %c0_105] : memref<32x64xf32, #tpu.memory_space<vmem>>, vector<32x64xf32>
    tpu.vector_store %arg10[%c0_104, %c0_105], %227 {strides = array<i32>} : memref<32x64xf32, #tpu.memory_space<vmem>>, vector<32x64xf32>,
    return
  }
}

</mosaic_0001>

<bundles_post_ra>
// kernel: t5_stack_forward.1
= control target key start
LH: loop header
LB: loop body
LE: loop exit
PB: predicated region body
PF: predicated region fallthrough
CT: control target
= control target key end

     0   :  { %vm109_vm0 = vcmask 523264   ;;  %s7453_s0 = inlined_call_operand.vmem [shape: f32[32,64], index: 0, kind: input, shape index: {}]   ;;  %s7454_s1 = inlined_call_operand.vmem [shape: f32[256,32], index: 1, kind: input, shape index: {}]   ;;  %s7455_s2 = inlined_call_operand.vmem [shape: f32[256,64], index: 2, kind: input, shape index: {}]   ;;  %s7456_s3 = inlined_call_operand.vmem [shape: f32[2,64,192], index: 3, kind: input, shape index: {}]   ;;  %s7457_s4 = inlined_call_operand.vmem [shape: f32[2,64,64], index: 4, kind: input, shape index: {}]   ;;  %s7458_s5 = inlined_call_operand.vmem [shape: f32[2,1,64], index: 5, kind: input, shape index: {}]   ;;  %s7459_s6 = inlined_call_operand.vmem [shape: f32[2,64,256], index: 6, kind: input, shape index: {}]   ;;  %s7460_s7 = inlined_call_operand.vmem [shape: f32[2,128,64], index: 7, kind: input, shape index: {}]   ;;  %s7461_s8 = inlined_call_operand.vmem [shape: f32[2,1,64], index: 8, kind: input, shape index: {}]   ;;  %s7462_s9 = inlined_call_operand.vmem [shape: f32[1,64], index: 9, kind: input, shape index: {}]   ;;  %s7463_s10 = inlined_call_operand.hbm [shape: f32[32,64], index: 10, kind: output, shape index: {}]  }
   0x1   :  { %v5263_v0 = vld [vmem:[%s7453_s0] sm:$0xff]  ;;  %v5268_v1 = vld [vmem:[%s7453_s0 + $0x8] sm:$0xff]  ;;  %v5273_v2 = vld [vmem:[%s7453_s0 + $0x10] sm:$0xff] }
   0x2   :  { %v105_v3 = vmul.f32 %v5263_v0, %v5263_v0  ;;  %v106_v4 = vmul.f32 %v5268_v1, %v5268_v1  ;;  %v107_v5 = vmul.f32 %v5273_v2, %v5273_v2  ;;  %v5284_v6 = vld [vmem:[%s7453_s0 + $0x18] sm:$0xff] }
   0x3   :  { %15 = vsyncpa [#allocation3], 0  ;;  %v108_v7 = vmul.f32 %v5284_v6, %v5284_v6  ;;  %v150_v12 = vld [vmem:[%s7456_s3 + $0x8] sm:$0xff]  ;;  %v152_v13 = vld [vmem:[%s7456_s3 + $0x18] sm:$0xff]  ;;  %v7464_v34 = vmov 0.0   ;;  %s5201_s19 = smov 64  }
   0x4   :  { %v110_v8 = vsel %vm109_vm0, %v105_v3, 0.0  ;;  %v116_v9 = vsel %vm109_vm0, %v107_v5, 0.0  ;;  %v113_v10 = vsel %vm109_vm0, %v106_v4, 0.0  ;;  %v4519_v14 = vpack.c.bf16 %v152_v13, %v150_v12  ;;  %v149_v15 = vld [vmem:[%s7456_s3] sm:$0xff]  ;;  %v151_v16 = vld [vmem:[%s7456_s3 + $0x10] sm:$0xff]  ;;  %v154_v18 = vld [vmem:[%s7456_s3 + $0x28] sm:$0xff]  ;;  %241 = vmatprep.mubr.f32.mxu0 %v7464_v34 }
   0x5   :  { %111 = vadd.xlane.f32.xlu0 %v110_v8  ;;  %117 = vadd.xlane.f32.xlu1 %v116_v9  ;;  %v119_v11 = vsel %vm109_vm0, %v108_v7, 0.0  ;;  %v4521_v17 = vpack.c.bf16 %v151_v16, %v149_v15  ;;  %v156_v19 = vld [vmem:[%s7456_s3 + $0x38] sm:$0xff]  ;;  %v153_v21 = vld [vmem:[%s7456_s3 + $0x20] sm:$0xff]  ;;  %v155_v22 = vld [vmem:[%s7456_s3 + $0x30] sm:$0xff]  ;;  %vm639_vm2 = vcmask 261120   ;;  %s5202_s29 = smov [#allocation2]  }
   0x6   :  { %4520 = vmatprep.subr.bf16.mxu0 %v4519_v14  ;;  %v4523_v20 = vpack.c.bf16 %v156_v19, %v154_v18  ;;  %v4525_v23 = vpack.c.bf16 %v155_v22, %v153_v21  ;;  %v158_v24 = vld [vmem:[%s7456_s3 + $0x48] sm:$0xff]  ;;  %v160_v25 = vld [vmem:[%s7456_s3 + $0x58] sm:$0xff]  ;;  %v157_v27 = vld [vmem:[%s7456_s3 + $0x40] sm:$0xff]  ;;  %s3733_s30 = sshll.u32 %s5202_s29, 4  ;;  %s3734_s30 = int_to_ptr.vmem [resolvable:$true] %s3733_s30 }
   0x7   :  { %4522 = vmatpush1.bf16.msra.mxu0 %v4521_v17  ;;  %v4527_v26 = vpack.c.bf16 %v160_v25, %v158_v24  ;;  %v159_v28 = vld [vmem:[%s7456_s3 + $0x50] sm:$0xff]  ;;  %v162_v29 = vld [vmem:[%s7456_s3 + $0x68] sm:$0xff]  ;;  %v164_v31 = vld [vmem:[%s7456_s3 + $0x78] sm:$0xff]  ;;  %p5181_p1 = scmp.lt.s32.totalorder %s3734_s30, %s3734_s30 }
   0x8   :  { %4524 = vmatprep.subr.bf16.mxu0 %v4523_v20  ;;  %v4529_v30 = vpack.c.bf16 %v159_v28, %v157_v27  ;;  %v161_v32 = vld [vmem:[%s7456_s3 + $0x60] sm:$0xff]  ;;  %v163_v33 = vld [vmem:[%s7456_s3 + $0x70] sm:$0xff]  ;;  %v4531_v35 = vpack.c.bf16 %v164_v31, %v162_v29  ;;  %vm5381_vm1 = vmpackc.low %vm109_vm0, %vm109_vm0 }
   0x9   :  { %114 = vadd.xlane.f32.xlu0 %v113_v10  ;;  %120 = vadd.xlane.f32.xlu1 %v119_v11  ;;  %v4533_v36 = vpack.c.bf16 %v163_v33, %v161_v32  ;;  %v3744_v50 = vld [vmem:[%s7458_s5] ss:$0 sm:$0xff]  ;;  %v77_v24 = vld [vmem:[%s7455_s2 + $0x28] sm:$0xff]  ;;  %v74_v25 = vld [vmem:[%s7455_s2 + $0x10] sm:$0xff] }
   0xa   :  { %v72_v62 = vld [vmem:[%s7455_s2] sm:$0xff]  ;;  %v75_v31 = vld [vmem:[%s7455_s2 + $0x18] sm:$0xff] }
   0xb   :  { %4526 = vmatpush1.bf16.msra.mxu0 %v4525_v23  ;;  %v76_v63 = vld [vmem:[%s7455_s2 + $0x20] sm:$0xff]  ;;  %v73_v23 = vld [vmem:[%s7455_s2 + $0x8] sm:$0xff]  ;;  %v79_v32 = vld [vmem:[%s7455_s2 + $0x38] sm:$0xff] }
   0xc   :  { %4528 = vmatprep.subr.bf16.mxu0 %v4527_v26  ;;  %v78_v26 = vld [vmem:[%s7455_s2 + $0x30] sm:$0xff]  ;;  %v80_v33 = vld [vmem:[%s7455_s2 + $0x40] sm:$0xff] }
   0xf   :  { %4530 = vmatpush1.bf16.msra.mxu0 %v4529_v30 }
  0x10   :  { %4532 = vmatprep.subr.bf16.mxu0 %v4531_v35 }
  0x13   :  { %4534 = vmatpush1.bf16.msra.mxu0 %v4533_v36 }
  0x92   :  { %v112_v37 = vpop.xlane.xlu0 %111  ;;  %v118_v38 = vpop.xlane.xlu1 %117 }
  0x93   :  { %v123_v39 = vmul.f32 0.015625, %v112_v37  ;;  %v125_v40 = vmul.f32 0.015625, %v118_v38  ;;  %v81_v38 = vld [vmem:[%s7455_s2 + $0x48] sm:$0xff] }
  0x95   :  { %v127_v41 = vadd.f32 1e-06, %v123_v39  ;;  %v129_v42 = vadd.f32 1e-06, %v125_v40  ;;  %v82_v39 = vld [vmem:[%s7455_s2 + $0x50] sm:$0xff] }
  0x96   :  { %v115_v43 = vpop.xlane.xlu0 %114  ;;  %v121_v44 = vpop.xlane.xlu1 %120 }
  0x97   :  { %4748 = vrsqrt.f32 %v127_v41  ;;  %v124_v45 = vmul.f32 0.015625, %v115_v43  ;;  %v126_v46 = vmul.f32 0.015625, %v121_v44  ;;  %v84_v43 = vld [vmem:[%s7455_s2 + $0x60] sm:$0xff] }
  0x98   :  { %4750 = vrsqrt.f32 %v129_v42  ;;  %v83_v42 = vld [vmem:[%s7455_s2 + $0x58] sm:$0xff] }
  0x99   :  { %v128_v47 = vadd.f32 1e-06, %v124_v45  ;;  %v130_v48 = vadd.f32 1e-06, %v126_v46  ;;  %v85_v46 = vld [vmem:[%s7455_s2 + $0x68] sm:$0xff] }
  0x9b   :  { %4752 = vrsqrt.f32 %v128_v47  ;;  %v86_v47 = vld [vmem:[%s7455_s2 + $0x70] sm:$0xff] }
  0x9c   :  { %4754 = vrsqrt.f32 %v130_v48 }
  0xa1   :  { %v4749_v49 = vpop.eup %4748 }
  0xa2   :  { %v135_v51 = vmul.f32 %v4749_v49, %v5263_v0  ;;  %v4751_v52 = vpop.eup %4750 }
  0xa3   :  { %v137_v56 = vmul.f32 %v4751_v52, %v5273_v2 }
  0xa4   :  { %v145_v53 = vmul.f32 %v3744_v50, %v135_v51  ;;  %v88_v51 = vld [vmem:[%s7455_s2 + $0x80] sm:$0xff] }
  0xa5   :  { %v4753_v54 = vpop.eup %4752  ;;  %v147_v59 = vmul.f32 %v3744_v50, %v137_v56 }
  0xa6   :  { %3745 = vmatmul.mubr.msk.f32.vlgmr.msra.gmra.mrb[0].mxu0 %vm109_vm0, %v145_v53  ;;  %v136_v55 = vmul.f32 %v4753_v54, %v5268_v1  ;;  %v4755_v57 = vpop.eup %4754  ;;  %v89_v54 = vld [vmem:[%s7455_s2 + $0x88] sm:$0xff] }
  0xa7   :  { %247 = vmatprep.mubr.f32.mxu0 %v7464_v34  ;;  %v138_v60 = vmul.f32 %v4755_v57, %v5284_v6 }
  0xa8   :  { %v146_v58 = vmul.f32 %v3744_v50, %v136_v55  ;;  %v90_v55 = vld [vmem:[%s7455_s2 + $0x90] sm:$0xff] }
  0xa9   :  { %v148_v61 = vmul.f32 %v3744_v50, %v138_v60  ;;  %v87_v50 = vld [vmem:[%s7455_s2 + $0x78] sm:$0xff] }
  0xaa   :  { %3746 = vmatmul.mubr.msk.f32.gmra.mrb[2].mxu0 %vm109_vm0, %v146_v58  ;;  %v91_v58 = vld [vmem:[%s7455_s2 + $0x98] sm:$0xff] }
  0xab   :  { %253 = vmatprep.mubr.f32.mxu0 %v7464_v34 }
  0xae   :  { %3747 = vmatmul.mubr.msk.f32.gmra.mrb[4].mxu0 %vm109_vm0, %v147_v59  ;;  %v92_v59 = vld [vmem:[%s7455_s2 + $0xa0] sm:$0xff] }
  0xaf   :  { %259 = vmatprep.mubr.f32.mxu0 %v7464_v34 }
  0xb2   :  { %3748 = vmatmul.mubr.msk.f32.gmra.mrb[6].mxu0 %vm109_vm0, %v148_v61 }
 0x179   :  { %v5361_v0 = vpop.f32.mrb[0].mxu0 }
 0x17a   :  { %v245_v1 = vpop.f32.mrb[1].mxu0  ;;  %v266_v2 = vmul.f32 %v5361_v0, %v72_v62  ;;  %v270_v3 = vmul.f32 %v5361_v0, %v76_v63  ;;  %v274_v37 = vmul.f32 %v5361_v0, %v80_v33  ;;  %v278_v45 = vmul.f32 %v5361_v0, %v84_v43  ;;  %v93_v62 = vld [vmem:[%s7455_s2 + $0xa8] sm:$0xff]  ;;  %v94_v63 = vld [vmem:[%s7455_s2 + $0xb0] sm:$0xff] }
 0x17b   :  { %v282_v53 = vmul.f32 %v5361_v0, %v88_v51  ;;  %v286_v61 = vmul.f32 %v5361_v0, %v92_v59 }
 0x17c   :  { %4183 = vmatprep.mubr.msk.f32.mxu0 %vm109_vm0, %v266_v2  ;;  %4189 = vmatprep.mubr.msk.f32.mxu1 %vm109_vm0, %v270_v3  ;;  %v95_v3 = vld [vmem:[%s7455_s2 + $0xb8] sm:$0xff] }
 0x17d   :  { %v5367_v4 = vpop.f32.mrb[2].mxu0 }
 0x17e   :  { %v251_v5 = vpop.f32.mrb[3].mxu0  ;;  %v4728_v6 = vpack.i.bf16 %v5367_v4, %v5361_v0  ;;  %v267_v27 = vmul.f32 %v5367_v4, %v73_v23  ;;  %v271_v28 = vmul.f32 %v5367_v4, %v77_v24  ;;  %v275_v40 = vmul.f32 %v5367_v4, %v81_v38  ;;  %v41_v24 = vld [vmem:[%s7454_s1 + $0x8] sm:$0xff] }
 0x17f   :  { %v4547_v7 = vpack.c.bf16 %v251_v5, %v245_v1  ;;  %v279_v48 = vmul.f32 %v5367_v4, %v85_v46  ;;  %v283_v56 = vmul.f32 %v5367_v4, %v89_v54  ;;  %v287_v1 = vmul.f32 %v5367_v4, %v93_v62  ;;  %v96_v5 = vld [vmem:[%s7455_s2 + $0xc0] sm:$0xff] }
 0x180   :  { %4729 = vrot.lane.b32.xlu0 %v4728_v6, %s5201_s19 }
 0x181   :  { %v5372_v8 = vpop.f32.mrb[4].mxu0 }
 0x182   :  { %v257_v9 = vpop.f32.mrb[5].mxu0  ;;  %v268_v29 = vmul.f32 %v5372_v8, %v74_v25  ;;  %v272_v30 = vmul.f32 %v5372_v8, %v78_v26  ;;  %v276_v41 = vmul.f32 %v5372_v8, %v82_v39  ;;  %v280_v49 = vmul.f32 %v5372_v8, %v86_v47  ;;  %v47_v47 = vld [vmem:[%s7454_s1 + $0x38] sm:$0xff] }
 0x183   :  { %v284_v57 = vmul.f32 %v5372_v8, %v90_v55  ;;  %v288_v2 = vmul.f32 %v5372_v8, %v94_v63  ;;  %v49_v55 = vld [vmem:[%s7454_s1 + $0x48] sm:$0xff]  ;;  %v51_v63 = vld [vmem:[%s7454_s1 + $0x58] sm:$0xff] }
 0x185   :  { %v5374_v10 = vpop.f32.mrb[6].mxu0 }
 0x186   :  { %v263_v11 = vpop.f32.mrb[7].mxu0  ;;  %v4733_v12 = vpack.i.bf16 %v5374_v10, %v5372_v8  ;;  %v269_v35 = vmul.f32 %v5374_v10, %v75_v31  ;;  %v273_v36 = vmul.f32 %v5374_v10, %v79_v32  ;;  %v277_v44 = vmul.f32 %v5374_v10, %v83_v42  ;;  %v42_v31 = vld [vmem:[%s7454_s1 + $0x10] sm:$0xff] }
 0x187   :  { %v4551_v13 = vpack.c.bf16 %v263_v11, %v257_v9  ;;  %v281_v52 = vmul.f32 %v5374_v10, %v87_v50  ;;  %v285_v60 = vmul.f32 %v5374_v10, %v91_v58  ;;  %v289_v6 = vmul.f32 %v5374_v10, %v95_v3  ;;  %v97_v9 = vld [vmem:[%s7455_s2 + $0xc8] sm:$0xff]  ;;  %v98_v11 = vld [vmem:[%s7455_s2 + $0xd0] sm:$0xff] }
 0x188   :  { %4734 = vrot.lane.b32.xlu1 %v4733_v12, %s5201_s19  ;;  %v291_v12 = vmul.f32 %v5367_v4, %v97_v9 }
 0x1f2   :  { %v4730_v14 = vpop.permute.xlu0 %4729 }
 0x1f3   :  { %v4732_v15 = vunpack.i.h.bf16 %v4730_v14  ;;  %v4731_v16 = vunpack.i.l.bf16 %v4730_v14  ;;  %v99_v14 = vld [vmem:[%s7455_s2 + $0xd8] sm:$0xff] }
 0x1f5   :  { %v4535_v18 = vpack.c.bf16 %v4732_v15, %v4731_v16  ;;  %v100_v15 = vld [vmem:[%s7455_s2 + $0xe0] sm:$0xff]  ;;  %v293_v16 = vmul.f32 %v5374_v10, %v99_v14 }
 0x1f7   :  { %4537 = vmatprep.subr.msk.bf16.mxu0 %vm5381_vm1, %v4535_v18  ;;  %4719 = vmatprep.subr.msk.bf16.mxu1 %vm5381_vm1, %v4535_v18 }
 0x1f8   :  { %4540 = vmatpush3.bf16.xpose.msk.msra.mxu0 %vm5381_vm1, %v4535_v18  ;;  %4721 = vmatpush3.bf16.xpose.msk.msra.mxu1 %vm5381_vm1, %v4535_v18  ;;  %v294_v18 = vmul.f32 %v5361_v0, %v100_v15 }
 0x1fa   :  { %v4735_v19 = vpop.permute.xlu1 %4734 }
 0x1fb   :  { %v4737_v20 = vunpack.i.h.bf16 %v4735_v19  ;;  %v4736_v21 = vunpack.i.l.bf16 %v4735_v19  ;;  %v101_v19 = vld [vmem:[%s7455_s2 + $0xe8] sm:$0xff] }
 0x1fd   :  { %v4541_v22 = vpack.c.bf16 %v4737_v20, %v4736_v21  ;;  %v102_v20 = vld [vmem:[%s7455_s2 + $0xf0] sm:$0xff]  ;;  %v295_v21 = vmul.f32 %v5367_v4, %v101_v19  ;;  %v40_v4 = vld [vmem:[%s7454_s1] sm:$0xff] }
 0x1ff   :  { %4543 = vmatprep.subr.msk.bf16.mxu0 %vm5381_vm1, %v4541_v22  ;;  %4720 = vmatprep.subr.msk.bf16.mxu1 %vm5381_vm1, %v4541_v22 }
 0x200   :  { %4546 = vmatpush3.bf16.xpose.msk.msra.mxu0 %vm5381_vm1, %v4541_v22  ;;  %4722 = vmatpush3.bf16.xpose.msk.msra.mxu1 %vm5381_vm1, %v4541_v22  ;;  %v296_v22 = vmul.f32 %v5372_v8, %v102_v20  ;;  %v55_v20 = vld [vmem:[%s7454_s1 + $0x78] sm:$0xff] }
 0x201   :  { %4548 = vmatprep.subr.bf16.mxu0 %v4547_v7 }
 0x207   :  { %4184 = vmatmul.mubr.msk.f32.vlgmr.msra.gmra.mrb[8].mxu0 %vm109_vm0, %v267_v27  ;;  %4190 = vmatmul.mubr.msk.f32.vlgmr.msra.gmra.mrb[0].mxu1 %vm109_vm0, %v271_v28 }
 0x208   :  { %4186 = vmatprep.mubr.msk.f32.mxu0 %vm109_vm0, %v268_v29  ;;  %4192 = vmatprep.mubr.msk.f32.mxu1 %vm109_vm0, %v272_v30 }
 0x209   :  { %4550 = vmatpush3.bf16.msra.mxu0 %v4547_v7  ;;  %v290_v7 = vmul.f32 %v5361_v0, %v96_v5  ;;  %v103_v0 = vld [vmem:[%s7455_s2 + $0xf8] sm:$0xff] }
 0x20a   :  { %4552 = vmatprep.subr.bf16.mxu0 %v4551_v13  ;;  %v297_v23 = vmul.f32 %v5374_v10, %v103_v0  ;;  %v43_v10 = vld [vmem:[%s7454_s1 + $0x18] sm:$0xff] }
 0x20b   :  { %4187 = vmatmul.mubr.msk.f32.gmra.mrb[10].mxu0 %vm109_vm0, %v269_v35  ;;  %4193 = vmatmul.mubr.msk.f32.gmra.mrb[2].mxu1 %vm109_vm0, %v273_v36  ;;  %v45_v36 = vld [vmem:[%s7454_s1 + $0x28] sm:$0xff] }
 0x20c   :  { %4195 = vmatprep.mubr.msk.f32.mxu1 %vm109_vm0, %v274_v37  ;;  %v44_v37 = vld [vmem:[%s7454_s1 + $0x20] sm:$0xff] }
 0x20d   :  { %4554 = vmatpush3.bf16.msra.mxu0 %v4551_v13  ;;  %v292_v13 = vmul.f32 %v5372_v8, %v98_v11  ;;  %v53_v11 = vld [vmem:[%s7454_s1 + $0x68] sm:$0xff] }
 0x20f   :  { %4196 = vmatmul.mubr.msk.f32.gmra.mrb[4].mxu1 %vm109_vm0, %v275_v40 }
 0x210   :  { %4198 = vmatprep.mubr.msk.f32.mxu1 %vm109_vm0, %v276_v41 }
 0x213   :  { %4199 = vmatmul.mubr.msk.f32.gmra.mrb[6].mxu1 %vm109_vm0, %v277_v44 }
 0x214   :  { %4201 = vmatprep.mubr.msk.f32.mxu1 %vm109_vm0, %v278_v45 }
 0x217   :  { %4202 = vmatmul.mubr.msk.f32.gmra.mrb[8].mxu1 %vm109_vm0, %v279_v48  ;;  %v46_v48 = vld [vmem:[%s7454_s1 + $0x30] sm:$0xff] }
 0x218   :  { %4204 = vmatprep.mubr.msk.f32.mxu1 %vm109_vm0, %v280_v49 }
 0x21b   :  { %4205 = vmatmul.mubr.msk.f32.gmra.mrb[10].mxu1 %vm109_vm0, %v281_v52 }
 0x21c   :  { %4207 = vmatprep.mubr.msk.f32.mxu1 %vm109_vm0, %v282_v53 }
 0x21f   :  { %4208 = vmatmul.mubr.msk.f32.gmra.mrb[12].mxu1 %vm109_vm0, %v283_v56  ;;  %v48_v56 = vld [vmem:[%s7454_s1 + $0x40] sm:$0xff] }
 0x220   :  { %4210 = vmatprep.mubr.msk.f32.mxu1 %vm109_vm0, %v284_v57 }
 0x223   :  { %4211 = vmatmul.mubr.msk.f32.gmra.mrb[14].mxu1 %vm109_vm0, %v285_v60 }
 0x224   :  { %4213 = vmatprep.mubr.msk.f32.mxu1 %vm109_vm0, %v286_v61 }
 0x227   :  { %4214 = vmatmul.mubr.msk.f32.gmra.mrb[16].mxu1 %vm109_vm0, %v287_v1  ;;  %v50_v1 = vld [vmem:[%s7454_s1 + $0x50] sm:$0xff] }
 0x228   :  { %4216 = vmatprep.mubr.msk.f32.mxu1 %vm109_vm0, %v288_v2 }
 0x22b   :  { %4217 = vmatmul.mubr.msk.f32.gmra.mrb[18].mxu1 %vm109_vm0, %v289_v6 }
 0x22c   :  { %4219 = vmatprep.mubr.msk.f32.mxu1 %vm109_vm0, %v290_v7 }
 0x22f   :  { %4220 = vmatmul.mubr.msk.f32.gmra.mrb[20].mxu1 %vm109_vm0, %v291_v12  ;;  %v52_v12 = vld [vmem:[%s7454_s1 + $0x60] sm:$0xff] }
 0x230   :  { %4222 = vmatprep.mubr.msk.f32.mxu1 %vm109_vm0, %v292_v13 }
 0x233   :  { %4223 = vmatmul.mubr.msk.f32.gmra.mrb[22].mxu1 %vm109_vm0, %v293_v16 }
 0x234   :  { %4225 = vmatprep.mubr.msk.f32.mxu1 %vm109_vm0, %v294_v18 }
 0x237   :  { %4226 = vmatmul.mubr.msk.f32.gmra.mrb[24].mxu1 %vm109_vm0, %v295_v21  ;;  %v54_v21 = vld [vmem:[%s7454_s1 + $0x70] sm:$0xff] }
 0x238   :  { %4228 = vmatprep.mubr.msk.f32.mxu1 %vm109_vm0, %v296_v22 }
 0x23b   :  { %4229 = vmatmul.mubr.msk.f32.gmra.mrb[26].mxu1 %vm109_vm0, %v297_v23 }
 0x2da   :  { %v4185_v8 = vpop.f32.mrb[8].mxu0  ;;  %v4191_v25 = vpop.f32.mrb[0].mxu1 }
 0x2db   :  { %v5557_v26 = vadd.f32 %v4185_v8, %v41_v24  ;;  %v480_v27 = vpop.f32.mrb[9].mxu0  ;;  %v500_v28 = vpop.f32.mrb[1].mxu1  ;;  %v5583_v43 = vadd.f32 %v4191_v25, %v45_v36  ;;  %v57_v25 = vld [vmem:[%s7454_s1 + $0x88] sm:$0xff]  ;;  %v58_v36 = vld [vmem:[%s7454_s1 + $0x90] sm:$0xff] }
 0x2dc   :  { %v5559_v29 = vadd.f32 %v480_v27, %v40_v4  ;;  %v5585_v44 = vadd.f32 %v500_v28, %v44_v37  ;;  %v56_v27 = vld [vmem:[%s7454_s1 + $0x80] sm:$0xff] }
 0x2dd   :  { %v643_v30 = vsel %vm639_vm2, %v5557_v26, -inf  ;;  %v655_v54 = vsel %vm639_vm2, %v5583_v43, -inf }
 0x2de   :  { %v4194_v32 = vpop.f32.mrb[2].mxu1  ;;  %644 = vmax.xlane.f32.xlu0 %v643_v30  ;;  %v4188_v33 = vpop.f32.mrb[10].mxu0  ;;  %v640_v35 = vsel %vm639_vm2, %v5559_v29, -inf  ;;  %v652_v53 = vsel %vm639_vm2, %v5585_v44, -inf }
 0x2df   :  { %v5577_v38 = vadd.f32 %v4188_v33, %v43_v10  ;;  %v490_v39 = vpop.f32.mrb[11].mxu0  ;;  %v510_v40 = vpop.f32.mrb[3].mxu1  ;;  %641 = vmax.xlane.f32.xlu1 %v640_v35  ;;  %v5595_v50 = vadd.f32 %v4194_v32, %v47_v47  ;;  %v59_v35 = vld [vmem:[%s7454_s1 + $0x98] sm:$0xff]  ;;  %v61_v47 = vld [vmem:[%s7454_s1 + $0xa8] sm:$0xff] }
 0x2e0   :  { %v5579_v41 = vadd.f32 %v490_v39, %v42_v31  ;;  %v5597_v51 = vadd.f32 %v510_v40, %v46_v48  ;;  %v60_v48 = vld [vmem:[%s7454_s1 + $0xa0] sm:$0xff] }
 0x2e1   :  { %v649_v42 = vsel %vm639_vm2, %v5577_v38, -inf  ;;  %v661_v62 = vsel %vm639_vm2, %v5595_v50, -inf }
 0x2e2   :  { %v4197_v45 = vpop.f32.mrb[4].mxu1  ;;  %v646_v46 = vsel %vm639_vm2, %v5579_v41, -inf  ;;  %v658_v61 = vsel %vm639_vm2, %v5597_v51, -inf }
 0x2e3   :  { %v520_v49 = vpop.f32.mrb[5].mxu1  ;;  %647 = vmax.xlane.f32.xlu0 %v646_v46  ;;  %650 = vmax.xlane.f32.xlu1 %v649_v42  ;;  %v5609_v58 = vadd.f32 %v4197_v45, %v49_v55 }
 0x2e4   :  { %v5611_v59 = vadd.f32 %v520_v49, %v48_v56 }
 0x2e5   :  { %v667_v9 = vsel %vm639_vm2, %v5609_v58, -inf }
 0x2e6   :  { %v4200_v52 = vpop.f32.mrb[6].mxu1  ;;  %v664_v7 = vsel %vm639_vm2, %v5611_v59, -inf }
 0x2e7   :  { %v530_v57 = vpop.f32.mrb[7].mxu1  ;;  %653 = vmax.xlane.f32.xlu0 %v652_v53  ;;  %656 = vmax.xlane.f32.xlu1 %v655_v54  ;;  %v5623_v3 = vadd.f32 %v4200_v52, %v51_v63 }
 0x2e8   :  { %v5625_v5 = vadd.f32 %v530_v57, %v50_v1  ;;  %v63_v57 = vld [vmem:[%s7454_s1 + $0xb8] sm:$0xff] }
 0x2e9   :  { %v673_v19 = vsel %vm639_vm2, %v5623_v3, -inf }
 0x2ea   :  { %v4203_v60 = vpop.f32.mrb[8].mxu1  ;;  %v670_v18 = vsel %vm639_vm2, %v5625_v5, -inf }
 0x2eb   :  { %v540_v2 = vpop.f32.mrb[9].mxu1  ;;  %659 = vmax.xlane.f32.xlu0 %v658_v61  ;;  %662 = vmax.xlane.f32.xlu1 %v661_v62  ;;  %v5637_v14 = vadd.f32 %v4203_v60, %v53_v11  ;;  %v62_v60 = vld [vmem:[%s7454_s1 + $0xb0] sm:$0xff] }
 0x2ec   :  { %v5639_v15 = vadd.f32 %v540_v2, %v52_v12 }
 0x2ed   :  { %v679_v8 = vsel %vm639_vm2, %v5637_v14, -inf }
 0x2ee   :  { %v4206_v6 = vpop.f32.mrb[10].mxu1  ;;  %v676_v4 = vsel %vm639_vm2, %v5639_v15, -inf }
 0x2ef   :  { %v550_v13 = vpop.f32.mrb[11].mxu1  ;;  %665 = vmax.xlane.f32.xlu0 %v664_v7  ;;  %668 = vmax.xlane.f32.xlu1 %v667_v9  ;;  %v5651_v0 = vadd.f32 %v4206_v6, %v55_v20  ;;  %v65_v7 = vld [vmem:[%s7454_s1 + $0xc8] sm:$0xff]  ;;  %v64_v9 = vld [vmem:[%s7454_s1 + $0xc0] sm:$0xff]  ;;  %v67_v20 = vld [vmem:[%s7454_s1 + $0xd8] sm:$0xff] }
 0x2f0   :  { %v5653_v23 = vadd.f32 %v550_v13, %v54_v21  ;;  %v66_v21 = vld [vmem:[%s7454_s1 + $0xd0] sm:$0xff] }
 0x2f1   :  { %v685_v33 = vsel %vm639_vm2, %v5651_v0, -inf }
 0x2f2   :  { %v4209_v16 = vpop.f32.mrb[12].mxu1  ;;  %v682_v32 = vsel %vm639_vm2, %v5653_v23, -inf }
 0x2f3   :  { %v560_v22 = vpop.f32.mrb[13].mxu1  ;;  %671 = vmax.xlane.f32.xlu0 %v670_v18  ;;  %674 = vmax.xlane.f32.xlu1 %v673_v19  ;;  %v5665_v10 = vadd.f32 %v4209_v16, %v57_v25 }
 0x2f4   :  { %v5667_v30 = vadd.f32 %v560_v22, %v56_v27 }
 0x2f5   :  { %v691_v46 = vsel %vm639_vm2, %v5665_v10, -inf }
 0x2f6   :  { %v4212_v24 = vpop.f32.mrb[14].mxu1  ;;  %v688_v45 = vsel %vm639_vm2, %v5667_v30, -inf }
 0x2f7   :  { %v570_v28 = vpop.f32.mrb[15].mxu1  ;;  %677 = vmax.xlane.f32.xlu0 %v676_v4  ;;  %680 = vmax.xlane.f32.xlu1 %v679_v8  ;;  %v5679_v39 = vadd.f32 %v4212_v24, %v59_v35 }
 0x2f8   :  { %v5681_v40 = vadd.f32 %v570_v28, %v58_v36  ;;  %v69_v28 = vld [vmem:[%s7454_s1 + $0xe8] sm:$0xff] }
 0x2f9   :  { %v697_v56 = vsel %vm639_vm2, %v5679_v39, -inf }
 0x2fa   :  { %v4215_v31 = vpop.f32.mrb[16].mxu1  ;;  %v694_v55 = vsel %vm639_vm2, %v5681_v40, -inf }
 0x2fb   :  { %v580_v37 = vpop.f32.mrb[17].mxu1  ;;  %683 = vmax.xlane.f32.xlu0 %v682_v32  ;;  %686 = vmax.xlane.f32.xlu1 %v685_v33  ;;  %v5693_v52 = vadd.f32 %v4215_v31, %v61_v47  ;;  %v68_v31 = vld [vmem:[%s7454_s1 + $0xe0] sm:$0xff] }
 0x2fc   :  { %v5695_v53 = vadd.f32 %v580_v37, %v60_v48 }
 0x2fd   :  { %v703_v6 = vsel %vm639_vm2, %v5693_v52, -inf }
 0x2fe   :  { %v4218_v42 = vpop.f32.mrb[18].mxu1  ;;  %v700_v2 = vsel %vm639_vm2, %v5695_v53, -inf }
 0x2ff   :  { %v590_v49 = vpop.f32.mrb[19].mxu1  ;;  %689 = vmax.xlane.f32.xlu0 %v688_v45  ;;  %692 = vmax.xlane.f32.xlu1 %v691_v46  ;;  %v5707_v62 = vadd.f32 %v4218_v42, %v63_v57  ;;  %v71_v42 = vld [vmem:[%s7454_s1 + $0xf8] sm:$0xff]  ;;  %v70_v45 = vld [vmem:[%s7454_s1 + $0xf0] sm:$0xff] }
 0x300   :  { %v5709_v63 = vadd.f32 %v590_v49, %v62_v60 }
 0x301   :  { %v709_v19 = vsel %vm639_vm2, %v5707_v62, -inf }
 0x302   :  { %v4221_v54 = vpop.f32.mrb[20].mxu1  ;;  %v706_v18 = vsel %vm639_vm2, %v5709_v63, -inf }
 0x303   :  { %v600_v61 = vpop.f32.mrb[21].mxu1  ;;  %695 = vmax.xlane.f32.xlu0 %v694_v55  ;;  %698 = vmax.xlane.f32.xlu1 %v697_v56  ;;  %v5721_v12 = vadd.f32 %v4221_v54, %v65_v7 }
 0x304   :  { %v5723_v13 = vadd.f32 %v600_v61, %v64_v9 }
 0x305   :  { %v715_v27 = vsel %vm639_vm2, %v5721_v12, -inf }
 0x306   :  { %v4224_v1 = vpop.f32.mrb[22].mxu1  ;;  %v712_v25 = vsel %vm639_vm2, %v5723_v13, -inf }
 0x307   :  { %v610_v11 = vpop.f32.mrb[23].mxu1  ;;  %701 = vmax.xlane.f32.xlu0 %v700_v2  ;;  %704 = vmax.xlane.f32.xlu1 %v703_v6  ;;  %v5735_v24 = vadd.f32 %v4224_v1, %v67_v20 }
 0x308   :  { %v5737_v4 = vadd.f32 %v610_v11, %v66_v21 }
 0x309   :  { %v721_v37 = vsel %vm639_vm2, %v5735_v24, -inf }
 0x30a   :  { %v4227_v16 = vpop.f32.mrb[24].mxu1  ;;  %v718_v36 = vsel %vm639_vm2, %v5737_v4, -inf }
 0x30b   :  { %v620_v22 = vpop.f32.mrb[25].mxu1  ;;  %707 = vmax.xlane.f32.xlu0 %v706_v18  ;;  %710 = vmax.xlane.f32.xlu1 %v709_v19  ;;  %v5749_v33 = vadd.f32 %v4227_v16, %v69_v28 }
 0x30c   :  { %v5751_v35 = vadd.f32 %v620_v22, %v68_v31 }
 0x30d   :  { %v727_v49 = vsel %vm639_vm2, %v5749_v33, -inf }
 0x30e   :  { %v4230_v8 = vpop.f32.mrb[26].mxu1  ;;  %v724_v48 = vsel %vm639_vm2, %v5751_v35, -inf }
 0x30f   :  { %v630_v32 = vpop.f32.mrb[27].mxu1  ;;  %713 = vmax.xlane.f32.xlu0 %v712_v25  ;;  %716 = vmax.xlane.f32.xlu1 %v715_v27  ;;  %v5763_v46 = vadd.f32 %v4230_v8, %v71_v42 }
 0x310   :  { %v5765_v47 = vadd.f32 %v630_v32, %v70_v45 }
 0x311   :  { %v733_v55 = vsel %vm639_vm2, %v5763_v46, -inf }
 0x312   :  { %v730_v54 = vsel %vm639_vm2, %v5765_v47, -inf }
 0x313   :  { %719 = vmax.xlane.f32.xlu0 %v718_v36  ;;  %722 = vmax.xlane.f32.xlu1 %v721_v37 }
 0x317   :  { %725 = vmax.xlane.f32.xlu0 %v724_v48  ;;  %728 = vmax.xlane.f32.xlu1 %v727_v49 }
 0x31b   :  { %731 = vmax.xlane.f32.xlu0 %v730_v54  ;;  %734 = vmax.xlane.f32.xlu1 %v733_v55 }
 0x36b   :  { %v645_v56 = vpop.xlane.xlu0 %644 }
 0x36c   :  { %v737_v57 = vsub.f32 %v5557_v26, %v645_v56  ;;  %v642_v60 = vpop.xlane.xlu1 %641 }
 0x36d   :  { %v736_v61 = vsub.f32 %v5559_v29, %v642_v60 }
 0x36e   :  { %v770_v1 = vmul.f32 1.442695, %v737_v57 }
 0x36f   :  { %v768_v2 = vmul.f32 1.442695, %v736_v61 }
 0x370   :  { %4756 = vpow2.f32 %v770_v1  ;;  %v648_v6 = vpop.xlane.xlu0 %647  ;;  %v651_v7 = vpop.xlane.xlu1 %650 }
 0x371   :  { %4758 = vpow2.f32 %v768_v2  ;;  %v738_v9 = vsub.f32 %v5579_v41, %v648_v6  ;;  %v739_v11 = vsub.f32 %v5577_v38, %v651_v7 }
 0x373   :  { %v772_v16 = vmul.f32 1.442695, %v738_v9  ;;  %v774_v18 = vmul.f32 1.442695, %v739_v11 }
 0x374   :  { %v654_v19 = vpop.xlane.xlu0 %653  ;;  %v657_v20 = vpop.xlane.xlu1 %656 }
 0x375   :  { %4760 = vpow2.f32 %v772_v16  ;;  %v740_v26 = vsub.f32 %v5585_v44, %v654_v19  ;;  %v741_v21 = vsub.f32 %v5583_v43, %v657_v20 }
 0x376   :  { %4762 = vpow2.f32 %v774_v18 }
 0x377   :  { %v776_v29 = vmul.f32 1.442695, %v740_v26  ;;  %v778_v22 = vmul.f32 1.442695, %v741_v21 }
 0x378   :  { %v660_v8 = vpop.xlane.xlu0 %659  ;;  %v663_v25 = vpop.xlane.xlu1 %662 }
 0x379   :  { %4764 = vpow2.f32 %v776_v29  ;;  %v742_v27 = vsub.f32 %v5597_v51, %v660_v8  ;;  %v743_v41 = vsub.f32 %v5595_v50, %v663_v25 }
 0x37a   :  { %v5783_v38 = vpop.eup %4756  ;;  %4766 = vpow2.f32 %v778_v22 }
 0x37b   :  { %v5785_v28 = vpop.eup %4758  ;;  %v780_v31 = vmul.f32 1.442695, %v742_v27  ;;  %v782_v32 = vmul.f32 1.442695, %v743_v41  ;;  %v835_v43 = vsel %vm639_vm2, %v5783_v38, 0.0 }
 0x37c   :  { %v666_v44 = vpop.xlane.xlu0 %665  ;;  %836 = vadd.xlane.f32.xlu1 %v835_v43  ;;  %v669_v36 = vpop.xlane.xlu1 %668  ;;  %v832_v37 = vsel %vm639_vm2, %v5785_v28, 0.0 }
 0x37d   :  { %4768 = vpow2.f32 %v780_v31  ;;  %v744_v51 = vsub.f32 %v5611_v59, %v666_v44  ;;  %v745_v50 = vsub.f32 %v5609_v58, %v669_v36  ;;  %833 = vadd.xlane.f32.xlu0 %v832_v37 }
 0x37e   :  { %4770 = vpow2.f32 %v782_v32 }
 0x37f   :  { %v5793_v42 = vpop.eup %4760  ;;  %v784_v45 = vmul.f32 1.442695, %v744_v51  ;;  %v786_v48 = vmul.f32 1.442695, %v745_v50 }
 0x380   :  { %v5795_v49 = vpop.eup %4762  ;;  %v672_v54 = vpop.xlane.xlu0 %671  ;;  %v838_v56 = vsel %vm639_vm2, %v5793_v42, 0.0 }
 0x381   :  { %v675_v55 = vpop.xlane.xlu1 %674  ;;  %4772 = vpow2.f32 %v784_v45  ;;  %v746_v57 = vsub.f32 %v5625_v5, %v672_v54  ;;  %839 = vadd.xlane.f32.xlu0 %v838_v56  ;;  %v841_v58 = vsel %vm639_vm2, %v5795_v49, 0.0 }
 0x382   :  { %v747_v59 = vsub.f32 %v5623_v3, %v675_v55  ;;  %4774 = vpow2.f32 %v786_v48  ;;  %842 = vadd.xlane.f32.xlu1 %v841_v58 }
 0x383   :  { %v5803_v60 = vpop.eup %4764  ;;  %v788_v61 = vmul.f32 1.442695, %v746_v57 }
 0x384   :  { %v790_v1 = vmul.f32 1.442695, %v747_v59  ;;  %v5805_v2 = vpop.eup %4766  ;;  %v678_v6 = vpop.xlane.xlu0 %677  ;;  %v844_v9 = vsel %vm639_vm2, %v5803_v60, 0.0 }
 0x385   :  { %v681_v7 = vpop.xlane.xlu1 %680  ;;  %4776 = vpow2.f32 %v788_v61  ;;  %v748_v3 = vsub.f32 %v5639_v15, %v678_v6  ;;  %845 = vadd.xlane.f32.xlu0 %v844_v9  ;;  %v847_v11 = vsel %vm639_vm2, %v5805_v2, 0.0 }
 0x386   :  { %v749_v5 = vsub.f32 %v5637_v14, %v681_v7  ;;  %4778 = vpow2.f32 %v790_v1  ;;  %848 = vadd.xlane.f32.xlu1 %v847_v11 }
 0x387   :  { %v5813_v16 = vpop.eup %4768  ;;  %v792_v18 = vmul.f32 1.442695, %v748_v3 }
 0x388   :  { %v794_v19 = vmul.f32 1.442695, %v749_v5  ;;  %v5815_v20 = vpop.eup %4770  ;;  %v684_v26 = vpop.xlane.xlu0 %683  ;;  %v850_v29 = vsel %vm639_vm2, %v5813_v16, 0.0 }
 0x389   :  { %v687_v21 = vpop.xlane.xlu1 %686  ;;  %4780 = vpow2.f32 %v792_v18  ;;  %v750_v14 = vsub.f32 %v5653_v23, %v684_v26  ;;  %851 = vadd.xlane.f32.xlu0 %v850_v29  ;;  %v853_v22 = vsel %vm639_vm2, %v5815_v20, 0.0 }
 0x38a   :  { %v751_v15 = vsub.f32 %v5651_v0, %v687_v21  ;;  %4782 = vpow2.f32 %v794_v19  ;;  %854 = vadd.xlane.f32.xlu1 %v853_v22 }
 0x38b   :  { %v5823_v8 = vpop.eup %4772  ;;  %v796_v25 = vmul.f32 1.442695, %v750_v14 }
 0x38c   :  { %v798_v27 = vmul.f32 1.442695, %v751_v15  ;;  %v5825_v41 = vpop.eup %4774  ;;  %v690_v31 = vpop.xlane.xlu0 %689  ;;  %v856_v43 = vsel %vm639_vm2, %v5823_v8, 0.0 }
 0x38d   :  { %v693_v32 = vpop.xlane.xlu1 %692  ;;  %4784 = vpow2.f32 %v796_v25  ;;  %v752_v0 = vsub.f32 %v5667_v30, %v690_v31  ;;  %857 = vadd.xlane.f32.xlu0 %v856_v43  ;;  %v859_v44 = vsel %vm639_vm2, %v5825_v41, 0.0 }
 0x38e   :  { %v753_v23 = vsub.f32 %v5665_v10, %v693_v32  ;;  %4786 = vpow2.f32 %v798_v27  ;;  %860 = vadd.xlane.f32.xlu1 %v859_v44 }
 0x38f   :  { %v5833_v36 = vpop.eup %4776  ;;  %v800_v37 = vmul.f32 1.442695, %v752_v0 }
 0x390   :  { %v802_v51 = vmul.f32 1.442695, %v753_v23  ;;  %v5835_v50 = vpop.eup %4778  ;;  %v696_v45 = vpop.xlane.xlu0 %695  ;;  %v862_v54 = vsel %vm639_vm2, %v5833_v36, 0.0 }
 0x391   :  { %v699_v48 = vpop.xlane.xlu1 %698  ;;  %4788 = vpow2.f32 %v800_v37  ;;  %v754_v10 = vsub.f32 %v5681_v40, %v696_v45  ;;  %863 = vadd.xlane.f32.xlu0 %v862_v54  ;;  %v865_v55 = vsel %vm639_vm2, %v5835_v50, 0.0 }
 0x392   :  { %v755_v30 = vsub.f32 %v5679_v39, %v699_v48  ;;  %4790 = vpow2.f32 %v802_v51  ;;  %866 = vadd.xlane.f32.xlu1 %v865_v55 }
 0x393   :  { %v5843_v56 = vpop.eup %4780  ;;  %v804_v57 = vmul.f32 1.442695, %v754_v10 }
 0x394   :  { %v806_v59 = vmul.f32 1.442695, %v755_v30  ;;  %v5845_v58 = vpop.eup %4782  ;;  %v702_v61 = vpop.xlane.xlu0 %701  ;;  %v868_v6 = vsel %vm639_vm2, %v5843_v56, 0.0 }
 0x395   :  { %v705_v1 = vpop.xlane.xlu1 %704  ;;  %4792 = vpow2.f32 %v804_v57  ;;  %v756_v39 = vsub.f32 %v5695_v53, %v702_v61  ;;  %869 = vadd.xlane.f32.xlu0 %v868_v6  ;;  %v871_v7 = vsel %vm639_vm2, %v5845_v58, 0.0 }
 0x396   :  { %v757_v40 = vsub.f32 %v5693_v52, %v705_v1  ;;  %4794 = vpow2.f32 %v806_v59  ;;  %872 = vadd.xlane.f32.xlu1 %v871_v7 }
 0x397   :  { %v5853_v9 = vpop.eup %4784  ;;  %v808_v3 = vmul.f32 1.442695, %v756_v39 }
 0x398   :  { %v810_v5 = vmul.f32 1.442695, %v757_v40  ;;  %v5855_v11 = vpop.eup %4786  ;;  %v708_v18 = vpop.xlane.xlu0 %707  ;;  %v874_v26 = vsel %vm639_vm2, %v5853_v9, 0.0 }
 0x399   :  { %v711_v19 = vpop.xlane.xlu1 %710  ;;  %4796 = vpow2.f32 %v808_v3  ;;  %v758_v52 = vsub.f32 %v5709_v63, %v708_v18  ;;  %875 = vadd.xlane.f32.xlu0 %v874_v26  ;;  %v877_v21 = vsel %vm639_vm2, %v5855_v11, 0.0 }
 0x39a   :  { %v759_v53 = vsub.f32 %v5707_v62, %v711_v19  ;;  %4798 = vpow2.f32 %v810_v5  ;;  %878 = vadd.xlane.f32.xlu1 %v877_v21 }
 0x39b   :  { %v5863_v29 = vpop.eup %4788  ;;  %v812_v14 = vmul.f32 1.442695, %v758_v52 }
 0x39c   :  { %v814_v15 = vmul.f32 1.442695, %v759_v53  ;;  %v5865_v22 = vpop.eup %4790  ;;  %v714_v25 = vpop.xlane.xlu0 %713  ;;  %v880_v31 = vsel %vm639_vm2, %v5863_v29, 0.0 }
 0x39d   :  { %v717_v27 = vpop.xlane.xlu1 %716  ;;  %4800 = vpow2.f32 %v812_v14  ;;  %v760_v62 = vsub.f32 %v5723_v13, %v714_v25  ;;  %881 = vadd.xlane.f32.xlu0 %v880_v31  ;;  %v883_v32 = vsel %vm639_vm2, %v5865_v22, 0.0 }
 0x39e   :  { %v761_v63 = vsub.f32 %v5721_v12, %v717_v27  ;;  %4802 = vpow2.f32 %v814_v15  ;;  %884 = vadd.xlane.f32.xlu1 %v883_v32 }
 0x39f   :  { %v5873_v43 = vpop.eup %4792  ;;  %v816_v0 = vmul.f32 1.442695, %v760_v62 }
 0x3a0   :  { %v818_v23 = vmul.f32 1.442695, %v761_v63  ;;  %v5875_v44 = vpop.eup %4794  ;;  %v720_v37 = vpop.xlane.xlu0 %719  ;;  %v886_v45 = vsel %vm639_vm2, %v5873_v43, 0.0 }
 0x3a1   :  { %v723_v51 = vpop.xlane.xlu1 %722  ;;  %4804 = vpow2.f32 %v816_v0  ;;  %v762_v12 = vsub.f32 %v5737_v4, %v720_v37  ;;  %887 = vadd.xlane.f32.xlu0 %v886_v45  ;;  %v889_v48 = vsel %vm639_vm2, %v5875_v44, 0.0 }
 0x3a2   :  { %v763_v13 = vsub.f32 %v5735_v24, %v723_v51  ;;  %4806 = vpow2.f32 %v818_v23  ;;  %890 = vadd.xlane.f32.xlu1 %v889_v48 }
 0x3a3   :  { %v5883_v54 = vpop.eup %4796  ;;  %v820_v10 = vmul.f32 1.442695, %v762_v12 }
 0x3a4   :  { %v822_v30 = vmul.f32 1.442695, %v763_v13  ;;  %v5885_v55 = vpop.eup %4798  ;;  %v726_v57 = vpop.xlane.xlu0 %725  ;;  %v892_v61 = vsel %vm639_vm2, %v5883_v54, 0.0 }
 0x3a5   :  { %v729_v59 = vpop.xlane.xlu1 %728  ;;  %4808 = vpow2.f32 %v820_v10  ;;  %v764_v24 = vsub.f32 %v5751_v35, %v726_v57  ;;  %893 = vadd.xlane.f32.xlu0 %v892_v61  ;;  %v895_v1 = vsel %vm639_vm2, %v5885_v55, 0.0 }
 0x3a6   :  { %v765_v4 = vsub.f32 %v5749_v33, %v729_v59  ;;  %4810 = vpow2.f32 %v822_v30  ;;  %896 = vadd.xlane.f32.xlu1 %v895_v1 }
 0x3a7   :  { %v5893_v6 = vpop.eup %4800  ;;  %v824_v39 = vmul.f32 1.442695, %v764_v24 }
 0x3a8   :  { %v826_v40 = vmul.f32 1.442695, %v765_v4  ;;  %v5895_v7 = vpop.eup %4802  ;;  %v732_v3 = vpop.xlane.xlu0 %731  ;;  %v898_v18 = vsel %vm639_vm2, %v5893_v6, 0.0 }
 0x3a9   :  { %v735_v5 = vpop.xlane.xlu1 %734  ;;  %4812 = vpow2.f32 %v824_v39  ;;  %v766_v33 = vsub.f32 %v5765_v47, %v732_v3  ;;  %899 = vadd.xlane.f32.xlu0 %v898_v18  ;;  %v901_v19 = vsel %vm639_vm2, %v5895_v7, 0.0 }
 0x3aa   :  { %v767_v35 = vsub.f32 %v5763_v46, %v735_v5  ;;  %4814 = vpow2.f32 %v826_v40  ;;  %902 = vadd.xlane.f32.xlu1 %v901_v19 }
 0x3ab   :  { %v5903_v26 = vpop.eup %4804  ;;  %v828_v52 = vmul.f32 1.442695, %v766_v33 }
 0x3ac   :  { %v830_v53 = vmul.f32 1.442695, %v767_v35  ;;  %v5905_v21 = vpop.eup %4806  ;;  %v904_v14 = vsel %vm639_vm2, %v5903_v26, 0.0 }
 0x3ad   :  { %4816 = vpow2.f32 %v828_v52  ;;  %905 = vadd.xlane.f32.xlu0 %v904_v14  ;;  %v907_v46 = vsel %vm639_vm2, %v5905_v21, 0.0 }
 0x3ae   :  { %4818 = vpow2.f32 %v830_v53  ;;  %908 = vadd.xlane.f32.xlu1 %v907_v46 }
 0x3af   :  { %v5911_v47 = vpop.eup %4808 }
 0x3b0   :  { %v5913_v15 = vpop.eup %4810  ;;  %v910_v25 = vsel %vm639_vm2, %v5911_v47, 0.0 }
 0x3b1   :  { %911 = vadd.xlane.f32.xlu0 %v910_v25  ;;  %v913_v27 = vsel %vm639_vm2, %v5913_v15, 0.0 }
 0x3b2   :  { %914 = vadd.xlane.f32.xlu1 %v913_v27 }
 0x3b3   :  { %v5919_v31 = vpop.eup %4812 }
 0x3b4   :  { %v5921_v62 = vpop.eup %4814  ;;  %v916_v63 = vsel %vm639_vm2, %v5919_v31, 0.0 }
 0x3b5   :  { %917 = vadd.xlane.f32.xlu0 %v916_v63  ;;  %v919_v32 = vsel %vm639_vm2, %v5921_v62, 0.0 }
 0x3b6   :  { %920 = vadd.xlane.f32.xlu1 %v919_v32 }
 0x3b7   :  { %v5927_v0 = vpop.eup %4816 }
 0x3b8   :  { %v5929_v23 = vpop.eup %4818  ;;  %v922_v37 = vsel %vm639_vm2, %v5927_v0, 0.0 }
 0x3b9   :  { %923 = vadd.xlane.f32.xlu0 %v922_v37  ;;  %v925_v51 = vsel %vm639_vm2, %v5929_v23, 0.0 }
 0x3ba   :  { %926 = vadd.xlane.f32.xlu1 %v925_v51 }
 0x409   :  { %v837_v45 = vpop.xlane.xlu1 %836 }
 0x40a   :  { %4820 = vrcp.f32 %v837_v45  ;;  %v834_v12 = vpop.xlane.xlu0 %833 }
 0x40b   :  { %4822 = vrcp.f32 %v834_v12 }
 0x40e   :  { %v840_v13 = vpop.xlane.xlu0 %839 }
 0x40f   :  { %4824 = vrcp.f32 %v840_v13  ;;  %v843_v48 = vpop.xlane.xlu1 %842 }
 0x410   :  { %4826 = vrcp.f32 %v843_v48 }
 0x412   :  { %v846_v10 = vpop.xlane.xlu0 %845 }
 0x413   :  { %4828 = vrcp.f32 %v846_v10  ;;  %v849_v30 = vpop.xlane.xlu1 %848 }
 0x414   :  { %v4821_v57 = vpop.eup %4820  ;;  %4830 = vrcp.f32 %v849_v30 }
 0x415   :  { %v4823_v59 = vpop.eup %4822  ;;  %v961_v4 = vmul.f32 %v4821_v57, %v5783_v38 }
 0x416   :  { %v852_v61 = vpop.xlane.xlu0 %851  ;;  %v960_v24 = vmul.f32 %v4823_v59, %v5785_v28 }
 0x417   :  { %4832 = vrcp.f32 %v852_v61  ;;  %v855_v1 = vpop.xlane.xlu1 %854 }
 0x418   :  { %4834 = vrcp.f32 %v855_v1  ;;  %4239 = vmatprep.mubr.msk.f32.mxu0 %vm639_vm2, %v960_v24 }
 0x419   :  { %v4825_v39 = vpop.eup %4824  ;;  %4240 = vmatmul.mubr.msk.f32.vlgmr.msra.gmra.mrb[12].mxu0 %vm639_vm2, %v961_v4 }
 0x41a   :  { %v4827_v40 = vpop.eup %4826  ;;  %v858_v3 = vpop.xlane.xlu0 %857  ;;  %v962_v5 = vmul.f32 %v4825_v39, %v5793_v42 }
 0x41b   :  { %4836 = vrcp.f32 %v858_v3  ;;  %v861_v18 = vpop.xlane.xlu1 %860  ;;  %v963_v33 = vmul.f32 %v4827_v40, %v5795_v49 }
 0x41c   :  { %4838 = vrcp.f32 %v861_v18  ;;  %4242 = vmatprep.mubr.msk.f32.mxu0 %vm639_vm2, %v962_v5 }
 0x41d   :  { %v4829_v38 = vpop.eup %4828  ;;  %4243 = vmatmul.mubr.msk.f32.gmra.mrb[14].mxu0 %vm639_vm2, %v963_v33 }
 0x41e   :  { %v4831_v28 = vpop.eup %4830  ;;  %v864_v35 = vpop.xlane.xlu0 %863  ;;  %v964_v19 = vmul.f32 %v4829_v38, %v5803_v60 }
 0x41f   :  { %4840 = vrcp.f32 %v864_v35  ;;  %v867_v52 = vpop.xlane.xlu1 %866  ;;  %v965_v53 = vmul.f32 %v4831_v28, %v5805_v2 }
 0x420   :  { %4842 = vrcp.f32 %v867_v52  ;;  %4245 = vmatprep.mubr.msk.f32.mxu0 %vm639_vm2, %v964_v19 }
 0x421   :  { %v4833_v42 = vpop.eup %4832  ;;  %4246 = vmatmul.mubr.msk.f32.gmra.mrb[16].mxu0 %vm639_vm2, %v965_v53 }
 0x422   :  { %v4835_v49 = vpop.eup %4834  ;;  %v870_v14 = vpop.xlane.xlu0 %869  ;;  %v966_v46 = vmul.f32 %v4833_v42, %v5813_v16 }
 0x423   :  { %4844 = vrcp.f32 %v870_v14  ;;  %v873_v25 = vpop.xlane.xlu1 %872  ;;  %v967_v27 = vmul.f32 %v4835_v49, %v5815_v20 }
 0x424   :  { %4846 = vrcp.f32 %v873_v25  ;;  %4248 = vmatprep.mubr.msk.f32.mxu0 %vm639_vm2, %v966_v46 }
 0x425   :  { %v4837_v60 = vpop.eup %4836  ;;  %4249 = vmatmul.mubr.msk.f32.gmra.mrb[18].mxu0 %vm639_vm2, %v967_v27 }
 0x426   :  { %v4839_v2 = vpop.eup %4838  ;;  %v876_v63 = vpop.xlane.xlu0 %875  ;;  %v968_v32 = vmul.f32 %v4837_v60, %v5823_v8 }
 0x427   :  { %4848 = vrcp.f32 %v876_v63  ;;  %v879_v37 = vpop.xlane.xlu1 %878  ;;  %v969_v51 = vmul.f32 %v4839_v2, %v5825_v41 }
 0x428   :  { %4850 = vrcp.f32 %v879_v37  ;;  %4251 = vmatprep.mubr.msk.f32.mxu0 %vm639_vm2, %v968_v32 }
 0x429   :  { %v4841_v16 = vpop.eup %4840  ;;  %4252 = vmatmul.mubr.msk.f32.gmra.mrb[20].mxu0 %vm639_vm2, %v969_v51 }
 0x42a   :  { %v4843_v20 = vpop.eup %4842  ;;  %v882_v45 = vpop.xlane.xlu0 %881  ;;  %v970_v12 = vmul.f32 %v4841_v16, %v5833_v36 }
 0x42b   :  { %4852 = vrcp.f32 %v882_v45  ;;  %v885_v13 = vpop.xlane.xlu1 %884  ;;  %v971_v48 = vmul.f32 %v4843_v20, %v5835_v50 }
 0x42c   :  { %4854 = vrcp.f32 %v885_v13  ;;  %4254 = vmatprep.mubr.msk.f32.mxu0 %vm639_vm2, %v970_v12  ;;  %v1409_v13 = vld [vmem:[%s7457_s4 + $0x20] sm:$0xff] }
 0x42d   :  { %v4845_v8 = vpop.eup %4844  ;;  %4255 = vmatmul.mubr.msk.f32.gmra.mrb[22].mxu0 %vm639_vm2, %v971_v48  ;;  %v1410_v48 = vld [vmem:[%s7457_s4 + $0x28] sm:$0xff] }
 0x42e   :  { %v4847_v41 = vpop.eup %4846  ;;  %v888_v10 = vpop.xlane.xlu0 %887  ;;  %v972_v30 = vmul.f32 %v4845_v8, %v5843_v56  ;;  %v4563_v8 = vpack.c.bf16 %v1410_v48, %v1409_v13  ;;  %v6111_v48 = vld [vmem:[%s7455_s2 + $0x68] sm:$0xff] }
 0x42f   :  { %4856 = vrcp.f32 %v888_v10  ;;  %v891_v57 = vpop.xlane.xlu1 %890  ;;  %v973_v59 = vmul.f32 %v4847_v41, %v5845_v58  ;;  %v1411_v41 = vld [vmem:[%s7457_s4 + $0x30] sm:$0xff]  ;;  %v1412_v10 = vld [vmem:[%s7457_s4 + $0x38] sm:$0xff] }
 0x430   :  { %4858 = vrcp.f32 %v891_v57  ;;  %4257 = vmatprep.mubr.msk.f32.mxu0 %vm639_vm2, %v972_v30  ;;  %v4567_v30 = vpack.c.bf16 %v1412_v10, %v1411_v41  ;;  %v6117_v10 = vld [vmem:[%s7455_s2 + $0x60] sm:$0xff] }
 0x431   :  { %v4849_v36 = vpop.eup %4848  ;;  %4258 = vmatmul.mubr.msk.f32.gmra.mrb[24].mxu0 %vm639_vm2, %v973_v59 }
 0x432   :  { %v4851_v50 = vpop.eup %4850  ;;  %v894_v61 = vpop.xlane.xlu0 %893  ;;  %v974_v24 = vmul.f32 %v4849_v36, %v5853_v9 }
 0x433   :  { %4860 = vrcp.f32 %v894_v61  ;;  %v897_v4 = vpop.xlane.xlu1 %896  ;;  %v975_v1 = vmul.f32 %v4851_v50, %v5855_v11  ;;  %v6027_v61 = vld [vmem:[%s7455_s2 + $0x8] sm:$0xff] }
 0x434   :  { %4862 = vrcp.f32 %v897_v4  ;;  %4260 = vmatprep.mubr.msk.f32.mxu0 %vm639_vm2, %v974_v24  ;;  %v6033_v4 = vld [vmem:[%s7455_s2] sm:$0xff] }
 0x435   :  { %v4853_v56 = vpop.eup %4852  ;;  %4261 = vmatmul.mubr.msk.f32.gmra.mrb[26].mxu0 %vm639_vm2, %v975_v1 }
 0x436   :  { %v4855_v58 = vpop.eup %4854  ;;  %v900_v39 = vpop.xlane.xlu0 %899  ;;  %v976_v40 = vmul.f32 %v4853_v56, %v5863_v29 }
 0x437   :  { %4864 = vrcp.f32 %v900_v39  ;;  %v903_v3 = vpop.xlane.xlu1 %902  ;;  %v977_v5 = vmul.f32 %v4855_v58, %v5865_v22  ;;  %v6039_v58 = vld [vmem:[%s7455_s2 + $0x28] sm:$0xff] }
 0x438   :  { %4866 = vrcp.f32 %v903_v3  ;;  %4263 = vmatprep.mubr.msk.f32.mxu0 %vm639_vm2, %v976_v40  ;;  %v6045_v3 = vld [vmem:[%s7455_s2 + $0x20] sm:$0xff] }
 0x439   :  { %v4857_v9 = vpop.eup %4856  ;;  %4264 = vmatmul.mubr.msk.f32.gmra.mrb[28].mxu0 %vm639_vm2, %v977_v5 }
 0x43a   :  { %v4859_v11 = vpop.eup %4858  ;;  %v906_v18 = vpop.xlane.xlu0 %905  ;;  %v978_v33 = vmul.f32 %v4857_v9, %v5873_v43 }
 0x43b   :  { %4868 = vrcp.f32 %v906_v18  ;;  %v909_v38 = vpop.xlane.xlu1 %908  ;;  %v979_v28 = vmul.f32 %v4859_v11, %v5875_v44  ;;  %v6052_v11 = vld [vmem:[%s7455_s2 + $0x18] sm:$0xff] }
 0x43c   :  { %4870 = vrcp.f32 %v909_v38  ;;  %4266 = vmatprep.mubr.msk.f32.mxu0 %vm639_vm2, %v978_v33 }
 0x43d   :  { %v4861_v29 = vpop.eup %4860  ;;  %4267 = vmatmul.mubr.msk.f32.gmra.mrb[30].mxu0 %vm639_vm2, %v979_v28  ;;  %v6060_v28 = vld [vmem:[%s7455_s2 + $0x10] sm:$0xff] }
 0x43e   :  { %v4863_v22 = vpop.eup %4862  ;;  %v912_v35 = vpop.xlane.xlu0 %911  ;;  %v980_v19 = vmul.f32 %v4861_v29, %v5883_v54 }
 0x43f   :  { %4872 = vrcp.f32 %v912_v35  ;;  %v915_v52 = vpop.xlane.xlu1 %914  ;;  %v981_v53 = vmul.f32 %v4863_v22, %v5885_v55 }
 0x440   :  { %4874 = vrcp.f32 %v915_v52  ;;  %4269 = vmatprep.mubr.msk.f32.mxu0 %vm639_vm2, %v980_v19 }
 0x441   :  { %v4865_v43 = vpop.eup %4864  ;;  %4270 = vmatmul.mubr.msk.f32.gmra.mrb[32].mxu0 %vm639_vm2, %v981_v53  ;;  %v6067_v53 = vld [vmem:[%s7455_s2 + $0x38] sm:$0xff] }
 0x442   :  { %v4867_v44 = vpop.eup %4866  ;;  %v918_v42 = vpop.xlane.xlu0 %917  ;;  %v982_v49 = vmul.f32 %v4865_v43, %v5893_v6 }
 0x443   :  { %4876 = vrcp.f32 %v918_v42  ;;  %v921_v14 = vpop.xlane.xlu1 %920  ;;  %v983_v46 = vmul.f32 %v4867_v44, %v5895_v7  ;;  %v6073_v42 = vld [vmem:[%s7455_s2 + $0x30] sm:$0xff] }
 0x444   :  { %4878 = vrcp.f32 %v921_v14  ;;  %4272 = vmatprep.mubr.msk.f32.mxu0 %vm639_vm2, %v982_v49 }
 0x445   :  { %v4869_v54 = vpop.eup %4868  ;;  %4273 = vmatmul.mubr.msk.f32.gmra.mrb[34].mxu0 %vm639_vm2, %v983_v46 }
 0x446   :  { %v4871_v55 = vpop.eup %4870  ;;  %v924_v25 = vpop.xlane.xlu0 %923  ;;  %v984_v27 = vmul.f32 %v4869_v54, %v5903_v26 }
 0x447   :  { %4880 = vrcp.f32 %v924_v25  ;;  %v927_v60 = vpop.xlane.xlu1 %926  ;;  %v985_v2 = vmul.f32 %v4871_v55, %v5905_v21 }
 0x448   :  { %4882 = vrcp.f32 %v927_v60  ;;  %4275 = vmatprep.mubr.msk.f32.mxu0 %vm639_vm2, %v984_v27 }
 0x449   :  { %v4873_v6 = vpop.eup %4872  ;;  %4276 = vmatmul.mubr.msk.f32.gmra.mrb[36].mxu0 %vm639_vm2, %v985_v2  ;;  %v6083_v2 = vld [vmem:[%s7455_s2 + $0x48] sm:$0xff] }
 0x44a   :  { %v4875_v7 = vpop.eup %4874  ;;  %v986_v63 = vmul.f32 %v4873_v6, %v5911_v47 }
 0x44b   :  { %v987_v32 = vmul.f32 %v4875_v7, %v5913_v15 }
 0x44c   :  { %4278 = vmatprep.mubr.msk.f32.mxu0 %vm639_vm2, %v986_v63  ;;  %v6089_v63 = vld [vmem:[%s7455_s2 + $0x40] sm:$0xff] }
 0x44d   :  { %v4877_v37 = vpop.eup %4876  ;;  %4279 = vmatmul.mubr.msk.f32.gmra.mrb[38].mxu0 %vm639_vm2, %v987_v32 }
 0x44e   :  { %v4879_v26 = vpop.eup %4878  ;;  %v988_v51 = vmul.f32 %v4877_v37, %v5919_v31  ;;  %v1405_v31 = vld [vmem:[%s7457_s4] sm:$0xff] }
 0x44f   :  { %v989_v21 = vmul.f32 %v4879_v26, %v5921_v62  ;;  %v1406_v62 = vld [vmem:[%s7457_s4 + $0x8] sm:$0xff] }
 0x450   :  { %4281 = vmatprep.mubr.msk.f32.mxu0 %vm639_vm2, %v988_v51  ;;  %v4555_v45 = vpack.c.bf16 %v1406_v62, %v1405_v31  ;;  %v6103_v31 = vld [vmem:[%s7455_s2 + $0x50] sm:$0xff] }
 0x451   :  { %v4881_v16 = vpop.eup %4880  ;;  %4282 = vmatmul.mubr.msk.f32.gmra.mrb[40].mxu0 %vm639_vm2, %v989_v21 }
 0x452   :  { %v4883_v20 = vpop.eup %4882  ;;  %v990_v47 = vmul.f32 %v4881_v16, %v5927_v0  ;;  %4556 = vmatprep.subr.bf16.mxu1 %v4555_v45  ;;  %v1407_v0 = vld [vmem:[%s7457_s4 + $0x10] sm:$0xff] }
 0x453   :  { %v991_v15 = vmul.f32 %v4883_v20, %v5929_v23  ;;  %4558 = vmatpush3.bf16.msra.mxu1 %v4555_v45  ;;  %v1408_v23 = vld [vmem:[%s7457_s4 + $0x18] sm:$0xff] }
 0x454   :  { %4284 = vmatprep.mubr.msk.f32.mxu0 %vm639_vm2, %v990_v47  ;;  %v4559_v12 = vpack.c.bf16 %v1408_v23, %v1407_v0  ;;  %v6097_v20 = vld [vmem:[%s7455_s2 + $0x58] sm:$0xff] }
 0x455   :  { %4285 = vmatmul.mubr.msk.f32.gmra.mrb[42].mxu0 %vm639_vm2, %v991_v15 }
 0x456   :  { %1649 = vmatprep.mubr.f32.mxu0 %v7464_v34  ;;  %4560 = vmatprep.subr.bf16.mxu1 %v4559_v12 }
 0x457   :  { %4562 = vmatpush3.bf16.msra.mxu1 %v4559_v12 }
 0x458   :  { %4564 = vmatprep.subr.bf16.mxu1 %v4563_v8 }
 0x45b   :  { %4566 = vmatpush3.bf16.msra.mxu1 %v4563_v8 }
 0x45c   :  { %4568 = vmatprep.subr.bf16.mxu1 %v4567_v30 }
 0x45f   :  { %4570 = vmatpush3.bf16.msra.mxu1 %v4567_v30 }
 0x4ec   :  { %v4241_v57 = vpop.f32.mrb[12].mxu0 }
 0x4ed   :  { %v1154_v59 = vpop.f32.mrb[13].mxu0  ;;  %v1314_v24 = vmul.f32 %v6027_v61, %v4241_v57 }
 0x4ee   :  { %v1313_v1 = vmul.f32 %v6033_v4, %v1154_v59 }
 0x4ef   :  { %v1360_v9 = vsel %vm109_vm0, %v1314_v24, 0.0 }
 0x4f0   :  { %v4244_v36 = vpop.f32.mrb[14].mxu0  ;;  %v1345_v38 = vsel %vm109_vm0, %v1313_v1, 0.0  ;;  %v6125_v1 = vld [vmem:[%s7455_s2 + $0x78] sm:$0xff] }
 0x4f1   :  { %v1164_v50 = vpop.f32.mrb[15].mxu0  ;;  %v1316_v18 = vmul.f32 %v6052_v11, %v4244_v36 }
 0x4f2   :  { %v1315_v29 = vmul.f32 %v6060_v28, %v1164_v50 }
 0x4f3   :  { %v1390_v14 = vsel %vm109_vm0, %v1316_v18, 0.0 }
 0x4f4   :  { %v4247_v56 = vpop.f32.mrb[16].mxu0  ;;  %v1375_v54 = vsel %vm109_vm0, %v1315_v29, 0.0 }
 0x4f5   :  { %v1318_v39 = vmul.f32 %v6039_v58, %v4247_v56  ;;  %v1174_v40 = vpop.f32.mrb[17].mxu0 }
 0x4f6   :  { %v1317_v5 = vmul.f32 %v6045_v3, %v1174_v40  ;;  %v6131_v40 = vld [vmem:[%s7455_s2 + $0x70] sm:$0xff] }
 0x4f7   :  { %v1361_v33 = vsel %vm109_vm0, %v1318_v39, 0.0 }
 0x4f8   :  { %v1362_v22 = vadd.f32 %v1361_v33, %v1360_v9  ;;  %v1346_v35 = vsel %vm109_vm0, %v1317_v5, 0.0  ;;  %v4250_v19 = vpop.f32.mrb[18].mxu0 }
 0x4f9   :  { %v1347_v52 = vadd.f32 %v1346_v35, %v1345_v38  ;;  %v1320_v43 = vmul.f32 %v6067_v53, %v4250_v19  ;;  %v1184_v44 = vpop.f32.mrb[19].mxu0 }
 0x4fa   :  { %v1319_v49 = vmul.f32 %v6073_v42, %v1184_v44 }
 0x4fb   :  { %v1391_v46 = vsel %vm109_vm0, %v1320_v43, 0.0 }
 0x4fc   :  { %v1392_v55 = vadd.f32 %v1391_v46, %v1390_v14  ;;  %v1376_v25 = vsel %vm109_vm0, %v1319_v49, 0.0  ;;  %v4253_v27 = vpop.f32.mrb[20].mxu0 }
 0x4fd   :  { %v1377_v60 = vadd.f32 %v1376_v25, %v1375_v54  ;;  %v1322_v6 = vmul.f32 %v6083_v2, %v4253_v27  ;;  %v1194_v7 = vpop.f32.mrb[21].mxu0 }
 0x4fe   :  { %v1321_v32 = vmul.f32 %v6089_v63, %v1194_v7 }
 0x4ff   :  { %v1363_v37 = vsel %vm109_vm0, %v1322_v6, 0.0 }
 0x500   :  { %v1364_v26 = vadd.f32 %v1363_v37, %v1362_v22  ;;  %v1348_v51 = vsel %vm109_vm0, %v1321_v32, 0.0  ;;  %v4256_v21 = vpop.f32.mrb[22].mxu0  ;;  %v6139_v22 = vld [vmem:[%s7455_s2 + $0x88] sm:$0xff] }
 0x501   :  { %v1349_v16 = vadd.f32 %v1348_v51, %v1347_v52  ;;  %v1324_v47 = vmul.f32 %v6097_v20, %v4256_v21  ;;  %v1204_v15 = vpop.f32.mrb[23].mxu0  ;;  %v6145_v52 = vld [vmem:[%s7455_s2 + $0x80] sm:$0xff]  ;;  %v6167_v21 = vld [vmem:[%s7455_s2 + $0xa8] sm:$0xff] }
 0x502   :  { %v1323_v62 = vmul.f32 %v6103_v31, %v1204_v15  ;;  %7482 = vst [vmem:[#allocation6_spill] sm:$0xff] %v6167_v21  ;;  %v6173_v15 = vld [vmem:[%s7455_s2 + $0xa0] sm:$0xff] }
 0x503   :  { %v1393_v45 = vsel %vm109_vm0, %v1324_v47, 0.0  ;;  %7483 = vst [vmem:[#allocation7_spill] sm:$0xff] %v6173_v15 }
 0x504   :  { %v1394_v0 = vadd.f32 %v1393_v45, %v1392_v55  ;;  %v1378_v23 = vsel %vm109_vm0, %v1323_v62, 0.0  ;;  %v4259_v12 = vpop.f32.mrb[24].mxu0  ;;  %v6153_v55 = vld [vmem:[%s7455_s2 + $0x98] sm:$0xff] }
 0x505   :  { %v1379_v13 = vadd.f32 %v1378_v23, %v1377_v60  ;;  %v1326_v8 = vmul.f32 %v6111_v48, %v4259_v12  ;;  %v1214_v41 = vpop.f32.mrb[25].mxu0  ;;  %7481 = vst [vmem:[#allocation5_spill] sm:$0xff] %v6153_v55  ;;  %v6159_v60 = vld [vmem:[%s7455_s2 + $0x90] sm:$0xff] }
 0x506   :  { %v1325_v30 = vmul.f32 %v6117_v10, %v1214_v41 }
 0x507   :  { %v1365_v57 = vsel %vm109_vm0, %v1326_v8, 0.0  ;;  %v6181_v8 = vld [vmem:[%s7455_s2 + $0xb8] sm:$0xff] }
 0x508   :  { %v1366_v59 = vadd.f32 %v1365_v57, %v1364_v26  ;;  %v1350_v36 = vsel %vm109_vm0, %v1325_v30, 0.0  ;;  %v4262_v50 = vpop.f32.mrb[26].mxu0  ;;  %7484 = vst [vmem:[#allocation8_spill] sm:$0xff] %v6181_v8  ;;  %v6187_v57 = vld [vmem:[%s7455_s2 + $0xb0] sm:$0xff] }
 0x509   :  { %v1351_v24 = vadd.f32 %v1350_v36, %v1349_v16  ;;  %v1328_v56 = vmul.f32 %v6125_v1, %v4262_v50  ;;  %v1224_v39 = vpop.f32.mrb[27].mxu0  ;;  %7485 = vst [vmem:[#allocation9_spill] sm:$0xff] %v6187_v57 }
 0x50a   :  { %v1327_v5 = vmul.f32 %v6131_v40, %v1224_v39 }
 0x50b   :  { %v1395_v9 = vsel %vm109_vm0, %v1328_v56, 0.0 }
 0x50c   :  { %v1396_v18 = vadd.f32 %v1395_v9, %v1394_v0  ;;  %v1380_v33 = vsel %vm109_vm0, %v1327_v5, 0.0  ;;  %v4265_v38 = vpop.f32.mrb[28].mxu0  ;;  %v6195_v5 = vld [vmem:[%s7455_s2 + $0xc8] sm:$0xff] }
 0x50d   :  { %v1381_v29 = vadd.f32 %v1380_v33, %v1379_v13  ;;  %v1330_v35 = vmul.f32 %v6139_v22, %v4265_v38  ;;  %v1234_v19 = vpop.f32.mrb[29].mxu0  ;;  %7486 = vst [vmem:[#allocation10_spill] sm:$0xff] %v6195_v5  ;;  %v6201_v33 = vld [vmem:[%s7455_s2 + $0xc0] sm:$0xff] }
 0x50e   :  { %v1329_v43 = vmul.f32 %v6145_v52, %v1234_v19  ;;  %7487 = vst [vmem:[#allocation11_spill] sm:$0xff] %v6201_v33 }
 0x50f   :  { %v1367_v44 = vsel %vm109_vm0, %v1330_v35, 0.0 }
 0x510   :  { %v1368_v49 = vadd.f32 %v1367_v44, %v1366_v59  ;;  %v1352_v14 = vsel %vm109_vm0, %v1329_v43, 0.0  ;;  %v4268_v46 = vpop.f32.mrb[30].mxu0 }
 0x511   :  { %v1353_v54 = vadd.f32 %v1352_v14, %v1351_v24  ;;  %v1332_v25 = vmul.f32 %v6153_v55, %v4268_v46  ;;  %v1244_v27 = vpop.f32.mrb[31].mxu0 }
 0x512   :  { %v1331_v6 = vmul.f32 %v6159_v60, %v1244_v27 }
 0x513   :  { %v1397_v7 = vsel %vm109_vm0, %v1332_v25, 0.0 }
 0x514   :  { %v1398_v32 = vadd.f32 %v1397_v7, %v1396_v18  ;;  %v1382_v37 = vsel %vm109_vm0, %v1331_v6, 0.0  ;;  %v4271_v26 = vpop.f32.mrb[32].mxu0 }
 0x515   :  { %v1383_v51 = vadd.f32 %v1382_v37, %v1381_v29  ;;  %v1334_v16 = vmul.f32 %v6167_v21, %v4271_v26  ;;  %v1254_v47 = vpop.f32.mrb[33].mxu0  ;;  %v6223_v26 = vld [vmem:[%s7455_s2 + $0xe8] sm:$0xff] }
 0x516   :  { %v1333_v62 = vmul.f32 %v6173_v15, %v1254_v47  ;;  %7490 = vst [vmem:[#allocation14_spill] sm:$0xff] %v6223_v26  ;;  %v6229_v47 = vld [vmem:[%s7455_s2 + $0xe0] sm:$0xff] }
 0x517   :  { %v1369_v45 = vsel %vm109_vm0, %v1334_v16, 0.0  ;;  %7491 = vst [vmem:[#allocation15_spill] sm:$0xff] %v6229_v47 }
 0x518   :  { %v1370_v0 = vadd.f32 %v1369_v45, %v1368_v49  ;;  %v1354_v23 = vsel %vm109_vm0, %v1333_v62, 0.0  ;;  %v4274_v12 = vpop.f32.mrb[34].mxu0  ;;  %v6209_v49 = vld [vmem:[%s7455_s2 + $0xd8] sm:$0xff] }
 0x519   :  { %v1355_v13 = vadd.f32 %v1354_v23, %v1353_v54  ;;  %v1336_v41 = vmul.f32 %v6181_v8, %v4274_v12  ;;  %v1264_v30 = vpop.f32.mrb[35].mxu0  ;;  %7488 = vst [vmem:[#allocation12_spill] sm:$0xff] %v6209_v49  ;;  %v6215_v54 = vld [vmem:[%s7455_s2 + $0xd0] sm:$0xff] }
 0x51a   :  { %v1335_v59 = vmul.f32 %v6187_v57, %v1264_v30  ;;  %7489 = vst [vmem:[#allocation13_spill] sm:$0xff] %v6215_v54 }
 0x51b   :  { %v1399_v36 = vsel %vm109_vm0, %v1336_v41, 0.0  ;;  %v6237_v41 = vld [vmem:[%s7455_s2 + $0xf8] sm:$0xff] }
 0x51c   :  { %v1400_v50 = vadd.f32 %v1399_v36, %v1398_v32  ;;  %v1384_v24 = vsel %vm109_vm0, %v1335_v59, 0.0  ;;  %v4277_v56 = vpop.f32.mrb[36].mxu0  ;;  %7492 = vst [vmem:[#allocation16_spill] sm:$0xff] %v6237_v41  ;;  %v6243_v36 = vld [vmem:[%s7455_s2 + $0xf0] sm:$0xff] }
 0x51d   :  { %v1385_v39 = vadd.f32 %v1384_v24, %v1383_v51  ;;  %v1338_v9 = vmul.f32 %v6195_v5, %v4277_v56  ;;  %v1274_v18 = vpop.f32.mrb[37].mxu0  ;;  %7493 = vst [vmem:[#allocation17_spill] sm:$0xff] %v6243_v36 }
 0x51e   :  { %v1337_v38 = vmul.f32 %v6201_v33, %v1274_v18  ;;  %v1558_v18 = vld [vmem:[%s7459_s6 + $0x8] sm:$0xff] }
 0x51f   :  { %v1371_v29 = vsel %vm109_vm0, %v1338_v9, 0.0 }
 0x520   :  { %v1372_v35 = vadd.f32 %v1371_v29, %v1370_v0  ;;  %v1356_v19 = vsel %vm109_vm0, %v1337_v38, 0.0  ;;  %v4280_v43 = vpop.f32.mrb[38].mxu0  ;;  %v1560_v38 = vld [vmem:[%s7459_s6 + $0x18] sm:$0xff]  ;;  %v1557_v29 = vld [vmem:[%s7459_s6] sm:$0xff] }
 0x521   :  { %v1357_v44 = vadd.f32 %v1356_v19, %v1355_v13  ;;  %v1340_v14 = vmul.f32 %v6209_v49, %v4280_v43  ;;  %v1284_v46 = vpop.f32.mrb[39].mxu0  ;;  %v1559_v19 = vld [vmem:[%s7459_s6 + $0x10] sm:$0xff]  ;;  %v1562_v43 = vld [vmem:[%s7459_s6 + $0x28] sm:$0xff] }
 0x522   :  { %v1339_v25 = vmul.f32 %v6215_v54, %v1284_v46 }
 0x523   :  { %v1401_v27 = vsel %vm109_vm0, %v1340_v14, 0.0  ;;  %v4573_v14 = vpack.c.bf16 %v1559_v19, %v1557_v29 }
 0x524   :  { %v1402_v6 = vadd.f32 %v1401_v27, %v1400_v50  ;;  %v1386_v7 = vsel %vm109_vm0, %v1339_v25, 0.0  ;;  %v4283_v32 = vpop.f32.mrb[40].mxu0  ;;  %v1561_v25 = vld [vmem:[%s7459_s6 + $0x20] sm:$0xff]  ;;  %v1563_v27 = vld [vmem:[%s7459_s6 + $0x30] sm:$0xff] }
 0x525   :  { %v1387_v37 = vadd.f32 %v1386_v7, %v1385_v39  ;;  %v1342_v51 = vmul.f32 %v6223_v26, %v4283_v32  ;;  %v1294_v16 = vpop.f32.mrb[41].mxu0  ;;  %v1568_v7 = vld [vmem:[%s7459_s6 + $0x58] sm:$0xff]  ;;  %v4577_v32 = vpack.c.bf16 %v1563_v27, %v1561_v25 }
 0x526   :  { %v1341_v62 = vmul.f32 %v6229_v47, %v1294_v16  ;;  %v1567_v16 = vld [vmem:[%s7459_s6 + $0x50] sm:$0xff]  ;;  %v1572_v25 = vld [vmem:[%s7459_s6 + $0x78] sm:$0xff] }
 0x527   :  { %v1373_v45 = vsel %vm109_vm0, %v1342_v51, 0.0  ;;  %v1565_v51 = vld [vmem:[%s7459_s6 + $0x40] sm:$0xff] }
 0x528   :  { %v1374_v0 = vadd.f32 %v1373_v45, %v1372_v35  ;;  %v1358_v23 = vsel %vm109_vm0, %v1341_v62, 0.0  ;;  %v4286_v12 = vpop.f32.mrb[42].mxu0  ;;  %v4571_v35 = vpack.c.bf16 %v1560_v38, %v1558_v18  ;;  %v4581_v62 = vpack.c.bf16 %v1567_v16, %v1565_v51  ;;  %v5111_v38 = vld [vmem:[%s7453_s0 + $0x10] sm:$0xff] }
 0x529   :  { %v1359_v13 = vadd.f32 %v1358_v23, %v1357_v44  ;;  %v1344_v30 = vmul.f32 %v6237_v41, %v4286_v12  ;;  %v1304_v59 = vpop.f32.mrb[43].mxu0  ;;  %v1564_v44 = vld [vmem:[%s7459_s6 + $0x38] sm:$0xff] }
 0x52a   :  { %v1343_v50 = vmul.f32 %v6243_v36, %v1304_v59  ;;  %v4575_v46 = vpack.c.bf16 %v1564_v44, %v1562_v43  ;;  %4572 = vmatprep.subr.bf16.mxu0 %v4571_v35 }
 0x52b   :  { %v1403_v24 = vsel %vm109_vm0, %v1344_v30, 0.0  ;;  %4303 = vmatprep.mubr.msk.f32.mxu1 %vm109_vm0, %v1359_v13  ;;  %4574 = vmatpush1.bf16.msra.mxu0 %v4573_v14  ;;  %v5109_v13 = vld [vmem:[%s7453_s0] sm:$0xff] }
 0x52c   :  { %v1404_v56 = vadd.f32 %v1403_v24, %v1402_v6  ;;  %v1388_v39 = vsel %vm109_vm0, %v1343_v50, 0.0  ;;  %4304 = vmatmul.mubr.msk.f32.vlgmr.msra.gmra.mrb[28].mxu1 %vm109_vm0, %v1374_v0  ;;  %v1566_v6 = vld [vmem:[%s7459_s6 + $0x48] sm:$0xff]  ;;  %4576 = vmatprep.subr.bf16.mxu0 %v4575_v46 }
 0x52d   :  { %v1389_v9 = vadd.f32 %v1388_v39, %v1387_v37  ;;  %v4579_v37 = vpack.c.bf16 %v1568_v7, %v1566_v6  ;;  %v5108_v0 = vld [vmem:[%s7453_s0 + $0x8] sm:$0xff]  ;;  %v1569_v6 = vld [vmem:[%s7459_s6 + $0x60] sm:$0xff]  ;;  %v1571_v7 = vld [vmem:[%s7459_s6 + $0x70] sm:$0xff] }
 0x52e   :  { %v1570_v46 = vld [vmem:[%s7459_s6 + $0x68] sm:$0xff] }
 0x52f   :  { %4306 = vmatprep.mubr.msk.f32.mxu1 %vm109_vm0, %v1389_v9  ;;  %4578 = vmatpush1.bf16.msra.mxu0 %v4577_v32  ;;  %v4583_v27 = vpack.c.bf16 %v1572_v25, %v1570_v46  ;;  %v4585_v32 = vpack.c.bf16 %v1571_v7, %v1569_v6 }
 0x530   :  { %4307 = vmatmul.mubr.msk.f32.gmra.mrb[30].mxu1 %vm109_vm0, %v1404_v56  ;;  %4580 = vmatprep.subr.bf16.mxu0 %v4579_v37  ;;  %v5110_v56 = vld [vmem:[%s7453_s0 + $0x18] sm:$0xff] }
 0x533   :  { %4582 = vmatpush1.bf16.msra.mxu0 %v4581_v62 }
 0x534   :  { %4584 = vmatprep.subr.bf16.mxu0 %v4583_v27 }
 0x537   :  { %4586 = vmatpush1.bf16.msra.mxu0 %v4585_v32  ;;  %v1786_v32 = vld [vmem:[%s7460_s7] sm:$0xff] }
 0x5ff   :  { %v4305_v45 = vpop.f32.mrb[28].mxu1 }
 0x600   :  { %v6291_v23 = vadd.f32 %v5108_v0, %v4305_v45  ;;  %v1491_v12 = vpop.f32.mrb[29].mxu1 }
 0x601   :  { %v6296_v30 = vadd.f32 %v5109_v13, %v1491_v12 }
 0x602   :  { %v1516_v59 = vmul.f32 %v6291_v23, %v6291_v23 }
 0x603   :  { %v4308_v50 = vpop.f32.mrb[30].mxu1  ;;  %v1515_v24 = vmul.f32 %v6296_v30, %v6296_v30 }
 0x604   :  { %v6305_v39 = vadd.f32 %v5110_v56, %v4308_v50  ;;  %v1501_v9 = vpop.f32.mrb[31].mxu1  ;;  %v1522_v18 = vsel %vm109_vm0, %v1516_v59, 0.0 }
 0x605   :  { %v6311_v29 = vadd.f32 %v5111_v38, %v1501_v9  ;;  %1523 = vadd.xlane.f32.xlu1 %v1522_v18  ;;  %v1519_v35 = vsel %vm109_vm0, %v1515_v24, 0.0  ;;  %v3821_v38 = vld [vmem:[%s7461_s8] ss:$0 sm:$0xff] }
 0x606   :  { %1520 = vadd.xlane.f32.xlu0 %v1519_v35  ;;  %v1518_v19 = vmul.f32 %v6305_v39, %v6305_v39 }
 0x607   :  { %v1517_v43 = vmul.f32 %v6311_v29, %v6311_v29 }
 0x608   :  { %v1528_v44 = vsel %vm109_vm0, %v1518_v19, 0.0 }
 0x609   :  { %1529 = vadd.xlane.f32.xlu1 %v1528_v44  ;;  %v1525_v14 = vsel %vm109_vm0, %v1517_v43, 0.0 }
 0x60a   :  { %1526 = vadd.xlane.f32.xlu0 %v1525_v14 }
 0x692   :  { %v1524_v37 = vpop.xlane.xlu1 %1523 }
 0x693   :  { %v1532_v51 = vmul.f32 0.015625, %v1524_v37  ;;  %v1521_v16 = vpop.xlane.xlu0 %1520  ;;  %v1787_v37 = vld [vmem:[%s7460_s7 + $0x8] sm:$0xff] }
 0x694   :  { %v1531_v62 = vmul.f32 0.015625, %v1521_v16  ;;  %v1788_v16 = vld [vmem:[%s7460_s7 + $0x10] sm:$0xff] }
 0x695   :  { %v1536_v45 = vadd.f32 1e-06, %v1532_v51  ;;  %v4587_v51 = vpack.c.bf16 %v1787_v37, %v1786_v32 }
 0x696   :  { %v1535_v0 = vadd.f32 1e-06, %v1531_v62  ;;  %v1530_v12 = vpop.xlane.xlu1 %1529  ;;  %v1789_v62 = vld [vmem:[%s7460_s7 + $0x18] sm:$0xff] }
 0x697   :  { %4884 = vrsqrt.f32 %v1536_v45  ;;  %v1527_v13 = vpop.xlane.xlu0 %1526  ;;  %v1534_v59 = vmul.f32 0.015625, %v1530_v12  ;;  %4588 = vmatprep.subr.bf16.mxu1 %v4587_v51  ;;  %v4591_v45 = vpack.c.bf16 %v1789_v62, %v1788_v16  ;;  %v1791_v12 = vld [vmem:[%s7460_s7 + $0x28] sm:$0xff] }
 0x698   :  { %4886 = vrsqrt.f32 %v1535_v0  ;;  %v1533_v50 = vmul.f32 0.015625, %v1527_v13  ;;  %4590 = vmatpush3.bf16.msra.mxu1 %v4587_v51  ;;  %v1790_v0 = vld [vmem:[%s7460_s7 + $0x20] sm:$0xff] }
 0x699   :  { %v1538_v56 = vadd.f32 1e-06, %v1534_v59  ;;  %4592 = vmatprep.subr.bf16.mxu1 %v4591_v45  ;;  %v4595_v13 = vpack.c.bf16 %v1791_v12, %v1790_v0  ;;  %v1792_v59 = vld [vmem:[%s7460_s7 + $0x30] sm:$0xff] }
 0x69a   :  { %v1537_v24 = vadd.f32 1e-06, %v1533_v50  ;;  %v1793_v50 = vld [vmem:[%s7460_s7 + $0x38] sm:$0xff] }
 0x69c   :  { %4888 = vrsqrt.f32 %v1537_v24  ;;  %4594 = vmatpush3.bf16.msra.mxu1 %v4591_v45  ;;  %v4599_v24 = vpack.c.bf16 %v1793_v50, %v1792_v59 }
 0x69d   :  { %4890 = vrsqrt.f32 %v1538_v56  ;;  %4596 = vmatprep.subr.bf16.mxu1 %v4595_v13  ;;  %v1794_v56 = vld [vmem:[%s7460_s7 + $0x40] sm:$0xff] }
 0x6a0   :  { %4598 = vmatpush3.bf16.msra.mxu1 %v4595_v13 }
 0x6a1   :  { %v4885_v9 = vpop.eup %4884  ;;  %4600 = vmatprep.subr.bf16.mxu1 %v4599_v24 }
 0x6a2   :  { %v4887_v18 = vpop.eup %4886  ;;  %v1544_v43 = vmul.f32 %v4885_v9, %v6291_v23  ;;  %v1795_v9 = vld [vmem:[%s7460_s7 + $0x48] sm:$0xff] }
 0x6a3   :  { %v1543_v35 = vmul.f32 %v4887_v18, %v6296_v30  ;;  %v4603_v18 = vpack.c.bf16 %v1795_v9, %v1794_v56 }
 0x6a4   :  { %v1554_v14 = vmul.f32 %v3821_v38, %v1544_v43  ;;  %4602 = vmatpush3.bf16.msra.mxu1 %v4599_v24  ;;  %v1798_v43 = vld [vmem:[%s7460_s7 + $0x60] sm:$0xff] }
 0x6a5   :  { %v1553_v19 = vmul.f32 %v3821_v38, %v1543_v35  ;;  %4604 = vmatprep.subr.bf16.mxu1 %v4603_v18  ;;  %v1797_v35 = vld [vmem:[%s7460_s7 + $0x58] sm:$0xff] }
 0x6a6   :  { %v4889_v44 = vpop.eup %4888 }
 0x6a7   :  { %3822 = vmatmul.mubr.msk.f32.vlgmr.msra.gmra.mrb[44].mxu0 %vm109_vm0, %v1553_v19  ;;  %v1545_v46 = vmul.f32 %v4889_v44, %v6311_v29  ;;  %v4891_v25 = vpop.eup %4890  ;;  %v1799_v44 = vld [vmem:[%s7460_s7 + $0x68] sm:$0xff] }
 0x6a8   :  { %1655 = vmatprep.mubr.f32.mxu0 %v7464_v34  ;;  %v1546_v6 = vmul.f32 %v4891_v25, %v6305_v39  ;;  %4606 = vmatpush3.bf16.msra.mxu1 %v4603_v18  ;;  %v1801_v25 = vld [vmem:[%s7460_s7 + $0x78] sm:$0xff] }
 0x6a9   :  { %v1555_v27 = vmul.f32 %v3821_v38, %v1545_v46  ;;  %v1800_v46 = vld [vmem:[%s7460_s7 + $0x70] sm:$0xff] }
 0x6aa   :  { %v1556_v7 = vmul.f32 %v3821_v38, %v1546_v6  ;;  %v1796_v38 = vld [vmem:[%s7460_s7 + $0x50] sm:$0xff] }
 0x6ab   :  { %3823 = vmatmul.mubr.msk.f32.gmra.mrb[46].mxu0 %vm109_vm0, %v1554_v14  ;;  %v4607_v19 = vpack.c.bf16 %v1797_v35, %v1796_v38  ;;  %v4611_v14 = vpack.c.bf16 %v1799_v44, %v1798_v43 }
 0x6ac   :  { %1661 = vmatprep.mubr.f32.mxu0 %v7464_v34 }
 0x6ad   :  { %4608 = vmatprep.subr.bf16.mxu1 %v4607_v19 }
 0x6ae   :  { %4610 = vmatpush3.bf16.msra.mxu1 %v4607_v19 }
 0x6af   :  { %3824 = vmatmul.mubr.msk.f32.gmra.mrb[48].mxu0 %vm109_vm0, %v1555_v27  ;;  %4612 = vmatprep.subr.bf16.mxu1 %v4611_v14  ;;  %v4615_v27 = vpack.c.bf16 %v1801_v25, %v1800_v46 }
 0x6b0   :  { %1667 = vmatprep.mubr.f32.mxu0 %v7464_v34 }
 0x6b2   :  { %4614 = vmatpush3.bf16.msra.mxu1 %v4611_v14 }
 0x6b3   :  { %3825 = vmatmul.mubr.msk.f32.gmra.mrb[50].mxu0 %vm109_vm0, %v1556_v7  ;;  %4616 = vmatprep.subr.bf16.mxu1 %v4615_v27 }
 0x6b4   :  { %2028 = vmatprep.mubr.f32.mxu0 %v7464_v34 }
 0x6b6   :  { %4618 = vmatpush3.bf16.msra.mxu1 %v4615_v27 }
 0x77a   :  { %v6395_v6 = vpop.f32.mrb[44].mxu0 }
 0x77b   :  { %v6398_v7 = vmul.f32 0.70710677, %v6395_v6  ;;  %v6400_v32 = vpop.f32.mrb[45].mxu0 }
 0x77d   :  { %v1682_v37 = vand.u32 2147483647, %v6398_v7  ;;  %vm1762_vm3 = vcmp.lt.f32.partialorder %v6398_v7, 0.0 }
 0x77e   :  { %v6403_v51 = vpop.f32.mrb[46].mxu0 }
 0x77f   :  { %v1686_v16 = vmul.f32 0.3275911, %v1682_v37  ;;  %v6406_v62 = vmul.f32 0.70710677, %v6403_v51  ;;  %v6408_v45 = vpop.f32.mrb[47].mxu0  ;;  %v1738_v43 = vmul.f32 %v1682_v37, %v1682_v37 }
 0x781   :  { %v1690_v0 = vadd.f32 1.0, %v1686_v16  ;;  %v1683_v12 = vand.u32 2147483647, %v6406_v62  ;;  %v1742_v27 = vsub.f32 0.0, %v1738_v43  ;;  %vm1763_vm4 = vcmp.lt.f32.partialorder %v6406_v62, 0.0 }
 0x782   :  { %v6411_v13 = vpop.f32.mrb[48].mxu0 }
 0x783   :  { %4892 = vrcp.f32 %v1690_v0  ;;  %v1687_v59 = vmul.f32 0.3275911, %v1683_v12  ;;  %v6413_v50 = vpop.f32.mrb[49].mxu0  ;;  %v6416_v24 = vmul.f32 0.70710677, %v6411_v13  ;;  %v1739_v16 = vmul.f32 %v1683_v12, %v1683_v12 }
 0x784   :  { %v1746_v41 = vmul.f32 1.442695, %v1742_v27 }
 0x785   :  { %v1691_v56 = vadd.f32 1.0, %v1687_v59  ;;  %v1684_v9 = vand.u32 2147483647, %v6416_v24  ;;  %v1743_v36 = vsub.f32 0.0, %v1739_v16  ;;  %vm1764_vm5 = vcmp.lt.f32.partialorder %v6416_v24, 0.0 }
 0x786   :  { %v6419_v18 = vpop.f32.mrb[50].mxu0 }
 0x787   :  { %4894 = vrcp.f32 %v1691_v56  ;;  %v6422_v38 = vmul.f32 0.70710677, %v6419_v18  ;;  %v6424_v35 = vpop.f32.mrb[51].mxu0  ;;  %v1688_v19 = vmul.f32 0.3275911, %v1684_v9  ;;  %v1740_v49 = vmul.f32 %v1684_v9, %v1684_v9 }
 0x788   :  { %v1748_v5 = vmul.f32 1.442695, %v1743_v36 }
 0x789   :  { %v1685_v44 = vand.u32 2147483647, %v6422_v38  ;;  %v1692_v14 = vadd.f32 1.0, %v1688_v19  ;;  %v1744_v43 = vsub.f32 0.0, %v1740_v49  ;;  %vm1765_vm6 = vcmp.lt.f32.partialorder %v6422_v38, 0.0 }
 0x78b   :  { %v1689_v46 = vmul.f32 0.3275911, %v1685_v44  ;;  %4896 = vrcp.f32 %v1692_v14  ;;  %v1741_v19 = vmul.f32 %v1685_v44, %v1685_v44  ;;  %v1750_v21 = vmul.f32 1.442695, %v1744_v43 }
 0x78d   :  { %v4893_v25 = vpop.eup %4892  ;;  %v1693_v0 = vadd.f32 1.0, %v1689_v46  ;;  %v1745_v27 = vsub.f32 0.0, %v1741_v19 }
 0x78e   :  { %v1702_v59 = vmul.f32 1.0614054, %v4893_v25 }
 0x78f   :  { %4898 = vrcp.f32 %v1693_v0  ;;  %v1752_v15 = vmul.f32 1.442695, %v1745_v27 }
 0x790   :  { %v1706_v34 = vadd.f32 -1.4531521, %v1702_v59  ;;  %4900 = vpow2.f32 %v1746_v41 }
 0x791   :  { %v4895_v56 = vpop.eup %4894  ;;  %4902 = vpow2.f32 %v1748_v5 }
 0x792   :  { %v1710_v26 = vmul.f32 %v4893_v25, %v1706_v34  ;;  %v1703_v47 = vmul.f32 1.0614054, %v4895_v56  ;;  %4904 = vpow2.f32 %v1750_v21 }
 0x793   :  { %4906 = vpow2.f32 %v1752_v15 }
 0x794   :  { %v1714_v54 = vadd.f32 1.4214138, %v1710_v26  ;;  %v1707_v37 = vadd.f32 -1.4531521, %v1703_v47 }
 0x795   :  { %v4897_v33 = vpop.eup %4896 }
 0x796   :  { %v1718_v14 = vmul.f32 %v4893_v25, %v1714_v54  ;;  %v1711_v8 = vmul.f32 %v4895_v56, %v1707_v37  ;;  %v1704_v12 = vmul.f32 1.0614054, %v4897_v33 }
 0x798   :  { %v1722_v46 = vadd.f32 -0.28449672, %v1718_v14  ;;  %v1715_v57 = vadd.f32 1.4214138, %v1711_v8  ;;  %v1708_v59 = vadd.f32 -1.4531521, %v1704_v12 }
 0x799   :  { %v4899_v0 = vpop.eup %4898 }
 0x79a   :  { %v1726_v16 = vmul.f32 %v4893_v25, %v1722_v46  ;;  %v1719_v34 = vmul.f32 %v4895_v56, %v1715_v57  ;;  %v1705_v9 = vmul.f32 1.0614054, %v4899_v0  ;;  %v1712_v26 = vmul.f32 %v4897_v33, %v1708_v59  ;;  %v4901_v14 = vpop.eup %4900 }
 0x79b   :  { %v4903_v59 = vpop.eup %4902 }
 0x79c   :  { %v1730_v47 = vadd.f32 0.2548296, %v1726_v16  ;;  %v1723_v41 = vadd.f32 -0.28449672, %v1719_v34  ;;  %v1709_v36 = vadd.f32 -1.4531521, %v1705_v9 }
 0x79d   :  { %v1716_v44 = vadd.f32 1.4214138, %v1712_v26 }
 0x79e   :  { %v1734_v54 = vmul.f32 %v4893_v25, %v1730_v47  ;;  %v1727_v37 = vmul.f32 %v4895_v56, %v1723_v41  ;;  %v1713_v49 = vmul.f32 %v4899_v0, %v1709_v36  ;;  %v1674_v41 = vmul.f32 0.5, %v6395_v6 }
 0x79f   :  { %v1720_v8 = vmul.f32 %v4897_v33, %v1716_v44 }
 0x7a0   :  { %v1754_v55 = vmul.f32 %v4901_v14, %v1734_v54  ;;  %v1731_v5 = vadd.f32 0.2548296, %v1727_v37  ;;  %v1717_v12 = vadd.f32 1.4214138, %v1713_v49  ;;  %v4905_v54 = vpop.eup %4904 }
 0x7a1   :  { %v1724_v19 = vadd.f32 -0.28449672, %v1720_v8  ;;  %v4907_v8 = vpop.eup %4906 }
 0x7a2   :  { %v1758_v57 = vsub.f32 1.0, %v1754_v55  ;;  %v1735_v43 = vmul.f32 %v4895_v56, %v1731_v5  ;;  %v1721_v46 = vmul.f32 %v4899_v0, %v1717_v12  ;;  %v1675_v5 = vmul.f32 0.5, %v6403_v51 }
 0x7a3   :  { %v1728_v16 = vmul.f32 %v4897_v33, %v1724_v19 }
 0x7a4   :  { %v1766_v34 = vsub.f32 0.0, %v1758_v57  ;;  %v1755_v9 = vmul.f32 %v4903_v59, %v1735_v43  ;;  %v1725_v26 = vadd.f32 -0.28449672, %v1721_v46  ;;  %v1676_v59 = vmul.f32 0.5, %v6411_v13 }
 0x7a5   :  { %v1732_v25 = vadd.f32 0.2548296, %v1728_v16 }
 0x7a6   :  { %v1770_v21 = vsel %vm1762_vm3, %v1766_v34, %v1758_v57  ;;  %v1759_v27 = vsub.f32 1.0, %v1755_v9  ;;  %v1729_v47 = vmul.f32 %v4899_v0, %v1725_v26  ;;  %v1677_v34 = vmul.f32 0.5, %v6419_v18 }
 0x7a7   :  { %v1774_v36 = vadd.f32 1.0, %v1770_v21  ;;  %v1736_v44 = vmul.f32 %v4897_v33, %v1732_v25 }
 0x7a8   :  { %v1767_v15 = vsub.f32 0.0, %v1759_v27  ;;  %v1733_v55 = vadd.f32 0.2548296, %v1729_v47 }
 0x7a9   :  { %v1778_v56 = vmul.f32 %v1774_v36, %v1674_v41  ;;  %v1756_v37 = vmul.f32 %v4905_v54, %v1736_v44 }
 0x7aa   :  { %v1771_v49 = vsel %vm1763_vm4, %v1767_v15, %v1759_v27  ;;  %v1737_v14 = vmul.f32 %v4899_v0, %v1733_v55 }
 0x7ab   :  { %v1782_v7 = vmul.f32 %v1778_v56, %v6400_v32  ;;  %v1775_v12 = vadd.f32 1.0, %v1771_v49  ;;  %v1760_v19 = vsub.f32 1.0, %v1756_v37  ;;  %v3828_v56 = vld [vmem:[%s7456_s3 + $0x80] sm:$0xff]  ;;  %v3830_v37 = vld [vmem:[%s7456_s3 + $0x90] sm:$0xff] }
 0x7ac   :  { %v1757_v57 = vmul.f32 %v4907_v8, %v1737_v14  ;;  %v4621_v49 = vpack.c.bf16 %v3830_v37, %v3828_v56  ;;  %v3833_v14 = vld [vmem:[%s7456_s3 + $0xa8] sm:$0xff]  ;;  %v3835_v8 = vld [vmem:[%s7456_s3 + $0xb8] sm:$0xff] }
 0x7ad   :  { %v1779_v6 = vmul.f32 %v1775_v12, %v1675_v5  ;;  %v1768_v43 = vsub.f32 0.0, %v1760_v19  ;;  %4341 = vmatprep.mubr.f32.mxu1 %v1782_v7  ;;  %v4623_v7 = vpack.c.bf16 %v3835_v8, %v3833_v14  ;;  %v3832_v5 = vld [vmem:[%s7456_s3 + $0xa0] sm:$0xff]  ;;  %v3834_v12 = vld [vmem:[%s7456_s3 + $0xb0] sm:$0xff] }
 0x7ae   :  { %v1761_v33 = vsub.f32 1.0, %v1757_v57  ;;  %v3837_v57 = vld [vmem:[%s7456_s3 + $0xc8] sm:$0xff] }
 0x7af   :  { %v1783_v46 = vmul.f32 %v1779_v6, %v6408_v45  ;;  %v1772_v62 = vsel %vm1764_vm5, %v1768_v43, %v1760_v19  ;;  %v4625_v19 = vpack.c.bf16 %v3834_v12, %v3832_v5  ;;  %v3839_v6 = vld [vmem:[%s7456_s3 + $0xd8] sm:$0xff] }
 0x7b0   :  { %v1776_v0 = vadd.f32 1.0, %v1772_v62  ;;  %v1769_v16 = vsub.f32 0.0, %v1761_v33  ;;  %v4627_v43 = vpack.c.bf16 %v3839_v6, %v3837_v57 }
 0x7b1   :  { %4342 = vmatmul.mubr.f32.vlgmr.msra.gmra.mrb[32].mxu1 %v1783_v46  ;;  %v3838_v46 = vld [vmem:[%s7456_s3 + $0xd0] sm:$0xff] }
 0x7b2   :  { %v1780_v32 = vmul.f32 %v1776_v0, %v1676_v59  ;;  %v1773_v51 = vsel %vm1765_vm6, %v1769_v16, %v1761_v33  ;;  %v3836_v33 = vld [vmem:[%s7456_s3 + $0xc0] sm:$0xff]  ;;  %v3841_v59 = vld [vmem:[%s7456_s3 + $0xe8] sm:$0xff]  ;;  %v3843_v0 = vld [vmem:[%s7456_s3 + $0xf8] sm:$0xff] }
 0x7b3   :  { %v1777_v9 = vadd.f32 1.0, %v1773_v51  ;;  %v4629_v62 = vpack.c.bf16 %v3838_v46, %v3836_v33  ;;  %v4631_v16 = vpack.c.bf16 %v3843_v0, %v3841_v59  ;;  %v3842_v51 = vld [vmem:[%s7456_s3 + $0xf0] sm:$0xff] }
 0x7b4   :  { %v1784_v26 = vmul.f32 %v1780_v32, %v6413_v50  ;;  %v3840_v32 = vld [vmem:[%s7456_s3 + $0xe0] sm:$0xff] }
 0x7b5   :  { %v1781_v25 = vmul.f32 %v1777_v9, %v1677_v34  ;;  %v4633_v34 = vpack.c.bf16 %v3842_v51, %v3840_v32 }
 0x7b6   :  { %4344 = vmatprep.mubr.f32.mxu1 %v1784_v26 }
 0x7b7   :  { %v1785_v24 = vmul.f32 %v1781_v25, %v6424_v35 }
 0x7b9   :  { %4345 = vmatmul.mubr.f32.gmra.mrb[34].mxu1 %v1785_v24 }
 0x884   :  { %v4343_v45 = vpop.f32.mrb[32].mxu1 }
 0x885   :  { %v6440_v13 = vadd.f32 %v4343_v45, %v6291_v23  ;;  %v1868_v21 = vpop.f32.mrb[33].mxu1 }
 0x886   :  { %v6443_v38 = vadd.f32 %v1868_v21, %v6296_v30 }
 0x887   :  { %v1894_v27 = vmul.f32 %v6440_v13, %v6440_v13 }
 0x888   :  { %v1893_v18 = vmul.f32 %v6443_v38, %v6443_v38 }
 0x889   :  { %v1900_v50 = vsel %vm109_vm0, %v1894_v27, 0.0 }
 0x88a   :  { %1901 = vadd.xlane.f32.xlu1 %v1900_v50  ;;  %v1897_v35 = vsel %vm109_vm0, %v1893_v18, 0.0 }
 0x88b   :  { %1898 = vadd.xlane.f32.xlu0 %v1897_v35 }
 0x88c   :  { %v4346_v47 = vpop.f32.mrb[34].mxu1 }
 0x88d   :  { %v6452_v23 = vadd.f32 %v4346_v47, %v6305_v39  ;;  %v1878_v41 = vpop.f32.mrb[35].mxu1  ;;  %v3829_v39 = vld [vmem:[%s7456_s3 + $0x88] sm:$0xff] }
 0x88e   :  { %v6455_v30 = vadd.f32 %v1878_v41, %v6311_v29  ;;  %v3831_v29 = vld [vmem:[%s7456_s3 + $0x98] sm:$0xff] }
 0x88f   :  { %v1896_v36 = vmul.f32 %v6452_v23, %v6452_v23  ;;  %v4619_v55 = vpack.c.bf16 %v3831_v29, %v3829_v39 }
 0x890   :  { %v1895_v44 = vmul.f32 %v6455_v30, %v6455_v30 }
 0x891   :  { %v1906_v54 = vsel %vm109_vm0, %v1896_v36, 0.0  ;;  %4620 = vmatprep.subr.bf16.mxu0 %v4619_v55  ;;  %v7494_v55 = vmov 0.0  }
 0x892   :  { %1907 = vadd.xlane.f32.xlu1 %v1906_v54  ;;  %v1903_v15 = vsel %vm109_vm0, %v1895_v44, 0.0  ;;  %4622 = vmatpush1.bf16.msra.mxu0 %v4621_v49  ;;  %v3827_v54 = vld [vmem:[%s7458_s5 + $0x1] ss:$0 sm:$0xff] }
 0x893   :  { %1904 = vadd.xlane.f32.xlu0 %v1903_v15  ;;  %4624 = vmatprep.subr.bf16.mxu0 %v4623_v7 }
 0x896   :  { %4626 = vmatpush1.bf16.msra.mxu0 %v4625_v19 }
 0x897   :  { %4628 = vmatprep.subr.bf16.mxu0 %v4627_v43 }
 0x89a   :  { %4630 = vmatpush1.bf16.msra.mxu0 %v4629_v62 }
 0x89b   :  { %4632 = vmatprep.subr.bf16.mxu0 %v4631_v16 }
 0x89e   :  { %4634 = vmatpush1.bf16.msra.mxu0 %v4633_v34 }
 0x917   :  { %v1902_v9 = vpop.xlane.xlu1 %1901 }
 0x918   :  { %v1910_v26 = vmul.f32 0.015625, %v1902_v9  ;;  %v1899_v25 = vpop.xlane.xlu0 %1898 }
 0x919   :  { %v1909_v24 = vmul.f32 0.015625, %v1899_v25 }
 0x91a   :  { %v1914_v45 = vadd.f32 1e-06, %v1910_v26 }
 0x91b   :  { %v1913_v21 = vadd.f32 1e-06, %v1909_v24 }
 0x91c   :  { %4908 = vrsqrt.f32 %v1914_v45 }
 0x91d   :  { %4910 = vrsqrt.f32 %v1913_v21 }
 0x91f   :  { %v1908_v27 = vpop.xlane.xlu1 %1907 }
 0x920   :  { %v1912_v18 = vmul.f32 0.015625, %v1908_v27  ;;  %v1905_v50 = vpop.xlane.xlu0 %1904 }
 0x921   :  { %v1911_v35 = vmul.f32 0.015625, %v1905_v50 }
 0x922   :  { %v1916_v47 = vadd.f32 1e-06, %v1912_v18 }
 0x923   :  { %v1915_v41 = vadd.f32 1e-06, %v1911_v35 }
 0x924   :  { %4912 = vrsqrt.f32 %v1916_v47  ;;  %v7496_v47 = vld [vmem:[#allocation7_spill] sm:$0xff] }
 0x925   :  { %4914 = vrsqrt.f32 %v1915_v41  ;;  %v7497_v41 = vld [vmem:[#allocation6_spill] sm:$0xff] }
 0x926   :  { %v4909_v36 = vpop.eup %4908 }
 0x927   :  { %v4911_v44 = vpop.eup %4910  ;;  %v1922_v29 = vmul.f32 %v4909_v36, %v6440_v13  ;;  %v7498_v36 = vld [vmem:[#allocation9_spill] sm:$0xff] }
 0x928   :  { %v1921_v15 = vmul.f32 %v4911_v44, %v6443_v38  ;;  %v7499_v44 = vld [vmem:[#allocation8_spill] sm:$0xff] }
 0x929   :  { %v1932_v37 = vmul.f32 %v3827_v54, %v1922_v29  ;;  %v7501_v29 = vld [vmem:[#allocation10_spill] sm:$0xff] }
 0x92a   :  { %v1931_v39 = vmul.f32 %v3827_v54, %v1921_v15  ;;  %v7500_v15 = vld [vmem:[#allocation11_spill] sm:$0xff] }
 0x92c   :  { %3844 = vmatmul.mubr.msk.f32.vlgmr.msra.gmra.mrb[52].mxu0 %vm109_vm0, %v1931_v39 }
 0x92d   :  { %2034 = vmatprep.mubr.f32.mxu0 %v7494_v55 }
 0x92e   :  { %v4913_v56 = vpop.eup %4912 }
 0x92f   :  { %v4915_v49 = vpop.eup %4914  ;;  %v1924_v7 = vmul.f32 %v4913_v56, %v6452_v23 }
 0x930   :  { %3845 = vmatmul.mubr.msk.f32.gmra.mrb[54].mxu0 %vm109_vm0, %v1932_v37  ;;  %v1923_v14 = vmul.f32 %v4915_v49, %v6455_v30  ;;  %v7502_v37 = vld [vmem:[#allocation13_spill] sm:$0xff] }
 0x931   :  { %2040 = vmatprep.mubr.f32.mxu0 %v7494_v55  ;;  %v1934_v5 = vmul.f32 %v3827_v54, %v1924_v7  ;;  %v7504_v7 = vld [vmem:[#allocation15_spill] sm:$0xff] }
 0x932   :  { %v1933_v8 = vmul.f32 %v3827_v54, %v1923_v14  ;;  %v7503_v14 = vld [vmem:[#allocation12_spill] sm:$0xff] }
 0x934   :  { %3846 = vmatmul.mubr.msk.f32.gmra.mrb[56].mxu0 %vm109_vm0, %v1933_v8 }
 0x935   :  { %2046 = vmatprep.mubr.f32.mxu0 %v7494_v55 }
 0x938   :  { %3847 = vmatmul.mubr.msk.f32.gmra.mrb[58].mxu0 %vm109_vm0, %v1934_v5 }
 0x9ff   :  { %v6525_v12 = vpop.f32.mrb[52].mxu0 }
 0xa00   :  { %v2032_v19 = vpop.f32.mrb[53].mxu0  ;;  %v2053_v57 = vmul.f32 %v6033_v4, %v6525_v12  ;;  %v2057_v35 = vmul.f32 %v6045_v3, %v6525_v12  ;;  %v2061_v3 = vmul.f32 %v6089_v63, %v6525_v12  ;;  %v2077_v39 = vmul.f32 %v7500_v15, %v6525_v12 }
 0xa01   :  { %v2081_v5 = vmul.f32 %v7504_v7, %v6525_v12 }
 0xa02   :  { %4355 = vmatprep.mubr.msk.f32.mxu0 %vm109_vm0, %v2053_v57 }
 0xa03   :  { %v6530_v6 = vpop.f32.mrb[54].mxu0 }
 0xa04   :  { %v2038_v43 = vpop.f32.mrb[55].mxu0  ;;  %v4738_v33 = vpack.i.bf16 %v6530_v6, %v6525_v12  ;;  %v2054_v27 = vmul.f32 %v6027_v61, %v6530_v6  ;;  %v2058_v17 = vmul.f32 %v6039_v58, %v6530_v6  ;;  %v2062_v58 = vmul.f32 %v6083_v2, %v6530_v6 }
 0xa05   :  { %v4647_v46 = vpack.c.bf16 %v2038_v43, %v2032_v19  ;;  %v2066_v2 = vmul.f32 %v6111_v48, %v6530_v6  ;;  %v2070_v48 = vmul.f32 %v6139_v22, %v6530_v6  ;;  %v2074_v22 = vmul.f32 %v7497_v41, %v6530_v6  ;;  %v7505_v19 = vld [vmem:[#allocation14_spill] sm:$0xff]  ;;  %v7506_v43 = vld [vmem:[#allocation17_spill] sm:$0xff] }
 0xa06   :  { %4739 = vrot.lane.b32.xlu0 %v4738_v33, %s5201_s19  ;;  %v2078_v56 = vmul.f32 %v7501_v29, %v6530_v6  ;;  %v2082_v57 = vmul.f32 %v7505_v19, %v6530_v6 }
 0xa07   :  { %v6535_v62 = vpop.f32.mrb[56].mxu0  ;;  %4648 = vmatprep.subr.bf16.mxu1 %v4647_v46 }
 0xa08   :  { %v2044_v59 = vpop.f32.mrb[57].mxu0  ;;  %4650 = vmatpush3.bf16.msra.mxu1 %v4647_v46  ;;  %v2055_v18 = vmul.f32 %v6060_v28, %v6535_v62  ;;  %v2059_v61 = vmul.f32 %v6073_v42, %v6535_v62  ;;  %v2063_v28 = vmul.f32 %v6103_v31, %v6535_v62  ;;  %v2065_v42 = vmul.f32 %v6117_v10, %v6525_v12  ;;  %v7507_v46 = vld [vmem:[#allocation16_spill] sm:$0xff] }
 0xa09   :  { %v2067_v63 = vmul.f32 %v6131_v40, %v6535_v62  ;;  %v2069_v31 = vmul.f32 %v6145_v52, %v6525_v12  ;;  %v2071_v10 = vmul.f32 %v6159_v60, %v6535_v62  ;;  %v7495_v40 = vld [vmem:[#allocation5_spill] sm:$0xff]  ;;  %v2073_v52 = vmul.f32 %v7496_v47, %v6525_v12 }
 0xa0a   :  { %v2075_v60 = vmul.f32 %v7498_v36, %v6535_v62  ;;  %v2079_v49 = vmul.f32 %v7502_v37, %v6535_v62  ;;  %v2083_v33 = vmul.f32 %v7506_v43, %v6535_v62 }
 0xa0b   :  { %v6537_v0 = vpop.f32.mrb[58].mxu0 }
 0xa0c   :  { %v2050_v16 = vpop.f32.mrb[59].mxu0  ;;  %v4743_v4 = vpack.i.bf16 %v6537_v0, %v6535_v62  ;;  %v2056_v50 = vmul.f32 %v6052_v11, %v6537_v0  ;;  %v2060_v11 = vmul.f32 %v6067_v53, %v6537_v0  ;;  %v2064_v53 = vmul.f32 %v6097_v20, %v6537_v0  ;;  %v5113_v62 = vld [vmem:[%s7454_s1] sm:$0xff] }
 0xa0d   :  { %v4651_v32 = vpack.c.bf16 %v2050_v16, %v2044_v59  ;;  %v2068_v20 = vmul.f32 %v6125_v1, %v6537_v0  ;;  %v2072_v1 = vmul.f32 %v7495_v40, %v6537_v0  ;;  %v2076_v54 = vmul.f32 %v7499_v44, %v6537_v0  ;;  %v5112_v16 = vld [vmem:[%s7454_s1 + $0x8] sm:$0xff]  ;;  %v5122_v44 = vld [vmem:[%s7454_s1 + $0x58] sm:$0xff] }
 0xa0e   :  { %4744 = vrot.lane.b32.xlu1 %v4743_v4, %s5201_s19  ;;  %v2080_v8 = vmul.f32 %v7503_v14, %v6537_v0  ;;  %v2084_v59 = vmul.f32 %v7507_v46, %v6537_v0  ;;  %v5120_v40 = vld [vmem:[%s7454_s1 + $0x48] sm:$0xff]  ;;  %v5126_v46 = vld [vmem:[%s7454_s1 + $0x78] sm:$0xff] }
 0xa0f   :  { %4652 = vmatprep.subr.bf16.mxu1 %v4651_v32  ;;  %v5124_v14 = vld [vmem:[%s7454_s1 + $0x68] sm:$0xff] }
 0xa10   :  { %4654 = vmatpush3.bf16.msra.mxu1 %v4651_v32 }
 0xa78   :  { %v4740_v51 = vpop.permute.xlu0 %4739 }
 0xa79   :  { %v4742_v34 = vunpack.i.h.bf16 %v4740_v51  ;;  %v4741_v9 = vunpack.i.l.bf16 %v4740_v51 }
 0xa7b   :  { %v4635_v26 = vpack.c.bf16 %v4742_v34, %v4741_v9  ;;  %v5114_v9 = vld [vmem:[%s7454_s1 + $0x18] sm:$0xff] }
 0xa7d   :  { %4637 = vmatprep.subr.msk.bf16.mxu0 %vm5381_vm1, %v4635_v26 }
 0xa7e   :  { %4640 = vmatpush3.bf16.xpose.msk.msra.mxu0 %vm5381_vm1, %v4635_v26 }
 0xa80   :  { %v4745_v25 = vpop.permute.xlu1 %4744 }
 0xa81   :  { %v4747_v24 = vunpack.i.h.bf16 %v4745_v25  ;;  %v4746_v45 = vunpack.i.l.bf16 %v4745_v25 }
 0xa83   :  { %v4641_v21 = vpack.c.bf16 %v4747_v24, %v4746_v45  ;;  %v5115_v24 = vld [vmem:[%s7454_s1 + $0x10] sm:$0xff] }
 0xa85   :  { %4643 = vmatprep.subr.msk.bf16.mxu0 %vm5381_vm1, %v4641_v21 }
 0xa86   :  { %4646 = vmatpush3.bf16.xpose.msk.msra.mxu0 %vm5381_vm1, %v4641_v21 }
 0xa8d   :  { %4356 = vmatmul.mubr.msk.f32.vlgmr.msra.gmra.mrb[60].mxu0 %vm109_vm0, %v2054_v27 }
 0xa8e   :  { %4358 = vmatprep.mubr.msk.f32.mxu0 %vm109_vm0, %v2055_v18 }
 0xa91   :  { %4359 = vmatmul.mubr.msk.f32.gmra.mrb[62].mxu0 %vm109_vm0, %v2056_v50  ;;  %v5116_v50 = vld [vmem:[%s7454_s1 + $0x28] sm:$0xff] }
 0xa92   :  { %4361 = vmatprep.mubr.msk.f32.mxu0 %vm109_vm0, %v2057_v35 }
 0xa95   :  { %4362 = vmatmul.mubr.msk.f32.gmra.mrb[64].mxu0 %vm109_vm0, %v2058_v17 }
 0xa96   :  { %4364 = vmatprep.mubr.msk.f32.mxu0 %vm109_vm0, %v2059_v61  ;;  %v5117_v61 = vld [vmem:[%s7454_s1 + $0x20] sm:$0xff] }
 0xa99   :  { %4365 = vmatmul.mubr.msk.f32.gmra.mrb[66].mxu0 %vm109_vm0, %v2060_v11 }
 0xa9a   :  { %4367 = vmatprep.mubr.msk.f32.mxu0 %vm109_vm0, %v2061_v3 }
 0xa9d   :  { %4368 = vmatmul.mubr.msk.f32.gmra.mrb[68].mxu0 %vm109_vm0, %v2062_v58 }
 0xa9e   :  { %4370 = vmatprep.mubr.msk.f32.mxu0 %vm109_vm0, %v2063_v28 }
 0xaa1   :  { %4371 = vmatmul.mubr.msk.f32.gmra.mrb[70].mxu0 %vm109_vm0, %v2064_v53  ;;  %v5118_v53 = vld [vmem:[%s7454_s1 + $0x38] sm:$0xff] }
 0xaa2   :  { %4373 = vmatprep.mubr.msk.f32.mxu0 %vm109_vm0, %v2065_v42 }
 0xaa5   :  { %4374 = vmatmul.mubr.msk.f32.gmra.mrb[72].mxu0 %vm109_vm0, %v2066_v2 }
 0xaa6   :  { %4376 = vmatprep.mubr.msk.f32.mxu0 %vm109_vm0, %v2067_v63  ;;  %v5119_v63 = vld [vmem:[%s7454_s1 + $0x30] sm:$0xff] }
 0xaa9   :  { %4377 = vmatmul.mubr.msk.f32.gmra.mrb[74].mxu0 %vm109_vm0, %v2068_v20 }
 0xaaa   :  { %4379 = vmatprep.mubr.msk.f32.mxu0 %vm109_vm0, %v2069_v31 }
 0xaad   :  { %4380 = vmatmul.mubr.msk.f32.gmra.mrb[76].mxu0 %vm109_vm0, %v2070_v48 }
 0xaae   :  { %4382 = vmatprep.mubr.msk.f32.mxu0 %vm109_vm0, %v2071_v10 }
 0xab1   :  { %4383 = vmatmul.mubr.msk.f32.gmra.mrb[78].mxu0 %vm109_vm0, %v2072_v1 }
 0xab2   :  { %4385 = vmatprep.mubr.msk.f32.mxu0 %vm109_vm0, %v2073_v52  ;;  %v5121_v52 = vld [vmem:[%s7454_s1 + $0x40] sm:$0xff] }
 0xab5   :  { %4386 = vmatmul.mubr.msk.f32.gmra.mrb[80].mxu0 %vm109_vm0, %v2074_v22 }
 0xab6   :  { %4388 = vmatprep.mubr.msk.f32.mxu0 %vm109_vm0, %v2075_v60 }
 0xab9   :  { %4389 = vmatmul.mubr.msk.f32.gmra.mrb[82].mxu0 %vm109_vm0, %v2076_v54 }
 0xaba   :  { %4391 = vmatprep.mubr.msk.f32.mxu0 %vm109_vm0, %v2077_v39  ;;  %v5123_v39 = vld [vmem:[%s7454_s1 + $0x50] sm:$0xff] }
 0xabd   :  { %4392 = vmatmul.mubr.msk.f32.gmra.mrb[84].mxu0 %vm109_vm0, %v2078_v56 }
 0xabe   :  { %4394 = vmatprep.mubr.msk.f32.mxu0 %vm109_vm0, %v2079_v49 }
 0xac1   :  { %4395 = vmatmul.mubr.msk.f32.gmra.mrb[86].mxu0 %vm109_vm0, %v2080_v8 }
 0xac2   :  { %4397 = vmatprep.mubr.msk.f32.mxu0 %vm109_vm0, %v2081_v5  ;;  %v5125_v5 = vld [vmem:[%s7454_s1 + $0x60] sm:$0xff] }
 0xac5   :  { %4398 = vmatmul.mubr.msk.f32.gmra.mrb[88].mxu0 %vm109_vm0, %v2082_v57 }
 0xac6   :  { %4400 = vmatprep.mubr.msk.f32.mxu0 %vm109_vm0, %v2083_v33 }
 0xac9   :  { %4401 = vmatmul.mubr.msk.f32.gmra.mrb[90].mxu0 %vm109_vm0, %v2084_v59 }
 0xaca   :  { %3438 = vmatprep.mubr.f32.mxu0 %v7494_v55 }
 0xb60   :  { %v4357_v12 = vpop.f32.mrb[60].mxu0 }
 0xb61   :  { %v6647_v6 = vadd.f32 %v5112_v16, %v4357_v12  ;;  %v2267_v4 = vpop.f32.mrb[61].mxu0  ;;  %v5127_v16 = vld [vmem:[%s7454_s1 + $0x70] sm:$0xff] }
 0xb62   :  { %v6652_v32 = vadd.f32 %v5113_v62, %v2267_v4 }
 0xb63   :  { %v2429_v0 = vsel %vm639_vm2, %v6647_v6, -inf }
 0xb64   :  { %2430 = vmax.xlane.f32.xlu0 %v2429_v0  ;;  %v4360_v51 = vpop.f32.mrb[62].mxu0  ;;  %v2426_v34 = vsel %vm639_vm2, %v6652_v32, -inf }
 0xb65   :  { %v6661_v26 = vadd.f32 %v5114_v9, %v4360_v51  ;;  %v2277_v25 = vpop.f32.mrb[63].mxu0  ;;  %2427 = vmax.xlane.f32.xlu1 %v2426_v34  ;;  %v5128_v34 = vld [vmem:[%s7454_s1 + $0x88] sm:$0xff] }
 0xb66   :  { %v6666_v45 = vadd.f32 %v5115_v24, %v2277_v25  ;;  %v5129_v24 = vld [vmem:[%s7454_s1 + $0x80] sm:$0xff] }
 0xb67   :  { %v2435_v21 = vsel %vm639_vm2, %v6661_v26, -inf }
 0xb68   :  { %v4363_v27 = vpop.f32.mrb[64].mxu0  ;;  %v2432_v18 = vsel %vm639_vm2, %v6666_v45, -inf }
 0xb69   :  { %v6675_v35 = vadd.f32 %v5116_v50, %v4363_v27  ;;  %v2287_v17 = vpop.f32.mrb[65].mxu0  ;;  %2433 = vmax.xlane.f32.xlu0 %v2432_v18  ;;  %2436 = vmax.xlane.f32.xlu1 %v2435_v21 }
 0xb6a   :  { %v6680_v11 = vadd.f32 %v5117_v61, %v2287_v17  ;;  %v5130_v17 = vld [vmem:[%s7454_s1 + $0x98] sm:$0xff] }
 0xb6b   :  { %v2441_v3 = vsel %vm639_vm2, %v6675_v35, -inf }
 0xb6c   :  { %v4366_v58 = vpop.f32.mrb[66].mxu0  ;;  %v2438_v28 = vsel %vm639_vm2, %v6680_v11, -inf }
 0xb6d   :  { %v6689_v42 = vadd.f32 %v5118_v53, %v4366_v58  ;;  %v2297_v2 = vpop.f32.mrb[67].mxu0  ;;  %2439 = vmax.xlane.f32.xlu0 %v2438_v28  ;;  %2442 = vmax.xlane.f32.xlu1 %v2441_v3  ;;  %v5131_v58 = vld [vmem:[%s7454_s1 + $0x90] sm:$0xff] }
 0xb6e   :  { %v6694_v20 = vadd.f32 %v5119_v63, %v2297_v2 }
 0xb6f   :  { %v2447_v31 = vsel %vm639_vm2, %v6689_v42, -inf }
 0xb70   :  { %v4369_v48 = vpop.f32.mrb[68].mxu0  ;;  %v2444_v10 = vsel %vm639_vm2, %v6694_v20, -inf }
 0xb71   :  { %v6703_v1 = vadd.f32 %v5120_v40, %v4369_v48  ;;  %v2307_v47 = vpop.f32.mrb[69].mxu0  ;;  %2445 = vmax.xlane.f32.xlu0 %v2444_v10  ;;  %2448 = vmax.xlane.f32.xlu1 %v2447_v31  ;;  %v5132_v31 = vld [vmem:[%s7454_s1 + $0xa8] sm:$0xff]  ;;  %v5133_v40 = vld [vmem:[%s7454_s1 + $0xa0] sm:$0xff] }
 0xb72   :  { %v6708_v41 = vadd.f32 %v5121_v52, %v2307_v47 }
 0xb73   :  { %v2453_v22 = vsel %vm639_vm2, %v6703_v1, -inf }
 0xb74   :  { %v4372_v36 = vpop.f32.mrb[70].mxu0  ;;  %v2450_v60 = vsel %vm639_vm2, %v6708_v41, -inf }
 0xb75   :  { %v6717_v54 = vadd.f32 %v5122_v44, %v4372_v36  ;;  %v2317_v15 = vpop.f32.mrb[71].mxu0  ;;  %2451 = vmax.xlane.f32.xlu0 %v2450_v60  ;;  %2454 = vmax.xlane.f32.xlu1 %v2453_v22  ;;  %v5134_v60 = vld [vmem:[%s7454_s1 + $0xb8] sm:$0xff] }
 0xb76   :  { %v6722_v29 = vadd.f32 %v5123_v39, %v2317_v15  ;;  %v5135_v39 = vld [vmem:[%s7454_s1 + $0xb0] sm:$0xff] }
 0xb77   :  { %v2459_v56 = vsel %vm639_vm2, %v6717_v54, -inf }
 0xb78   :  { %v4375_v37 = vpop.f32.mrb[72].mxu0  ;;  %v2456_v49 = vsel %vm639_vm2, %v6722_v29, -inf }
 0xb79   :  { %v6731_v8 = vadd.f32 %v5124_v14, %v4375_v37  ;;  %v2327_v7 = vpop.f32.mrb[73].mxu0  ;;  %2457 = vmax.xlane.f32.xlu0 %v2456_v49  ;;  %2460 = vmax.xlane.f32.xlu1 %v2459_v56 }
 0xb7a   :  { %v6736_v19 = vadd.f32 %v5125_v5, %v2327_v7  ;;  %v5136_v7 = vld [vmem:[%s7454_s1 + $0xc8] sm:$0xff] }
 0xb7b   :  { %v2465_v57 = vsel %vm639_vm2, %v6731_v8, -inf }
 0xb7c   :  { %v4378_v43 = vpop.f32.mrb[74].mxu0  ;;  %v2462_v33 = vsel %vm639_vm2, %v6736_v19, -inf }
 0xb7d   :  { %v6745_v59 = vadd.f32 %v5126_v46, %v4378_v43  ;;  %v2337_v12 = vpop.f32.mrb[75].mxu0  ;;  %2463 = vmax.xlane.f32.xlu0 %v2462_v33  ;;  %2466 = vmax.xlane.f32.xlu1 %v2465_v57  ;;  %v5137_v43 = vld [vmem:[%s7454_s1 + $0xc0] sm:$0xff] }
 0xb7e   :  { %v6750_v4 = vadd.f32 %v5127_v16, %v2337_v12 }
 0xb7f   :  { %v2471_v62 = vsel %vm639_vm2, %v6745_v59, -inf }
 0xb80   :  { %v4381_v0 = vpop.f32.mrb[76].mxu0  ;;  %v2468_v51 = vsel %vm639_vm2, %v6750_v4, -inf }
 0xb81   :  { %v6759_v9 = vadd.f32 %v5128_v34, %v4381_v0  ;;  %v2347_v25 = vpop.f32.mrb[77].mxu0  ;;  %2469 = vmax.xlane.f32.xlu0 %v2468_v51  ;;  %2472 = vmax.xlane.f32.xlu1 %v2471_v62  ;;  %v5138_v62 = vld [vmem:[%s7454_s1 + $0xd8] sm:$0xff]  ;;  %v5139_v34 = vld [vmem:[%s7454_s1 + $0xd0] sm:$0xff] }
 0xb82   :  { %v6764_v21 = vadd.f32 %v5129_v24, %v2347_v25 }
 0xb83   :  { %v2477_v27 = vsel %vm639_vm2, %v6759_v9, -inf }
 0xb84   :  { %v4384_v18 = vpop.f32.mrb[78].mxu0  ;;  %v2474_v50 = vsel %vm639_vm2, %v6764_v21, -inf }
 0xb85   :  { %v6773_v61 = vadd.f32 %v5130_v17, %v4384_v18  ;;  %v2357_v3 = vpop.f32.mrb[79].mxu0  ;;  %2475 = vmax.xlane.f32.xlu0 %v2474_v50  ;;  %2478 = vmax.xlane.f32.xlu1 %v2477_v27  ;;  %v5140_v50 = vld [vmem:[%s7454_s1 + $0xe8] sm:$0xff] }
 0xb86   :  { %v6778_v28 = vadd.f32 %v5131_v58, %v2357_v3  ;;  %v5141_v58 = vld [vmem:[%s7454_s1 + $0xe0] sm:$0xff] }
 0xb87   :  { %v2483_v53 = vsel %vm639_vm2, %v6773_v61, -inf }
 0xb88   :  { %v4387_v2 = vpop.f32.mrb[80].mxu0  ;;  %v2480_v63 = vsel %vm639_vm2, %v6778_v28, -inf }
 0xb89   :  { %v6787_v48 = vadd.f32 %v5132_v31, %v4387_v2  ;;  %v2367_v10 = vpop.f32.mrb[81].mxu0  ;;  %2481 = vmax.xlane.f32.xlu0 %v2480_v63  ;;  %2484 = vmax.xlane.f32.xlu1 %v2483_v53 }
 0xb8a   :  { %v6792_v47 = vadd.f32 %v5133_v40, %v2367_v10  ;;  %v5142_v10 = vld [vmem:[%s7454_s1 + $0xf8] sm:$0xff] }
 0xb8b   :  { %v2489_v52 = vsel %vm639_vm2, %v6787_v48, -inf }
 0xb8c   :  { %v4390_v22 = vpop.f32.mrb[82].mxu0  ;;  %v2486_v36 = vsel %vm639_vm2, %v6792_v47, -inf }
 0xb8d   :  { %v6801_v44 = vadd.f32 %v5134_v60, %v4390_v22  ;;  %v2377_v15 = vpop.f32.mrb[83].mxu0  ;;  %2487 = vmax.xlane.f32.xlu0 %v2486_v36  ;;  %2490 = vmax.xlane.f32.xlu1 %v2489_v52  ;;  %v5143_v22 = vld [vmem:[%s7454_s1 + $0xf0] sm:$0xff] }
 0xb8e   :  { %v6806_v56 = vadd.f32 %v5135_v39, %v2377_v15 }
 0xb8f   :  { %v2495_v37 = vsel %vm639_vm2, %v6801_v44, -inf }
 0xb90   :  { %v4393_v49 = vpop.f32.mrb[84].mxu0  ;;  %v2492_v14 = vsel %vm639_vm2, %v6806_v56, -inf }
 0xb91   :  { %v6815_v5 = vadd.f32 %v5136_v7, %v4393_v49  ;;  %v2387_v57 = vpop.f32.mrb[85].mxu0  ;;  %2493 = vmax.xlane.f32.xlu0 %v2492_v14  ;;  %2496 = vmax.xlane.f32.xlu1 %v2495_v37 }
 0xb92   :  { %v6820_v33 = vadd.f32 %v5137_v43, %v2387_v57 }
 0xb93   :  { %v2501_v46 = vsel %vm639_vm2, %v6815_v5, -inf }
 0xb94   :  { %v4396_v12 = vpop.f32.mrb[86].mxu0  ;;  %v2498_v16 = vsel %vm639_vm2, %v6820_v33, -inf }
 0xb95   :  { %v6829_v0 = vadd.f32 %v5138_v62, %v4396_v12  ;;  %v2397_v51 = vpop.f32.mrb[87].mxu0  ;;  %2499 = vmax.xlane.f32.xlu0 %v2498_v16  ;;  %2502 = vmax.xlane.f32.xlu1 %v2501_v46 }
 0xb96   :  { %v6834_v25 = vadd.f32 %v5139_v34, %v2397_v51 }
 0xb97   :  { %v2507_v24 = vsel %vm639_vm2, %v6829_v0, -inf }
 0xb98   :  { %v4399_v27 = vpop.f32.mrb[88].mxu0  ;;  %v2504_v18 = vsel %vm639_vm2, %v6834_v25, -inf }
 0xb99   :  { %v6843_v17 = vadd.f32 %v5140_v50, %v4399_v27  ;;  %v2407_v3 = vpop.f32.mrb[89].mxu0  ;;  %2505 = vmax.xlane.f32.xlu0 %v2504_v18  ;;  %2508 = vmax.xlane.f32.xlu1 %v2507_v24 }
 0xb9a   :  { %v6848_v53 = vadd.f32 %v5141_v58, %v2407_v3 }
 0xb9b   :  { %v2513_v2 = vsel %vm639_vm2, %v6843_v17, -inf }
 0xb9c   :  { %v4402_v63 = vpop.f32.mrb[90].mxu0  ;;  %v2510_v31 = vsel %vm639_vm2, %v6848_v53, -inf }
 0xb9d   :  { %v6857_v40 = vadd.f32 %v5142_v10, %v4402_v63  ;;  %v2417_v52 = vpop.f32.mrb[91].mxu0  ;;  %2511 = vmax.xlane.f32.xlu0 %v2510_v31  ;;  %2514 = vmax.xlane.f32.xlu1 %v2513_v2 }
 0xb9e   :  { %v6862_v36 = vadd.f32 %v5143_v22, %v2417_v52 }
 0xb9f   :  { %v2519_v60 = vsel %vm639_vm2, %v6857_v40, -inf }
 0xba0   :  { %v2516_v15 = vsel %vm639_vm2, %v6862_v36, -inf }
 0xba1   :  { %2517 = vmax.xlane.f32.xlu0 %v2516_v15  ;;  %2520 = vmax.xlane.f32.xlu1 %v2519_v60 }
 0xbf1   :  { %v2431_v39 = vpop.xlane.xlu0 %2430 }
 0xbf2   :  { %v2523_v37 = vsub.f32 %v6647_v6, %v2431_v39  ;;  %v2428_v49 = vpop.xlane.xlu1 %2427 }
 0xbf3   :  { %v2522_v14 = vsub.f32 %v6652_v32, %v2428_v49 }
 0xbf4   :  { %v2556_v7 = vmul.f32 1.442695, %v2523_v37 }
 0xbf5   :  { %v2554_v57 = vmul.f32 1.442695, %v2522_v14 }
 0xbf6   :  { %4916 = vpow2.f32 %v2556_v7  ;;  %v2434_v43 = vpop.xlane.xlu0 %2433  ;;  %v2437_v46 = vpop.xlane.xlu1 %2436 }
 0xbf7   :  { %4918 = vpow2.f32 %v2554_v57  ;;  %v2524_v12 = vsub.f32 %v6666_v45, %v2434_v43  ;;  %v2525_v16 = vsub.f32 %v6661_v26, %v2437_v46 }
 0xbf9   :  { %v2558_v62 = vmul.f32 1.442695, %v2524_v12  ;;  %v2560_v51 = vmul.f32 1.442695, %v2525_v16 }
 0xbfa   :  { %v2440_v34 = vpop.xlane.xlu0 %2439  ;;  %v2443_v24 = vpop.xlane.xlu1 %2442 }
 0xbfb   :  { %4920 = vpow2.f32 %v2558_v62  ;;  %v2526_v6 = vsub.f32 %v6680_v11, %v2440_v34  ;;  %v2527_v27 = vsub.f32 %v6675_v35, %v2443_v24 }
 0xbfc   :  { %4922 = vpow2.f32 %v2560_v51 }
 0xbfd   :  { %v2562_v32 = vmul.f32 1.442695, %v2526_v6  ;;  %v2564_v18 = vmul.f32 1.442695, %v2527_v27 }
 0xbfe   :  { %v2446_v50 = vpop.xlane.xlu0 %2445  ;;  %v2449_v3 = vpop.xlane.xlu1 %2448 }
 0xbff   :  { %4924 = vpow2.f32 %v2562_v32  ;;  %v2528_v58 = vsub.f32 %v6694_v20, %v2446_v50  ;;  %v2529_v45 = vsub.f32 %v6689_v42, %v2449_v3 }
 0xc00   :  { %v6876_v26 = vpop.eup %4916  ;;  %4926 = vpow2.f32 %v2564_v18 }
 0xc01   :  { %v6878_v2 = vpop.eup %4918  ;;  %v2566_v63 = vmul.f32 1.442695, %v2528_v58  ;;  %v2568_v31 = vmul.f32 1.442695, %v2529_v45  ;;  %v2621_v35 = vsel %vm639_vm2, %v6876_v26, 0.0 }
 0xc02   :  { %v2452_v11 = vpop.xlane.xlu0 %2451  ;;  %2622 = vadd.xlane.f32.xlu1 %v2621_v35  ;;  %v2455_v10 = vpop.xlane.xlu1 %2454  ;;  %v2618_v52 = vsel %vm639_vm2, %v6878_v2, 0.0 }
 0xc03   :  { %4928 = vpow2.f32 %v2566_v63  ;;  %v2530_v20 = vsub.f32 %v6708_v41, %v2452_v11  ;;  %v2531_v42 = vsub.f32 %v6703_v1, %v2455_v10  ;;  %2619 = vadd.xlane.f32.xlu0 %v2618_v52 }
 0xc04   :  { %4930 = vpow2.f32 %v2568_v31 }
 0xc05   :  { %v6886_v22 = vpop.eup %4920  ;;  %v2570_v60 = vmul.f32 1.442695, %v2530_v20  ;;  %v2572_v15 = vmul.f32 1.442695, %v2531_v42 }
 0xc06   :  { %v6888_v39 = vpop.eup %4922  ;;  %v2458_v37 = vpop.xlane.xlu0 %2457  ;;  %v2624_v14 = vsel %vm639_vm2, %v6886_v22, 0.0 }
 0xc07   :  { %v2461_v49 = vpop.xlane.xlu1 %2460  ;;  %4932 = vpow2.f32 %v2570_v60  ;;  %v2532_v7 = vsub.f32 %v6722_v29, %v2458_v37  ;;  %2625 = vadd.xlane.f32.xlu0 %v2624_v14  ;;  %v2627_v1 = vsel %vm639_vm2, %v6888_v39, 0.0 }
 0xc08   :  { %v2533_v41 = vsub.f32 %v6717_v54, %v2461_v49  ;;  %4934 = vpow2.f32 %v2572_v15  ;;  %2628 = vadd.xlane.f32.xlu1 %v2627_v1 }
 0xc09   :  { %v6896_v57 = vpop.eup %4924  ;;  %v2574_v43 = vmul.f32 1.442695, %v2532_v7 }
 0xc0a   :  { %v2576_v46 = vmul.f32 1.442695, %v2533_v41  ;;  %v6898_v12 = vpop.eup %4926  ;;  %v2464_v16 = vpop.xlane.xlu0 %2463  ;;  %v2630_v51 = vsel %vm639_vm2, %v6896_v57, 0.0 }
 0xc0b   :  { %v2467_v62 = vpop.xlane.xlu1 %2466  ;;  %4936 = vpow2.f32 %v2574_v43  ;;  %v2534_v54 = vsub.f32 %v6736_v19, %v2464_v16  ;;  %2631 = vadd.xlane.f32.xlu0 %v2630_v51  ;;  %v2633_v34 = vsel %vm639_vm2, %v6898_v12, 0.0 }
 0xc0c   :  { %v2535_v29 = vsub.f32 %v6731_v8, %v2467_v62  ;;  %4938 = vpow2.f32 %v2576_v46  ;;  %2634 = vadd.xlane.f32.xlu1 %v2633_v34 }
 0xc0d   :  { %v6906_v24 = vpop.eup %4928  ;;  %v2578_v6 = vmul.f32 1.442695, %v2534_v54 }
 0xc0e   :  { %v2580_v27 = vmul.f32 1.442695, %v2535_v29  ;;  %v6908_v32 = vpop.eup %4930  ;;  %v2470_v18 = vpop.xlane.xlu0 %2469  ;;  %v2636_v3 = vsel %vm639_vm2, %v6906_v24, 0.0 }
 0xc0f   :  { %v2473_v50 = vpop.xlane.xlu1 %2472  ;;  %4940 = vpow2.f32 %v2578_v6  ;;  %v2536_v8 = vsub.f32 %v6750_v4, %v2470_v18  ;;  %2637 = vadd.xlane.f32.xlu0 %v2636_v3  ;;  %v2639_v58 = vsel %vm639_vm2, %v6908_v32, 0.0 }
 0xc10   :  { %v2537_v19 = vsub.f32 %v6745_v59, %v2473_v50  ;;  %4942 = vpow2.f32 %v2580_v27  ;;  %2640 = vadd.xlane.f32.xlu1 %v2639_v58 }
 0xc11   :  { %v6916_v45 = vpop.eup %4932  ;;  %v2582_v63 = vmul.f32 1.442695, %v2536_v8 }
 0xc12   :  { %v2584_v31 = vmul.f32 1.442695, %v2537_v19  ;;  %v6918_v35 = vpop.eup %4934  ;;  %v2476_v11 = vpop.xlane.xlu0 %2475  ;;  %v2642_v52 = vsel %vm639_vm2, %v6916_v45, 0.0 }
 0xc13   :  { %v2479_v10 = vpop.xlane.xlu1 %2478  ;;  %4944 = vpow2.f32 %v2582_v63  ;;  %v2538_v59 = vsub.f32 %v6764_v21, %v2476_v11  ;;  %2643 = vadd.xlane.f32.xlu0 %v2642_v52  ;;  %v2645_v20 = vsel %vm639_vm2, %v6918_v35, 0.0 }
 0xc14   :  { %v2539_v4 = vsub.f32 %v6759_v9, %v2479_v10  ;;  %4946 = vpow2.f32 %v2584_v31  ;;  %2646 = vadd.xlane.f32.xlu1 %v2645_v20 }
 0xc15   :  { %v6926_v42 = vpop.eup %4936  ;;  %v2586_v60 = vmul.f32 1.442695, %v2538_v59 }
 0xc16   :  { %v2588_v15 = vmul.f32 1.442695, %v2539_v4  ;;  %v6928_v37 = vpop.eup %4938  ;;  %v2482_v49 = vpop.xlane.xlu0 %2481  ;;  %v2648_v7 = vsel %vm639_vm2, %v6926_v42, 0.0 }
 0xc17   :  { %v2485_v14 = vpop.xlane.xlu1 %2484  ;;  %4948 = vpow2.f32 %v2586_v60  ;;  %v2540_v9 = vsub.f32 %v6778_v28, %v2482_v49  ;;  %2649 = vadd.xlane.f32.xlu0 %v2648_v7  ;;  %v2651_v41 = vsel %vm639_vm2, %v6928_v37, 0.0 }
 0xc18   :  { %v2541_v21 = vsub.f32 %v6773_v61, %v2485_v14  ;;  %4950 = vpow2.f32 %v2588_v15  ;;  %2652 = vadd.xlane.f32.xlu1 %v2651_v41 }
 0xc19   :  { %v6936_v1 = vpop.eup %4940  ;;  %v2590_v43 = vmul.f32 1.442695, %v2540_v9 }
 0xc1a   :  { %v2592_v46 = vmul.f32 1.442695, %v2541_v21  ;;  %v6938_v16 = vpop.eup %4942  ;;  %v2488_v62 = vpop.xlane.xlu0 %2487  ;;  %v2654_v54 = vsel %vm639_vm2, %v6936_v1, 0.0 }
 0xc1b   :  { %v2491_v51 = vpop.xlane.xlu1 %2490  ;;  %4952 = vpow2.f32 %v2590_v43  ;;  %v2542_v61 = vsub.f32 %v6792_v47, %v2488_v62  ;;  %2655 = vadd.xlane.f32.xlu0 %v2654_v54  ;;  %v2657_v29 = vsel %vm639_vm2, %v6938_v16, 0.0 }
 0xc1c   :  { %v2543_v28 = vsub.f32 %v6787_v48, %v2491_v51  ;;  %4954 = vpow2.f32 %v2592_v46  ;;  %2658 = vadd.xlane.f32.xlu1 %v2657_v29 }
 0xc1d   :  { %v6946_v34 = vpop.eup %4944  ;;  %v2594_v6 = vmul.f32 1.442695, %v2542_v61 }
 0xc1e   :  { %v2596_v27 = vmul.f32 1.442695, %v2543_v28  ;;  %v6948_v18 = vpop.eup %4946  ;;  %v2494_v50 = vpop.xlane.xlu0 %2493  ;;  %v2660_v8 = vsel %vm639_vm2, %v6946_v34, 0.0 }
 0xc1f   :  { %v2497_v3 = vpop.xlane.xlu1 %2496  ;;  %4956 = vpow2.f32 %v2594_v6  ;;  %v2544_v48 = vsub.f32 %v6806_v56, %v2494_v50  ;;  %2661 = vadd.xlane.f32.xlu0 %v2660_v8  ;;  %v2663_v19 = vsel %vm639_vm2, %v6948_v18, 0.0 }
 0xc20   :  { %v2545_v47 = vsub.f32 %v6801_v44, %v2497_v3  ;;  %4958 = vpow2.f32 %v2596_v27  ;;  %2664 = vadd.xlane.f32.xlu1 %v2663_v19 }
 0xc21   :  { %v6956_v58 = vpop.eup %4948  ;;  %v2598_v63 = vmul.f32 1.442695, %v2544_v48 }
 0xc22   :  { %v2600_v31 = vmul.f32 1.442695, %v2545_v47  ;;  %v6958_v11 = vpop.eup %4950  ;;  %v2500_v10 = vpop.xlane.xlu0 %2499  ;;  %v2666_v59 = vsel %vm639_vm2, %v6956_v58, 0.0 }
 0xc23   :  { %v2503_v52 = vpop.xlane.xlu1 %2502  ;;  %4960 = vpow2.f32 %v2598_v63  ;;  %v2546_v44 = vsub.f32 %v6820_v33, %v2500_v10  ;;  %2667 = vadd.xlane.f32.xlu0 %v2666_v59  ;;  %v2669_v4 = vsel %vm639_vm2, %v6958_v11, 0.0 }
 0xc24   :  { %v2547_v56 = vsub.f32 %v6815_v5, %v2503_v52  ;;  %4962 = vpow2.f32 %v2600_v31  ;;  %2670 = vadd.xlane.f32.xlu1 %v2669_v4 }
 0xc25   :  { %v6966_v20 = vpop.eup %4952  ;;  %v2602_v60 = vmul.f32 1.442695, %v2546_v44 }
 0xc26   :  { %v2604_v15 = vmul.f32 1.442695, %v2547_v56  ;;  %v6968_v49 = vpop.eup %4954  ;;  %v2506_v14 = vpop.xlane.xlu0 %2505  ;;  %v2672_v9 = vsel %vm639_vm2, %v6966_v20, 0.0 }
 0xc27   :  { %v2509_v7 = vpop.xlane.xlu1 %2508  ;;  %4964 = vpow2.f32 %v2602_v60  ;;  %v2548_v5 = vsub.f32 %v6834_v25, %v2506_v14  ;;  %2673 = vadd.xlane.f32.xlu0 %v2672_v9  ;;  %v2675_v21 = vsel %vm639_vm2, %v6968_v49, 0.0 }
 0xc28   :  { %v2549_v33 = vsub.f32 %v6829_v0, %v2509_v7  ;;  %4966 = vpow2.f32 %v2604_v15  ;;  %2676 = vadd.xlane.f32.xlu1 %v2675_v21 }
 0xc29   :  { %v6976_v41 = vpop.eup %4956  ;;  %v2606_v43 = vmul.f32 1.442695, %v2548_v5 }
 0xc2a   :  { %v2608_v46 = vmul.f32 1.442695, %v2549_v33  ;;  %v6978_v62 = vpop.eup %4958  ;;  %v2512_v51 = vpop.xlane.xlu0 %2511  ;;  %v2678_v61 = vsel %vm639_vm2, %v6976_v41, 0.0 }
 0xc2b   :  { %v2515_v54 = vpop.xlane.xlu1 %2514  ;;  %4968 = vpow2.f32 %v2606_v43  ;;  %v2550_v0 = vsub.f32 %v6848_v53, %v2512_v51  ;;  %2679 = vadd.xlane.f32.xlu0 %v2678_v61  ;;  %v2681_v28 = vsel %vm639_vm2, %v6978_v62, 0.0 }
 0xc2c   :  { %v2551_v25 = vsub.f32 %v6843_v17, %v2515_v54  ;;  %4970 = vpow2.f32 %v2608_v46  ;;  %2682 = vadd.xlane.f32.xlu1 %v2681_v28 }
 0xc2d   :  { %v6986_v29 = vpop.eup %4960  ;;  %v2610_v6 = vmul.f32 1.442695, %v2550_v0 }
 0xc2e   :  { %v2612_v27 = vmul.f32 1.442695, %v2551_v25  ;;  %v6988_v50 = vpop.eup %4962  ;;  %v2518_v3 = vpop.xlane.xlu0 %2517  ;;  %v2684_v48 = vsel %vm639_vm2, %v6986_v29, 0.0 }
 0xc2f   :  { %v2521_v8 = vpop.xlane.xlu1 %2520  ;;  %4972 = vpow2.f32 %v2610_v6  ;;  %v2552_v17 = vsub.f32 %v6862_v36, %v2518_v3  ;;  %2685 = vadd.xlane.f32.xlu0 %v2684_v48  ;;  %v2687_v47 = vsel %vm639_vm2, %v6988_v50, 0.0 }
 0xc30   :  { %v2553_v53 = vsub.f32 %v6857_v40, %v2521_v8  ;;  %4974 = vpow2.f32 %v2612_v27  ;;  %2688 = vadd.xlane.f32.xlu1 %v2687_v47 }
 0xc31   :  { %v6996_v19 = vpop.eup %4964  ;;  %v2614_v63 = vmul.f32 1.442695, %v2552_v17 }
 0xc32   :  { %v2616_v31 = vmul.f32 1.442695, %v2553_v53  ;;  %v6998_v10 = vpop.eup %4966  ;;  %v2690_v52 = vsel %vm639_vm2, %v6996_v19, 0.0 }
 0xc33   :  { %4976 = vpow2.f32 %v2614_v63  ;;  %2691 = vadd.xlane.f32.xlu0 %v2690_v52  ;;  %v2693_v40 = vsel %vm639_vm2, %v6998_v10, 0.0 }
 0xc34   :  { %4978 = vpow2.f32 %v2616_v31  ;;  %2694 = vadd.xlane.f32.xlu1 %v2693_v40 }
 0xc35   :  { %v7004_v36 = vpop.eup %4968 }
 0xc36   :  { %v7006_v59 = vpop.eup %4970  ;;  %v2696_v44 = vsel %vm639_vm2, %v7004_v36, 0.0 }
 0xc37   :  { %2697 = vadd.xlane.f32.xlu0 %v2696_v44  ;;  %v2699_v56 = vsel %vm639_vm2, %v7006_v59, 0.0 }
 0xc38   :  { %2700 = vadd.xlane.f32.xlu1 %v2699_v56 }
 0xc39   :  { %v7012_v4 = vpop.eup %4972 }
 0xc3a   :  { %v7014_v60 = vpop.eup %4974  ;;  %v2702_v15 = vsel %vm639_vm2, %v7012_v4, 0.0 }
 0xc3b   :  { %2703 = vadd.xlane.f32.xlu0 %v2702_v15  ;;  %v2705_v14 = vsel %vm639_vm2, %v7014_v60, 0.0 }
 0xc3c   :  { %2706 = vadd.xlane.f32.xlu1 %v2705_v14 }
 0xc3d   :  { %v7020_v7 = vpop.eup %4976 }
 0xc3e   :  { %v7022_v9 = vpop.eup %4978  ;;  %v2708_v5 = vsel %vm639_vm2, %v7020_v7, 0.0 }
 0xc3f   :  { %2709 = vadd.xlane.f32.xlu0 %v2708_v5  ;;  %v2711_v33 = vsel %vm639_vm2, %v7022_v9, 0.0 }
 0xc40   :  { %2712 = vadd.xlane.f32.xlu1 %v2711_v33 }
 0xc8f   :  { %v2623_v21 = vpop.xlane.xlu1 %2622 }
 0xc90   :  { %4980 = vrcp.f32 %v2623_v21  ;;  %v2620_v43 = vpop.xlane.xlu0 %2619 }
 0xc91   :  { %4982 = vrcp.f32 %v2620_v43 }
 0xc94   :  { %v2626_v46 = vpop.xlane.xlu0 %2625 }
 0xc95   :  { %4984 = vrcp.f32 %v2626_v46  ;;  %v2629_v51 = vpop.xlane.xlu1 %2628 }
 0xc96   :  { %4986 = vrcp.f32 %v2629_v51 }
 0xc98   :  { %v2632_v54 = vpop.xlane.xlu0 %2631 }
 0xc99   :  { %4988 = vrcp.f32 %v2632_v54  ;;  %v2635_v61 = vpop.xlane.xlu1 %2634 }
 0xc9a   :  { %v4981_v0 = vpop.eup %4980  ;;  %4990 = vrcp.f32 %v2635_v61 }
 0xc9b   :  { %v4983_v25 = vpop.eup %4982  ;;  %v2747_v27 = vmul.f32 %v4981_v0, %v6876_v26 }
 0xc9c   :  { %v2638_v28 = vpop.xlane.xlu0 %2637  ;;  %v2746_v6 = vmul.f32 %v4983_v25, %v6878_v2 }
 0xc9d   :  { %4992 = vrcp.f32 %v2638_v28  ;;  %v2641_v3 = vpop.xlane.xlu1 %2640 }
 0xc9e   :  { %4994 = vrcp.f32 %v2641_v3  ;;  %4411 = vmatprep.mubr.msk.f32.mxu1 %vm639_vm2, %v2746_v6 }
 0xc9f   :  { %v4985_v8 = vpop.eup %4984  ;;  %4412 = vmatmul.mubr.msk.f32.vlgmr.msra.gmra.mrb[36].mxu1 %vm639_vm2, %v2747_v27 }
 0xca0   :  { %v4987_v48 = vpop.eup %4986  ;;  %v2644_v17 = vpop.xlane.xlu0 %2643  ;;  %v2748_v53 = vmul.f32 %v4985_v8, %v6886_v22 }
 0xca1   :  { %4996 = vrcp.f32 %v2644_v17  ;;  %v2647_v47 = vpop.xlane.xlu1 %2646  ;;  %v2749_v63 = vmul.f32 %v4987_v48, %v6888_v39 }
 0xca2   :  { %4998 = vrcp.f32 %v2647_v47  ;;  %4414 = vmatprep.mubr.msk.f32.mxu1 %vm639_vm2, %v2748_v53 }
 0xca3   :  { %v4989_v26 = vpop.eup %4988  ;;  %4415 = vmatmul.mubr.msk.f32.gmra.mrb[38].mxu1 %vm639_vm2, %v2749_v63 }
 0xca4   :  { %v4991_v2 = vpop.eup %4990  ;;  %v2650_v31 = vpop.xlane.xlu0 %2649  ;;  %v2750_v52 = vmul.f32 %v4989_v26, %v6896_v57 }
 0xca5   :  { %5000 = vrcp.f32 %v2650_v31  ;;  %v2653_v40 = vpop.xlane.xlu1 %2652  ;;  %v2751_v44 = vmul.f32 %v4991_v2, %v6898_v12 }
 0xca6   :  { %5002 = vrcp.f32 %v2653_v40  ;;  %4417 = vmatprep.mubr.msk.f32.mxu1 %vm639_vm2, %v2750_v52 }
 0xca7   :  { %v4993_v22 = vpop.eup %4992  ;;  %4418 = vmatmul.mubr.msk.f32.gmra.mrb[40].mxu1 %vm639_vm2, %v2751_v44 }
 0xca8   :  { %v4995_v39 = vpop.eup %4994  ;;  %v2656_v56 = vpop.xlane.xlu0 %2655  ;;  %v2752_v15 = vmul.f32 %v4993_v22, %v6906_v24 }
 0xca9   :  { %5004 = vrcp.f32 %v2656_v56  ;;  %v2659_v14 = vpop.xlane.xlu1 %2658  ;;  %v2753_v5 = vmul.f32 %v4995_v39, %v6908_v32 }
 0xcaa   :  { %5006 = vrcp.f32 %v2659_v14  ;;  %4420 = vmatprep.mubr.msk.f32.mxu1 %vm639_vm2, %v2752_v15 }
 0xcab   :  { %v4997_v57 = vpop.eup %4996  ;;  %4421 = vmatmul.mubr.msk.f32.gmra.mrb[42].mxu1 %vm639_vm2, %v2753_v5 }
 0xcac   :  { %v4999_v12 = vpop.eup %4998  ;;  %v2662_v33 = vpop.xlane.xlu0 %2661  ;;  %v2754_v21 = vmul.f32 %v4997_v57, %v6916_v45 }
 0xcad   :  { %5008 = vrcp.f32 %v2662_v33  ;;  %v2665_v43 = vpop.xlane.xlu1 %2664  ;;  %v2755_v46 = vmul.f32 %v4999_v12, %v6918_v35 }
 0xcae   :  { %5010 = vrcp.f32 %v2665_v43  ;;  %4423 = vmatprep.mubr.msk.f32.mxu1 %vm639_vm2, %v2754_v21 }
 0xcaf   :  { %v5001_v24 = vpop.eup %5000  ;;  %4424 = vmatmul.mubr.msk.f32.gmra.mrb[44].mxu1 %vm639_vm2, %v2755_v46 }
 0xcb0   :  { %v5003_v32 = vpop.eup %5002  ;;  %v2668_v51 = vpop.xlane.xlu0 %2667  ;;  %v2756_v54 = vmul.f32 %v5001_v24, %v6926_v42 }
 0xcb1   :  { %5012 = vrcp.f32 %v2668_v51  ;;  %v2671_v61 = vpop.xlane.xlu1 %2670  ;;  %v2757_v0 = vmul.f32 %v5003_v32, %v6928_v37 }
 0xcb2   :  { %5014 = vrcp.f32 %v2671_v61  ;;  %4426 = vmatprep.mubr.msk.f32.mxu1 %vm639_vm2, %v2756_v54 }
 0xcb3   :  { %v5005_v45 = vpop.eup %5004  ;;  %4427 = vmatmul.mubr.msk.f32.gmra.mrb[46].mxu1 %vm639_vm2, %v2757_v0 }
 0xcb4   :  { %v5007_v35 = vpop.eup %5006  ;;  %v2674_v25 = vpop.xlane.xlu0 %2673  ;;  %v2758_v28 = vmul.f32 %v5005_v45, %v6936_v1 }
 0xcb5   :  { %5016 = vrcp.f32 %v2674_v25  ;;  %v2677_v6 = vpop.xlane.xlu1 %2676  ;;  %v2759_v27 = vmul.f32 %v5007_v35, %v6938_v16  ;;  %v3920_v35 = vld [vmem:[%s7457_s4 + $0x60] sm:$0xff]  ;;  %v3921_v25 = vld [vmem:[%s7457_s4 + $0x68] sm:$0xff] }
 0xcb6   :  { %5018 = vrcp.f32 %v2677_v6  ;;  %4429 = vmatprep.mubr.msk.f32.mxu1 %vm639_vm2, %v2758_v28  ;;  %v4663_v28 = vpack.c.bf16 %v3921_v25, %v3920_v35  ;;  %v3922_v6 = vld [vmem:[%s7457_s4 + $0x70] sm:$0xff] }
 0xcb7   :  { %v5009_v42 = vpop.eup %5008  ;;  %4430 = vmatmul.mubr.msk.f32.gmra.mrb[48].mxu1 %vm639_vm2, %v2759_v27  ;;  %v3923_v27 = vld [vmem:[%s7457_s4 + $0x78] sm:$0xff] }
 0xcb8   :  { %v5011_v37 = vpop.eup %5010  ;;  %v2680_v3 = vpop.xlane.xlu0 %2679  ;;  %v2760_v8 = vmul.f32 %v5009_v42, %v6946_v34  ;;  %v4667_v42 = vpack.c.bf16 %v3923_v27, %v3922_v6  ;;  %v5156_v27 = vld [vmem:[%s7455_s2 + $0x68] sm:$0xff] }
 0xcb9   :  { %5020 = vrcp.f32 %v2680_v3  ;;  %v2683_v48 = vpop.xlane.xlu1 %2682  ;;  %v2761_v17 = vmul.f32 %v5011_v37, %v6948_v18 }
 0xcba   :  { %5022 = vrcp.f32 %v2683_v48  ;;  %4432 = vmatprep.mubr.msk.f32.mxu1 %vm639_vm2, %v2760_v8 }
 0xcbb   :  { %v5013_v1 = vpop.eup %5012  ;;  %4433 = vmatmul.mubr.msk.f32.gmra.mrb[50].mxu1 %vm639_vm2, %v2761_v17  ;;  %v5144_v17 = vld [vmem:[%s7455_s2 + $0x8] sm:$0xff] }
 0xcbc   :  { %v5015_v16 = vpop.eup %5014  ;;  %v2686_v53 = vpop.xlane.xlu0 %2685  ;;  %v2762_v47 = vmul.f32 %v5013_v1, %v6956_v58 }
 0xcbd   :  { %5024 = vrcp.f32 %v2686_v53  ;;  %v2689_v63 = vpop.xlane.xlu1 %2688  ;;  %v2763_v26 = vmul.f32 %v5015_v16, %v6958_v11  ;;  %v5145_v16 = vld [vmem:[%s7455_s2] sm:$0xff] }
 0xcbe   :  { %5026 = vrcp.f32 %v2689_v63  ;;  %4435 = vmatprep.mubr.msk.f32.mxu1 %vm639_vm2, %v2762_v47  ;;  %v5146_v63 = vld [vmem:[%s7455_s2 + $0x28] sm:$0xff] }
 0xcbf   :  { %v5017_v34 = vpop.eup %5016  ;;  %4436 = vmatmul.mubr.msk.f32.gmra.mrb[52].mxu1 %vm639_vm2, %v2763_v26 }
 0xcc0   :  { %v5019_v18 = vpop.eup %5018  ;;  %v2692_v2 = vpop.xlane.xlu0 %2691  ;;  %v2764_v31 = vmul.f32 %v5017_v34, %v6966_v20 }
 0xcc1   :  { %5028 = vrcp.f32 %v2692_v2  ;;  %v2695_v52 = vpop.xlane.xlu1 %2694  ;;  %v2765_v40 = vmul.f32 %v5019_v18, %v6968_v49  ;;  %v5147_v18 = vld [vmem:[%s7455_s2 + $0x20] sm:$0xff] }
 0xcc2   :  { %5030 = vrcp.f32 %v2695_v52  ;;  %4438 = vmatprep.mubr.msk.f32.mxu1 %vm639_vm2, %v2764_v31  ;;  %v5148_v52 = vld [vmem:[%s7455_s2 + $0x18] sm:$0xff] }
 0xcc3   :  { %v5021_v58 = vpop.eup %5020  ;;  %4439 = vmatmul.mubr.msk.f32.gmra.mrb[54].mxu1 %vm639_vm2, %v2765_v40 }
 0xcc4   :  { %v5023_v11 = vpop.eup %5022  ;;  %v2698_v44 = vpop.xlane.xlu0 %2697  ;;  %v2766_v22 = vmul.f32 %v5021_v58, %v6976_v41 }
 0xcc5   :  { %5032 = vrcp.f32 %v2698_v44  ;;  %v2701_v39 = vpop.xlane.xlu1 %2700  ;;  %v2767_v56 = vmul.f32 %v5023_v11, %v6978_v62  ;;  %v5149_v44 = vld [vmem:[%s7455_s2 + $0x10] sm:$0xff] }
 0xcc6   :  { %5034 = vrcp.f32 %v2701_v39  ;;  %4441 = vmatprep.mubr.msk.f32.mxu1 %vm639_vm2, %v2766_v22 }
 0xcc7   :  { %v5025_v20 = vpop.eup %5024  ;;  %4442 = vmatmul.mubr.msk.f32.gmra.mrb[56].mxu1 %vm639_vm2, %v2767_v56 }
 0xcc8   :  { %v5027_v49 = vpop.eup %5026  ;;  %v2704_v15 = vpop.xlane.xlu0 %2703  ;;  %v2768_v14 = vmul.f32 %v5025_v20, %v6986_v29 }
 0xcc9   :  { %5036 = vrcp.f32 %v2704_v15  ;;  %v2707_v5 = vpop.xlane.xlu1 %2706  ;;  %v2769_v57 = vmul.f32 %v5027_v49, %v6988_v50  ;;  %v5150_v15 = vld [vmem:[%s7455_s2 + $0x38] sm:$0xff] }
 0xcca   :  { %5038 = vrcp.f32 %v2707_v5  ;;  %4444 = vmatprep.mubr.msk.f32.mxu1 %vm639_vm2, %v2768_v14 }
 0xccb   :  { %v5029_v41 = vpop.eup %5028  ;;  %4445 = vmatmul.mubr.msk.f32.gmra.mrb[58].mxu1 %vm639_vm2, %v2769_v57  ;;  %v5151_v57 = vld [vmem:[%s7455_s2 + $0x30] sm:$0xff] }
 0xccc   :  { %v5031_v62 = vpop.eup %5030  ;;  %v2710_v12 = vpop.xlane.xlu0 %2709  ;;  %v2770_v33 = vmul.f32 %v5029_v41, %v6996_v19 }
 0xccd   :  { %5040 = vrcp.f32 %v2710_v12  ;;  %v2713_v21 = vpop.xlane.xlu1 %2712  ;;  %v2771_v43 = vmul.f32 %v5031_v62, %v6998_v10 }
 0xcce   :  { %5042 = vrcp.f32 %v2713_v21  ;;  %4447 = vmatprep.mubr.msk.f32.mxu1 %vm639_vm2, %v2770_v33 }
 0xccf   :  { %v5033_v29 = vpop.eup %5032  ;;  %4448 = vmatmul.mubr.msk.f32.gmra.mrb[60].mxu1 %vm639_vm2, %v2771_v43 }
 0xcd0   :  { %v5035_v50 = vpop.eup %5034  ;;  %v2772_v46 = vmul.f32 %v5033_v29, %v7004_v36 }
 0xcd1   :  { %v2773_v24 = vmul.f32 %v5035_v50, %v7006_v59 }
 0xcd2   :  { %4450 = vmatprep.mubr.msk.f32.mxu1 %vm639_vm2, %v2772_v46  ;;  %v5152_v46 = vld [vmem:[%s7455_s2 + $0x48] sm:$0xff] }
 0xcd3   :  { %v5037_v32 = vpop.eup %5036  ;;  %4451 = vmatmul.mubr.msk.f32.gmra.mrb[62].mxu1 %vm639_vm2, %v2773_v24 }
 0xcd4   :  { %v5039_v19 = vpop.eup %5038  ;;  %v2774_v51 = vmul.f32 %v5037_v32, %v7012_v4  ;;  %v3916_v4 = vld [vmem:[%s7457_s4 + $0x40] sm:$0xff] }
 0xcd5   :  { %v2775_v10 = vmul.f32 %v5039_v19, %v7014_v60  ;;  %v3917_v60 = vld [vmem:[%s7457_s4 + $0x48] sm:$0xff]  ;;  %v5153_v19 = vld [vmem:[%s7455_s2 + $0x40] sm:$0xff] }
 0xcd6   :  { %4453 = vmatprep.mubr.msk.f32.mxu1 %vm639_vm2, %v2774_v51  ;;  %v4655_v0 = vpack.c.bf16 %v3917_v60, %v3916_v4  ;;  %v5154_v4 = vld [vmem:[%s7455_s2 + $0x58] sm:$0xff] }
 0xcd7   :  { %v5041_v54 = vpop.eup %5040  ;;  %4454 = vmatmul.mubr.msk.f32.gmra.mrb[64].mxu1 %vm639_vm2, %v2775_v10 }
 0xcd8   :  { %v5043_v61 = vpop.eup %5042  ;;  %v2776_v36 = vmul.f32 %v5041_v54, %v7020_v7  ;;  %4656 = vmatprep.subr.bf16.mxu1 %v4655_v0  ;;  %v3918_v7 = vld [vmem:[%s7457_s4 + $0x50] sm:$0xff] }
 0xcd9   :  { %v2777_v59 = vmul.f32 %v5043_v61, %v7022_v9  ;;  %4658 = vmatpush3.bf16.msra.mxu1 %v4655_v0  ;;  %v3919_v9 = vld [vmem:[%s7457_s4 + $0x58] sm:$0xff] }
 0xcda   :  { %4456 = vmatprep.mubr.msk.f32.mxu1 %vm639_vm2, %v2776_v36  ;;  %v4659_v45 = vpack.c.bf16 %v3919_v9, %v3918_v7  ;;  %v5155_v7 = vld [vmem:[%s7455_s2 + $0x50] sm:$0xff] }
 0xcdb   :  { %4457 = vmatmul.mubr.msk.f32.gmra.mrb[66].mxu1 %vm639_vm2, %v2777_v59 }
 0xcdc   :  { %4660 = vmatprep.subr.bf16.mxu1 %v4659_v45 }
 0xcdd   :  { %4662 = vmatpush3.bf16.msra.mxu1 %v4659_v45 }
 0xcde   :  { %4664 = vmatprep.subr.bf16.mxu1 %v4663_v28 }
 0xce1   :  { %4666 = vmatpush3.bf16.msra.mxu1 %v4663_v28 }
 0xce2   :  { %4668 = vmatprep.subr.bf16.mxu1 %v4667_v42 }
 0xce5   :  { %4670 = vmatpush3.bf16.msra.mxu1 %v4667_v42 }
 0xd72   :  { %v4413_v37 = vpop.f32.mrb[36].mxu1 }
 0xd73   :  { %v2940_v3 = vpop.f32.mrb[37].mxu1  ;;  %v3100_v1 = vmul.f32 %v5144_v17, %v4413_v37 }
 0xd74   :  { %v3099_v53 = vmul.f32 %v5145_v16, %v2940_v3  ;;  %v5157_v3 = vld [vmem:[%s7455_s2 + $0x60] sm:$0xff] }
 0xd75   :  { %v3146_v31 = vsel %vm109_vm0, %v3100_v1, 0.0 }
 0xd76   :  { %v4416_v8 = vpop.f32.mrb[38].mxu1  ;;  %v3131_v11 = vsel %vm109_vm0, %v3099_v53, 0.0 }
 0xd77   :  { %v2950_v48 = vpop.f32.mrb[39].mxu1  ;;  %v3102_v40 = vmul.f32 %v5148_v52, %v4416_v8 }
 0xd78   :  { %v3101_v22 = vmul.f32 %v5149_v44, %v2950_v48 }
 0xd79   :  { %v3176_v62 = vsel %vm109_vm0, %v3102_v40, 0.0 }
 0xd7a   :  { %v4419_v47 = vpop.f32.mrb[40].mxu1  ;;  %v3161_v33 = vsel %vm109_vm0, %v3101_v22, 0.0 }
 0xd7b   :  { %v3104_v26 = vmul.f32 %v5146_v63, %v4419_v47  ;;  %v2960_v34 = vpop.f32.mrb[41].mxu1  ;;  %v5158_v47 = vld [vmem:[%s7455_s2 + $0x78] sm:$0xff] }
 0xd7c   :  { %v3103_v2 = vmul.f32 %v5147_v18, %v2960_v34  ;;  %v5159_v34 = vld [vmem:[%s7455_s2 + $0x70] sm:$0xff] }
 0xd7d   :  { %v3147_v58 = vsel %vm109_vm0, %v3104_v26, 0.0 }
 0xd7e   :  { %v3148_v39 = vadd.f32 %v3147_v58, %v3146_v31  ;;  %v3132_v56 = vsel %vm109_vm0, %v3103_v2, 0.0  ;;  %v4422_v20 = vpop.f32.mrb[42].mxu1 }
 0xd7f   :  { %v3133_v49 = vadd.f32 %v3132_v56, %v3131_v11  ;;  %v3106_v14 = vmul.f32 %v5150_v15, %v4422_v20  ;;  %v2970_v5 = vpop.f32.mrb[43].mxu1  ;;  %v5160_v11 = vld [vmem:[%s7455_s2 + $0x88] sm:$0xff] }
 0xd80   :  { %v3105_v41 = vmul.f32 %v5151_v57, %v2970_v5  ;;  %v5162_v57 = vld [vmem:[%s7455_s2 + $0x98] sm:$0xff] }
 0xd81   :  { %v3177_v12 = vsel %vm109_vm0, %v3106_v14, 0.0 }
 0xd82   :  { %v3178_v21 = vadd.f32 %v3177_v12, %v3176_v62  ;;  %v3162_v43 = vsel %vm109_vm0, %v3105_v41, 0.0  ;;  %v4425_v29 = vpop.f32.mrb[44].mxu1  ;;  %v5163_v12 = vld [vmem:[%s7455_s2 + $0x90] sm:$0xff] }
 0xd83   :  { %v3163_v50 = vadd.f32 %v3162_v43, %v3161_v33  ;;  %v3108_v24 = vmul.f32 %v5152_v46, %v4425_v29  ;;  %v2980_v32 = vpop.f32.mrb[45].mxu1 }
 0xd84   :  { %v3107_v51 = vmul.f32 %v5153_v19, %v2980_v32 }
 0xd85   :  { %v3149_v10 = vsel %vm109_vm0, %v3108_v24, 0.0  ;;  %v5164_v24 = vld [vmem:[%s7455_s2 + $0xa8] sm:$0xff] }
 0xd86   :  { %v3150_v54 = vadd.f32 %v3149_v10, %v3148_v39  ;;  %v3134_v61 = vsel %vm109_vm0, %v3107_v51, 0.0  ;;  %v4428_v36 = vpop.f32.mrb[46].mxu1  ;;  %v5161_v39 = vld [vmem:[%s7455_s2 + $0x80] sm:$0xff] }
 0xd87   :  { %v3135_v59 = vadd.f32 %v3134_v61, %v3133_v49  ;;  %v3110_v60 = vmul.f32 %v5154_v4, %v4428_v36  ;;  %v2990_v0 = vpop.f32.mrb[47].mxu1  ;;  %v5165_v51 = vld [vmem:[%s7455_s2 + $0xa0] sm:$0xff] }
 0xd88   :  { %v3109_v9 = vmul.f32 %v5155_v7, %v2990_v0 }
 0xd89   :  { %v3179_v45 = vsel %vm109_vm0, %v3110_v60, 0.0  ;;  %v5166_v60 = vld [vmem:[%s7455_s2 + $0xb8] sm:$0xff] }
 0xd8a   :  { %v3180_v35 = vadd.f32 %v3179_v45, %v3178_v21  ;;  %v3164_v25 = vsel %vm109_vm0, %v3109_v9, 0.0  ;;  %v4431_v28 = vpop.f32.mrb[48].mxu1  ;;  %v5167_v9 = vld [vmem:[%s7455_s2 + $0xb0] sm:$0xff] }
 0xd8b   :  { %v3165_v6 = vadd.f32 %v3164_v25, %v3163_v50  ;;  %v3112_v42 = vmul.f32 %v5156_v27, %v4431_v28  ;;  %v3000_v37 = vpop.f32.mrb[49].mxu1 }
 0xd8c   :  { %v3111_v8 = vmul.f32 %v5157_v3, %v3000_v37 }
 0xd8d   :  { %v3151_v48 = vsel %vm109_vm0, %v3112_v42, 0.0  ;;  %v5168_v42 = vld [vmem:[%s7455_s2 + $0xc8] sm:$0xff] }
 0xd8e   :  { %v3152_v17 = vadd.f32 %v3151_v48, %v3150_v54  ;;  %v3136_v1 = vsel %vm109_vm0, %v3111_v8, 0.0  ;;  %v4434_v16 = vpop.f32.mrb[50].mxu1  ;;  %v5169_v8 = vld [vmem:[%s7455_s2 + $0xc0] sm:$0xff] }
 0xd8f   :  { %v3137_v53 = vadd.f32 %v3136_v1, %v3135_v59  ;;  %v3114_v63 = vmul.f32 %v5158_v47, %v4434_v16  ;;  %v3010_v26 = vpop.f32.mrb[51].mxu1 }
 0xd90   :  { %v3113_v18 = vmul.f32 %v5159_v34, %v3010_v26 }
 0xd91   :  { %v3181_v2 = vsel %vm109_vm0, %v3114_v63, 0.0  ;;  %v5170_v63 = vld [vmem:[%s7455_s2 + $0xd8] sm:$0xff] }
 0xd92   :  { %v3182_v31 = vadd.f32 %v3181_v2, %v3180_v35  ;;  %v3166_v52 = vsel %vm109_vm0, %v3113_v18, 0.0  ;;  %v4437_v40 = vpop.f32.mrb[52].mxu1  ;;  %v5171_v18 = vld [vmem:[%s7455_s2 + $0xd0] sm:$0xff] }
 0xd93   :  { %v3167_v58 = vadd.f32 %v3166_v52, %v3165_v6  ;;  %v3116_v44 = vmul.f32 %v5160_v11, %v4437_v40  ;;  %v3020_v22 = vpop.f32.mrb[53].mxu1 }
 0xd94   :  { %v3115_v56 = vmul.f32 %v5161_v39, %v3020_v22 }
 0xd95   :  { %v3153_v20 = vsel %vm109_vm0, %v3116_v44, 0.0  ;;  %v5172_v44 = vld [vmem:[%s7455_s2 + $0xe8] sm:$0xff] }
 0xd96   :  { %v3154_v49 = vadd.f32 %v3153_v20, %v3152_v17  ;;  %v3138_v15 = vsel %vm109_vm0, %v3115_v56, 0.0  ;;  %v4440_v14 = vpop.f32.mrb[54].mxu1  ;;  %v5173_v56 = vld [vmem:[%s7455_s2 + $0xe0] sm:$0xff] }
 0xd97   :  { %v3139_v5 = vadd.f32 %v3138_v15, %v3137_v53  ;;  %v3118_v41 = vmul.f32 %v5162_v57, %v4440_v14  ;;  %v3030_v62 = vpop.f32.mrb[55].mxu1 }
 0xd98   :  { %v3117_v33 = vmul.f32 %v5163_v12, %v3030_v62 }
 0xd99   :  { %v3183_v21 = vsel %vm109_vm0, %v3118_v41, 0.0  ;;  %v5174_v41 = vld [vmem:[%s7455_s2 + $0xf8] sm:$0xff] }
 0xd9a   :  { %v3184_v43 = vadd.f32 %v3183_v21, %v3182_v31  ;;  %v3168_v29 = vsel %vm109_vm0, %v3117_v33, 0.0  ;;  %v4443_v50 = vpop.f32.mrb[56].mxu1  ;;  %v5175_v33 = vld [vmem:[%s7455_s2 + $0xf0] sm:$0xff] }
 0xd9b   :  { %v3169_v46 = vadd.f32 %v3168_v29, %v3167_v58  ;;  %v3120_v32 = vmul.f32 %v5164_v24, %v4443_v50  ;;  %v3040_v19 = vpop.f32.mrb[57].mxu1  ;;  %v3931_v24 = vld [vmem:[%s7459_s6 + $0x88] sm:$0xff] }
 0xd9c   :  { %v3119_v10 = vmul.f32 %v5165_v51, %v3040_v19  ;;  %v3930_v19 = vld [vmem:[%s7459_s6 + $0x80] sm:$0xff] }
 0xd9d   :  { %v3155_v54 = vsel %vm109_vm0, %v3120_v32, 0.0  ;;  %v3933_v32 = vld [vmem:[%s7459_s6 + $0x98] sm:$0xff] }
 0xd9e   :  { %v3156_v61 = vadd.f32 %v3155_v54, %v3154_v49  ;;  %v3140_v36 = vsel %vm109_vm0, %v3119_v10, 0.0  ;;  %v4446_v59 = vpop.f32.mrb[58].mxu1  ;;  %v4671_v51 = vpack.c.bf16 %v3933_v32, %v3931_v24  ;;  %v3932_v10 = vld [vmem:[%s7459_s6 + $0x90] sm:$0xff]  ;;  %v3935_v54 = vld [vmem:[%s7459_s6 + $0xa8] sm:$0xff] }
 0xd9f   :  { %v3141_v4 = vadd.f32 %v3140_v36, %v3139_v5  ;;  %v3122_v0 = vmul.f32 %v5166_v60, %v4446_v59  ;;  %v3050_v7 = vpop.f32.mrb[59].mxu1  ;;  %v4673_v36 = vpack.c.bf16 %v3932_v10, %v3930_v19  ;;  %v3936_v60 = vld [vmem:[%s7459_s6 + $0xb0] sm:$0xff]  ;;  %v3950_v19 = vld [vmem:[%s7460_s7 + $0x80] sm:$0xff] }
 0xda0   :  { %v3121_v45 = vmul.f32 %v5167_v9, %v3050_v7  ;;  %4672 = vmatprep.subr.bf16.mxu0 %v4671_v51  ;;  %v3941_v7 = vld [vmem:[%s7459_s6 + $0xd8] sm:$0xff]  ;;  %v3951_v51 = vld [vmem:[%s7460_s7 + $0x88] sm:$0xff] }
 0xda1   :  { %v3185_v35 = vsel %vm109_vm0, %v3122_v0, 0.0  ;;  %v3939_v0 = vld [vmem:[%s7459_s6 + $0xc8] sm:$0xff]  ;;  %4674 = vmatpush1.bf16.msra.mxu0 %v4673_v36  ;;  %v4687_v10 = vpack.c.bf16 %v3951_v51, %v3950_v19  ;;  %v3954_v36 = vld [vmem:[%s7460_s7 + $0xa0] sm:$0xff] }
 0xda2   :  { %v3186_v25 = vadd.f32 %v3185_v35, %v3184_v43  ;;  %v3170_v28 = vsel %vm109_vm0, %v3121_v45, 0.0  ;;  %v4449_v6 = vpop.f32.mrb[60].mxu1  ;;  %v4679_v45 = vpack.c.bf16 %v3941_v7, %v3939_v0  ;;  %v3938_v35 = vld [vmem:[%s7459_s6 + $0xc0] sm:$0xff]  ;;  %v3957_v0 = vld [vmem:[%s7460_s7 + $0xb8] sm:$0xff] }
 0xda3   :  { %v3171_v27 = vadd.f32 %v3170_v28, %v3169_v46  ;;  %v3124_v37 = vmul.f32 %v5168_v42, %v4449_v6  ;;  %v3060_v3 = vpop.f32.mrb[61].mxu1  ;;  %4688 = vmatprep.subr.bf16.mxu1 %v4687_v10 }
 0xda4   :  { %v3123_v48 = vmul.f32 %v5169_v8, %v3060_v3 }
 0xda5   :  { %v3157_v17 = vsel %vm109_vm0, %v3124_v37, 0.0 }
 0xda6   :  { %v3158_v1 = vadd.f32 %v3157_v17, %v3156_v61  ;;  %v3142_v16 = vsel %vm109_vm0, %v3123_v48, 0.0  ;;  %v4452_v53 = vpop.f32.mrb[62].mxu1  ;;  %v3937_v61 = vld [vmem:[%s7459_s6 + $0xb8] sm:$0xff] }
 0xda7   :  { %v3143_v47 = vadd.f32 %v3142_v16, %v3141_v4  ;;  %v3126_v26 = vmul.f32 %v5170_v63, %v4452_v53  ;;  %v3070_v34 = vpop.f32.mrb[63].mxu1  ;;  %v4675_v59 = vpack.c.bf16 %v3937_v61, %v3935_v54  ;;  %v3934_v4 = vld [vmem:[%s7459_s6 + $0xa0] sm:$0xff]  ;;  %v3952_v54 = vld [vmem:[%s7460_s7 + $0x90] sm:$0xff] }
 0xda8   :  { %v3125_v2 = vmul.f32 %v5171_v18, %v3070_v34  ;;  %v4677_v9 = vpack.c.bf16 %v3936_v60, %v3934_v4  ;;  %v3942_v18 = vld [vmem:[%s7459_s6 + $0xe0] sm:$0xff]  ;;  %v3956_v60 = vld [vmem:[%s7460_s7 + $0xb0] sm:$0xff] }
 0xda9   :  { %v3187_v31 = vsel %vm109_vm0, %v3126_v26, 0.0  ;;  %4676 = vmatprep.subr.bf16.mxu0 %v4675_v59  ;;  %v3945_v26 = vld [vmem:[%s7459_s6 + $0xf8] sm:$0xff]  ;;  %v3955_v59 = vld [vmem:[%s7460_s7 + $0xa8] sm:$0xff]  ;;  %v4699_v7 = vpack.c.bf16 %v3957_v0, %v3956_v60 }
 0xdaa   :  { %v3188_v52 = vadd.f32 %v3187_v31, %v3186_v25  ;;  %v3172_v40 = vsel %vm109_vm0, %v3125_v2, 0.0  ;;  %v4455_v58 = vpop.f32.mrb[64].mxu1  ;;  %v3940_v25 = vld [vmem:[%s7459_s6 + $0xd0] sm:$0xff]  ;;  %4678 = vmatpush1.bf16.msra.mxu0 %v4677_v9  ;;  %v4695_v4 = vpack.c.bf16 %v3955_v59, %v3954_v36  ;;  %v3958_v9 = vld [vmem:[%s7460_s7 + $0xc0] sm:$0xff] }
 0xdab   :  { %v3173_v11 = vadd.f32 %v3172_v40, %v3171_v27  ;;  %v3128_v22 = vmul.f32 %v5172_v44, %v4455_v58  ;;  %v3080_v39 = vpop.f32.mrb[65].mxu1  ;;  %v4681_v28 = vpack.c.bf16 %v3940_v25, %v3938_v35  ;;  %4680 = vmatprep.subr.bf16.mxu0 %v4679_v45  ;;  %v3944_v2 = vld [vmem:[%s7459_s6 + $0xf0] sm:$0xff]  ;;  %v3959_v45 = vld [vmem:[%s7460_s7 + $0xc8] sm:$0xff] }
 0xdac   :  { %v3127_v20 = vmul.f32 %v5173_v56, %v3080_v39  ;;  %v4685_v31 = vpack.c.bf16 %v3944_v2, %v3942_v18  ;;  %v4703_v35 = vpack.c.bf16 %v3959_v45, %v3958_v9  ;;  %v3960_v25 = vld [vmem:[%s7460_s7 + $0xd0] sm:$0xff] }
 0xdad   :  { %v3159_v49 = vsel %vm109_vm0, %v3128_v22, 0.0 }
 0xdae   :  { %v3160_v15 = vadd.f32 %v3159_v49, %v3158_v1  ;;  %v3144_v14 = vsel %vm109_vm0, %v3127_v20, 0.0  ;;  %v4458_v5 = vpop.f32.mrb[66].mxu1  ;;  %4682 = vmatpush1.bf16.msra.mxu0 %v4681_v28  ;;  %v3961_v28 = vld [vmem:[%s7460_s7 + $0xd8] sm:$0xff] }
 0xdaf   :  { %v3145_v57 = vadd.f32 %v3144_v14, %v3143_v47  ;;  %v3130_v62 = vmul.f32 %v5174_v41, %v4458_v5  ;;  %v3090_v12 = vpop.f32.mrb[67].mxu1  ;;  %v3929_v41 = vld [vmem:[%s7461_s8 + $0x1] ss:$0 sm:$0xff] }
 0xdb0   :  { %v3129_v21 = vmul.f32 %v5175_v33, %v3090_v12 }
 0xdb1   :  { %v3189_v43 = vsel %vm109_vm0, %v3130_v62, 0.0  ;;  %4475 = vmatprep.mubr.msk.f32.mxu1 %vm109_vm0, %v3145_v57 }
 0xdb2   :  { %v3190_v29 = vadd.f32 %v3189_v43, %v3188_v52  ;;  %v3174_v50 = vsel %vm109_vm0, %v3129_v21, 0.0  ;;  %4476 = vmatmul.mubr.msk.f32.vlgmr.msra.gmra.mrb[68].mxu1 %vm109_vm0, %v3160_v15 }
 0xdb3   :  { %v3175_v46 = vadd.f32 %v3174_v50, %v3173_v11  ;;  %4690 = vmatpush3.bf16.msra.mxu1 %v4687_v10 }
 0xdb5   :  { %4478 = vmatprep.mubr.msk.f32.mxu1 %vm109_vm0, %v3175_v46 }
 0xdb6   :  { %4479 = vmatmul.mubr.msk.f32.gmra.mrb[70].mxu1 %vm109_vm0, %v3190_v29 }
 0xe85   :  { %v4477_v6 = vpop.f32.mrb[68].mxu1 }
 0xe86   :  { %v7285_v27 = vadd.f32 %v4477_v6, %v6440_v13  ;;  %v3278_v42 = vpop.f32.mrb[69].mxu1  ;;  %v4707_v6 = vpack.c.bf16 %v3961_v28, %v3960_v25 }
 0xe87   :  { %v7288_v37 = vadd.f32 %v3278_v42, %v6443_v38  ;;  %v3962_v42 = vld [vmem:[%s7460_s7 + $0xe0] sm:$0xff] }
 0xe88   :  { %v3304_v3 = vmul.f32 %v7285_v27, %v7285_v27 }
 0xe89   :  { %v4480_v8 = vpop.f32.mrb[70].mxu1  ;;  %v3303_v48 = vmul.f32 %v7288_v37, %v7288_v37 }
 0xe8a   :  { %v7295_v17 = vadd.f32 %v4480_v8, %v6452_v23  ;;  %v3288_v1 = vpop.f32.mrb[71].mxu1  ;;  %v3310_v16 = vsel %vm109_vm0, %v3304_v3, 0.0  ;;  %v3963_v3 = vld [vmem:[%s7460_s7 + $0xe8] sm:$0xff] }
 0xe8b   :  { %v7299_v13 = vadd.f32 %v3288_v1, %v6455_v30  ;;  %3311 = vadd.xlane.f32.xlu1 %v3310_v16  ;;  %v3307_v38 = vsel %vm109_vm0, %v3303_v48, 0.0  ;;  %v3943_v30 = vld [vmem:[%s7459_s6 + $0xe8] sm:$0xff]  ;;  %v4711_v8 = vpack.c.bf16 %v3963_v3, %v3962_v42  ;;  %v3964_v48 = vld [vmem:[%s7460_s7 + $0xf0] sm:$0xff]  ;;  %v3965_v1 = vld [vmem:[%s7460_s7 + $0xf8] sm:$0xff] }
 0xe8c   :  { %3308 = vadd.xlane.f32.xlu0 %v3307_v38  ;;  %v3306_v53 = vmul.f32 %v7295_v17, %v7295_v17  ;;  %v4683_v34 = vpack.c.bf16 %v3945_v26, %v3943_v30  ;;  %v4715_v16 = vpack.c.bf16 %v3965_v1, %v3964_v48 }
 0xe8d   :  { %v3305_v47 = vmul.f32 %v7299_v13, %v7299_v13 }
 0xe8e   :  { %v3316_v63 = vsel %vm109_vm0, %v3306_v53, 0.0  ;;  %4684 = vmatprep.subr.bf16.mxu0 %v4683_v34 }
 0xe8f   :  { %3317 = vadd.xlane.f32.xlu1 %v3316_v63  ;;  %v3313_v23 = vsel %vm109_vm0, %v3305_v47, 0.0  ;;  %4686 = vmatpush1.bf16.msra.mxu0 %v4685_v31 }
 0xe90   :  { %3314 = vadd.xlane.f32.xlu0 %v3313_v23 }
 0xf18   :  { %v3312_v52 = vpop.xlane.xlu1 %3311 }
 0xf19   :  { %v3320_v40 = vmul.f32 0.015625, %v3312_v52  ;;  %v3309_v58 = vpop.xlane.xlu0 %3308 }
 0xf1a   :  { %v3319_v11 = vmul.f32 0.015625, %v3309_v58 }
 0xf1b   :  { %v3324_v44 = vadd.f32 1e-06, %v3320_v40 }
 0xf1c   :  { %v3323_v22 = vadd.f32 1e-06, %v3319_v11  ;;  %v3318_v39 = vpop.xlane.xlu1 %3317 }
 0xf1d   :  { %5044 = vrsqrt.f32 %v3324_v44  ;;  %v3315_v56 = vpop.xlane.xlu0 %3314  ;;  %v3322_v20 = vmul.f32 0.015625, %v3318_v39 }
 0xf1e   :  { %5046 = vrsqrt.f32 %v3323_v22  ;;  %v3321_v49 = vmul.f32 0.015625, %v3315_v56 }
 0xf1f   :  { %v3326_v14 = vadd.f32 1e-06, %v3322_v20 }
 0xf20   :  { %v3325_v15 = vadd.f32 1e-06, %v3321_v49 }
 0xf22   :  { %5048 = vrsqrt.f32 %v3325_v15 }
 0xf23   :  { %5050 = vrsqrt.f32 %v3326_v14 }
 0xf27   :  { %v5045_v5 = vpop.eup %5044 }
 0xf28   :  { %v5047_v57 = vpop.eup %5046  ;;  %v3332_v33 = vmul.f32 %v5045_v5, %v7285_v27 }
 0xf29   :  { %v3331_v62 = vmul.f32 %v5047_v57, %v7288_v37 }
 0xf2a   :  { %v3342_v43 = vmul.f32 %v3929_v41, %v3332_v33 }
 0xf2b   :  { %v3341_v12 = vmul.f32 %v3929_v41, %v3331_v62 }
 0xf2c   :  { %v5049_v21 = vpop.eup %5048 }
 0xf2d   :  { %3946 = vmatmul.mubr.msk.f32.vlgmr.msra.gmra.mrb[92].mxu0 %vm109_vm0, %v3341_v12  ;;  %v3333_v29 = vmul.f32 %v5049_v21, %v7299_v13  ;;  %v5051_v50 = vpop.eup %5050 }
 0xf2e   :  { %3444 = vmatprep.mubr.f32.mxu0 %v7494_v55  ;;  %v3334_v24 = vmul.f32 %v5051_v50, %v7295_v17 }
 0xf2f   :  { %v3343_v46 = vmul.f32 %v3929_v41, %v3333_v29 }
 0xf30   :  { %v3344_v32 = vmul.f32 %v3929_v41, %v3334_v24 }
 0xf31   :  { %3947 = vmatmul.mubr.msk.f32.gmra.mrb[94].mxu0 %vm109_vm0, %v3342_v43 }
 0xf32   :  { %3450 = vmatprep.mubr.f32.mxu0 %v7494_v55 }
 0xf35   :  { %3948 = vmatmul.mubr.msk.f32.gmra.mrb[96].mxu0 %vm109_vm0, %v3343_v46 }
 0xf36   :  { %3456 = vmatprep.mubr.f32.mxu0 %v7494_v55  ;;  %v3953_v55 = vld [vmem:[%s7460_s7 + $0x98] sm:$0xff] }
 0xf37   :  { %v4691_v61 = vpack.c.bf16 %v3953_v55, %v3952_v54 }
 0xf39   :  { %3949 = vmatmul.mubr.msk.f32.gmra.mrb[98].mxu0 %vm109_vm0, %v3344_v32  ;;  %4692 = vmatprep.subr.bf16.mxu1 %v4691_v61 }
 0xf3a   :  { %4694 = vmatpush3.bf16.msra.mxu1 %v4691_v61 }
 0xf3b   :  { %4696 = vmatprep.subr.bf16.mxu1 %v4695_v4 }
 0xf3e   :  { %4698 = vmatpush3.bf16.msra.mxu1 %v4695_v4 }
 0xf3f   :  { %4700 = vmatprep.subr.bf16.mxu1 %v4699_v7 }
 0xf42   :  { %4702 = vmatpush3.bf16.msra.mxu1 %v4699_v7 }
 0xf43   :  { %4704 = vmatprep.subr.bf16.mxu1 %v4703_v35 }
 0xf46   :  { %4706 = vmatpush3.bf16.msra.mxu1 %v4703_v35 }
 0xf47   :  { %4708 = vmatprep.subr.bf16.mxu1 %v4707_v6 }
 0xf4a   :  { %4710 = vmatpush3.bf16.msra.mxu1 %v4707_v6 }
 0xf4b   :  { %4712 = vmatprep.subr.bf16.mxu1 %v4711_v8 }
 0xf4e   :  { %4714 = vmatpush3.bf16.msra.mxu1 %v4711_v8 }
 0xf4f   :  { %4716 = vmatprep.subr.bf16.mxu1 %v4715_v16 }
 0xf52   :  { %4718 = vmatpush3.bf16.msra.mxu1 %v4715_v16 }
0x1000   :  { %v7382_v38 = vpop.f32.mrb[92].mxu0 }
0x1001   :  { %v7385_v53 = vmul.f32 0.70710677, %v7382_v38  ;;  %v7387_v47 = vpop.f32.mrb[93].mxu0 }
0x1003   :  { %v3471_v63 = vand.u32 2147483647, %v7385_v53  ;;  %vm3551_vm7 = vcmp.lt.f32.partialorder %v7385_v53, 0.0 }
0x1004   :  { %v7390_v23 = vpop.f32.mrb[94].mxu0 }
0x1005   :  { %v3475_v30 = vmul.f32 0.3275911, %v3471_v63  ;;  %v7393_v26 = vmul.f32 0.70710677, %v7390_v23  ;;  %v7395_v34 = vpop.f32.mrb[95].mxu0  ;;  %v3527_v49 = vmul.f32 %v3471_v63, %v3471_v63 }
0x1007   :  { %v3479_v18 = vadd.f32 1.0, %v3475_v30  ;;  %v3472_v2 = vand.u32 2147483647, %v7393_v26  ;;  %v3531_v41 = vsub.f32 0.0, %v3527_v49  ;;  %vm3552_vm8 = vcmp.lt.f32.partialorder %v7393_v26, 0.0 }
0x1008   :  { %v7398_v31 = vpop.f32.mrb[96].mxu0 }
0x1009   :  { %5052 = vrcp.f32 %v3479_v18  ;;  %v3476_v52 = vmul.f32 0.3275911, %v3472_v2  ;;  %v7400_v40 = vpop.f32.mrb[97].mxu0  ;;  %v7403_v58 = vmul.f32 0.70710677, %v7398_v31  ;;  %v3528_v62 = vmul.f32 %v3472_v2, %v3472_v2 }
0x100a   :  { %v3535_v29 = vmul.f32 1.442695, %v3531_v41 }
0x100b   :  { %v3480_v11 = vadd.f32 1.0, %v3476_v52  ;;  %v3473_v44 = vand.u32 2147483647, %v7403_v58  ;;  %v3532_v50 = vsub.f32 0.0, %v3528_v62  ;;  %vm3553_vm9 = vcmp.lt.f32.partialorder %v7403_v58, 0.0 }
0x100c   :  { %v7406_v22 = vpop.f32.mrb[98].mxu0 }
0x100d   :  { %5054 = vrcp.f32 %v3480_v11  ;;  %v7409_v39 = vmul.f32 0.70710677, %v7406_v22  ;;  %v7411_v56 = vpop.f32.mrb[99].mxu0  ;;  %v3477_v20 = vmul.f32 0.3275911, %v3473_v44  ;;  %v3529_v32 = vmul.f32 %v3473_v44, %v3473_v44 }
0x100e   :  { %v3537_v10 = vmul.f32 1.442695, %v3532_v50 }
0x100f   :  { %v3474_v15 = vand.u32 2147483647, %v7409_v39  ;;  %v3481_v14 = vadd.f32 1.0, %v3477_v20  ;;  %v3533_v59 = vsub.f32 0.0, %v3529_v32  ;;  %vm3554_vm10 = vcmp.lt.f32.partialorder %v7409_v39, 0.0 }
0x1011   :  { %v3478_v5 = vmul.f32 0.3275911, %v3474_v15  ;;  %5056 = vrcp.f32 %v3481_v14  ;;  %v3530_v54 = vmul.f32 %v3474_v15, %v3474_v15  ;;  %v3539_v28 = vmul.f32 1.442695, %v3533_v59 }
0x1013   :  { %v5053_v57 = vpop.eup %5052  ;;  %v3482_v12 = vadd.f32 1.0, %v3478_v5  ;;  %v3534_v45 = vsub.f32 0.0, %v3530_v54 }
0x1014   :  { %v3491_v33 = vmul.f32 1.0614054, %v5053_v57 }
0x1015   :  { %5058 = vrcp.f32 %v3482_v12  ;;  %v3541_v16 = vmul.f32 1.442695, %v3534_v45 }
0x1016   :  { %v3495_v21 = vadd.f32 -1.4531521, %v3491_v33  ;;  %5060 = vpow2.f32 %v3535_v29 }
0x1017   :  { %v5055_v43 = vpop.eup %5054  ;;  %5062 = vpow2.f32 %v3537_v10 }
0x1018   :  { %v3499_v46 = vmul.f32 %v5053_v57, %v3495_v21  ;;  %v3492_v24 = vmul.f32 1.0614054, %v5055_v43  ;;  %5064 = vpow2.f32 %v3539_v28  ;;  %v3465_v28 = vmul.f32 0.5, %v7398_v31 }
0x1019   :  { %5066 = vpow2.f32 %v3541_v16 }
0x101a   :  { %v3503_v19 = vadd.f32 1.4214138, %v3499_v46  ;;  %v3496_v51 = vadd.f32 -1.4531521, %v3492_v24  ;;  %v3463_v24 = vmul.f32 0.5, %v7382_v38 }
0x101b   :  { %v5057_v55 = vpop.eup %5056 }
0x101c   :  { %v3507_v61 = vmul.f32 %v5053_v57, %v3503_v19  ;;  %v3500_v36 = vmul.f32 %v5055_v43, %v3496_v51  ;;  %v3493_v4 = vmul.f32 1.0614054, %v5057_v55 }
0x101e   :  { %v3511_v60 = vadd.f32 -0.28449672, %v3507_v61  ;;  %v3504_v0 = vadd.f32 1.4214138, %v3500_v36  ;;  %v3497_v9 = vadd.f32 -1.4531521, %v3493_v4 }
0x101f   :  { %v5059_v7 = vpop.eup %5058 }
0x1020   :  { %v3515_v35 = vmul.f32 %v5053_v57, %v3511_v60  ;;  %v3508_v25 = vmul.f32 %v5055_v43, %v3504_v0  ;;  %v3494_v6 = vmul.f32 1.0614054, %v5059_v7  ;;  %v3501_v42 = vmul.f32 %v5057_v55, %v3497_v9  ;;  %v5061_v2 = vpop.eup %5060 }
0x1021   :  { %v5063_v41 = vpop.eup %5062  ;;  %v3464_v60 = vmul.f32 0.5, %v7390_v23 }
0x1022   :  { %v3519_v3 = vadd.f32 0.2548296, %v3515_v35  ;;  %v3512_v8 = vadd.f32 -0.28449672, %v3508_v25  ;;  %v3498_v48 = vadd.f32 -1.4531521, %v3494_v6  ;;  %v5065_v51 = vpop.eup %5064 }
0x1023   :  { %v3505_v1 = vadd.f32 1.4214138, %v3501_v42  ;;  %v5067_v4 = vpop.eup %5066  ;;  %v3466_v42 = vmul.f32 0.5, %v7406_v22 }
0x1024   :  { %v3523_v63 = vmul.f32 %v5053_v57, %v3519_v3  ;;  %v3516_v30 = vmul.f32 %v5055_v43, %v3512_v8  ;;  %v3502_v18 = vmul.f32 %v5059_v7, %v3498_v48 }
0x1025   :  { %v3509_v52 = vmul.f32 %v5057_v55, %v3505_v1 }
0x1026   :  { %v3543_v11 = vmul.f32 %v5061_v2, %v3523_v63  ;;  %v3520_v44 = vadd.f32 0.2548296, %v3516_v30  ;;  %v3506_v20 = vadd.f32 1.4214138, %v3502_v18 }
0x1027   :  { %v3513_v49 = vadd.f32 -0.28449672, %v3509_v52 }
0x1028   :  { %v3547_v15 = vsub.f32 1.0, %v3543_v11  ;;  %v3524_v14 = vmul.f32 %v5055_v43, %v3520_v44  ;;  %v3510_v5 = vmul.f32 %v5059_v7, %v3506_v20 }
0x1029   :  { %v3517_v62 = vmul.f32 %v5057_v55, %v3513_v49 }
0x102a   :  { %v3555_v12 = vsub.f32 0.0, %v3547_v15  ;;  %v3544_v33 = vmul.f32 %v5063_v41, %v3524_v14  ;;  %v3514_v21 = vadd.f32 -0.28449672, %v3510_v5 }
0x102b   :  { %v3521_v57 = vadd.f32 0.2548296, %v3517_v62 }
0x102c   :  { %v3559_v29 = vsel %vm3551_vm7, %v3555_v12, %v3547_v15  ;;  %v3548_v50 = vsub.f32 1.0, %v3544_v33  ;;  %v3518_v46 = vmul.f32 %v5059_v7, %v3514_v21 }
0x102d   :  { %v3563_v32 = vadd.f32 1.0, %v3559_v29  ;;  %v3525_v19 = vmul.f32 %v5057_v55, %v3521_v57  ;;  %v3966_v57 = vld [vmem:[%s7462_s9] ss:$0 sm:$0xff]  ;;  %s5176_s9 = scalar_lea.vmem %s3734_s30, 512 }
0x102e   :  { %v3556_v10 = vsub.f32 0.0, %v3548_v50  ;;  %v3522_v54 = vadd.f32 0.2548296, %v3518_v46  ;;  %p5177_p0 = scmp.ne.s32.totalorder %s3734_s30, %s5176_s9  ;;  %p5182_p2 = scmp.lt.s32.totalorder %s5176_s9, %s5176_s9 }
0x102f   :  { %v3567_v43 = vmul.f32 %v3563_v32, %v3463_v24  ;;  %v3545_v61 = vmul.f32 %v5065_v51, %v3525_v19 }
0x1030   :  { %v3560_v36 = vsel %vm3552_vm8, %v3556_v10, %v3548_v50  ;;  %v3526_v59 = vmul.f32 %v5059_v7, %v3522_v54  ;;  %p5183_p3 = por %p5182_p2, %p5181_p1 }
0x1031   :  { %v3571_v53 = vmul.f32 %v3567_v43, %v7387_v47  ;;  %v3564_v0 = vadd.f32 1.0, %v3560_v36  ;;  %v3549_v9 = vsub.f32 1.0, %v3545_v61 }
0x1032   :  { %v3546_v45 = vmul.f32 %v5067_v4, %v3526_v59  ;;  %p5184_p4 = pnand %p5183_p3, %p5177_p0 }
0x1033   :  { %v3568_v38 = vmul.f32 %v3564_v0, %v3464_v60  ;;  %v3557_v35 = vsub.f32 0.0, %v3549_v9  ;;  %4513 = vmatprep.mubr.f32.mxu1 %v3571_v53 }
0x1034   :  { %v3550_v55 = vsub.f32 1.0, %v3546_v45 }
0x1035   :  { %v3572_v25 = vmul.f32 %v3568_v38, %v7395_v34  ;;  %v3561_v26 = vsel %vm3553_vm9, %v3557_v35, %v3549_v9 }
0x1036   :  { %v3565_v7 = vadd.f32 1.0, %v3561_v26  ;;  %v3558_v6 = vsub.f32 0.0, %v3550_v55 }
0x1037   :  { %4514 = vmatmul.mubr.f32.vlgmr.msra.gmra.mrb[72].mxu1 %v3572_v25 }
0x1038   :  { %v3569_v47 = vmul.f32 %v3565_v7, %v3465_v28  ;;  %v3562_v23 = vsel %vm3554_vm10, %v3558_v6, %v3550_v55 }
0x1039   :  { %v3566_v3 = vadd.f32 1.0, %v3562_v23 }
0x103a   :  { %v3573_v8 = vmul.f32 %v3569_v47, %v7400_v40 }
0x103b   :  { %v3570_v48 = vmul.f32 %v3566_v3, %v3466_v42 }
0x103c   :  { %4516 = vmatprep.mubr.f32.mxu1 %v3573_v8 }
0x103d   :  { %v3574_v58 = vmul.f32 %v3570_v48, %v7411_v56 }
0x103f   :  { %4517 = vmatmul.mubr.f32.gmra.mrb[74].mxu1 %v3574_v58 }
0x110a   :  { %v4515_v34 = vpop.f32.mrb[72].mxu1 }
0x110b   :  { %v3678_v31 = vadd.f32 %v4515_v34, %v7285_v27  ;;  %v3658_v1 = vpop.f32.mrb[73].mxu1 }
0x110c   :  { %v3677_v16 = vadd.f32 %v3658_v1, %v7288_v37 }
0x110d   :  { %v3683_v39 = vmul.f32 %v3678_v31, %v3678_v31 }
0x110e   :  { %v3682_v63 = vmul.f32 %v3677_v16, %v3677_v16 }
0x110f   :  { %v3689_v30 = vsel %vm109_vm0, %v3683_v39, 0.0 }
0x1110   :  { %3690 = vadd.xlane.f32.xlu1 %v3689_v30  ;;  %v3686_v22 = vsel %vm109_vm0, %v3682_v63, 0.0 }
0x1111   :  { %3687 = vadd.xlane.f32.xlu0 %v3686_v22 }
0x1112   :  { %v4518_v40 = vpop.f32.mrb[74].mxu1 }
0x1113   :  { %v3680_v18 = vadd.f32 %v4518_v40, %v7295_v17  ;;  %v3668_v2 = vpop.f32.mrb[75].mxu1 }
0x1114   :  { %v3679_v56 = vadd.f32 %v3668_v2, %v7299_v13 }
0x1115   :  { %v3685_v52 = vmul.f32 %v3680_v18, %v3680_v18 }
0x1116   :  { %v3684_v11 = vmul.f32 %v3679_v56, %v3679_v56 }
0x1117   :  { %v3695_v27 = vsel %vm109_vm0, %v3685_v52, 0.0 }
0x1118   :  { %3696 = vadd.xlane.f32.xlu1 %v3695_v27  ;;  %v3692_v37 = vsel %vm109_vm0, %v3684_v11, 0.0 }
0x1119   :  { %3693 = vadd.xlane.f32.xlu0 %v3692_v37 }
0x119d   :  { %v3691_v44 = vpop.xlane.xlu1 %3690 }
0x119e   :  { %v3699_v20 = vmul.f32 0.015625, %v3691_v44  ;;  %v3688_v49 = vpop.xlane.xlu0 %3687 }
0x119f   :  { %v3698_v15 = vmul.f32 0.015625, %v3688_v49 }
0x11a0   :  { %v3703_v14 = vadd.f32 1e-06, %v3699_v20 }
0x11a1   :  { %v3702_v5 = vadd.f32 1e-06, %v3698_v15 }
0x11a2   :  { %5068 = vrsqrt.f32 %v3703_v14 }
0x11a3   :  { %5070 = vrsqrt.f32 %v3702_v5 }
0x11a5   :  { %v3697_v17 = vpop.xlane.xlu1 %3696 }
0x11a6   :  { %v3701_v41 = vmul.f32 0.015625, %v3697_v17  ;;  %v3694_v62 = vpop.xlane.xlu0 %3693 }
0x11a7   :  { %v3700_v13 = vmul.f32 0.015625, %v3694_v62 }
0x11a8   :  { %v3705_v12 = vadd.f32 1e-06, %v3701_v41 }
0x11a9   :  { %v3704_v33 = vadd.f32 1e-06, %v3700_v13 }
0x11aa   :  { %5072 = vrsqrt.f32 %v3705_v12 }
0x11ab   :  { %5074 = vrsqrt.f32 %v3704_v33 }
0x11ac   :  { %v5069_v21 = vpop.eup %5068 }
0x11ad   :  { %v5071_v29 = vpop.eup %5070  ;;  %v3711_v50 = vmul.f32 %v5069_v21, %v3678_v31 }
0x11ae   :  { %v3710_v46 = vmul.f32 %v5071_v29, %v3677_v16 }
0x11af   :  { %v3721_v24 = vmul.f32 %v3966_v57, %v3711_v50 }
0x11b0   :  { %v3720_v32 = vmul.f32 %v3966_v57, %v3710_v46 }
0x11b1   :  { %3725 = vst.msk [vmem:[#allocation2 + $0x8] sm:$0xff] %vm109_vm0, %v3721_v24 }
0x11b2   :  { %3724 = vst.msk [vmem:[#allocation2] sm:$0xff] %vm109_vm0, %v3720_v32 }
0x11b4   :  { %v5073_v19 = vpop.eup %5072 }
0x11b5   :  { %v5075_v51 = vpop.eup %5074  ;;  %v3713_v10 = vmul.f32 %v5073_v19, %v3680_v18 }
0x11b6   :  { %v3712_v54 = vmul.f32 %v5075_v51, %v3679_v56 }
0x11b7   :  { %v3723_v43 = vmul.f32 %v3966_v57, %v3713_v10 }
0x11b8   :  { %v3722_v61 = vmul.f32 %v3966_v57, %v3712_v54 }
0x11b9   :  { %3727 = vst.msk [vmem:[#allocation2 + $0x18] sm:$0xff] %vm109_vm0, %v3723_v43 }
0x11ba   :  { %3726 = vst.msk [vmem:[#allocation2 + $0x10] sm:$0xff] %vm109_vm0, %v3722_v61 }
0x11bb   :  { %5187 = shalt.err (!%p5184_p4)
}
0x11bc   :  { %s5188_s13 = scalar_lea.hbm %s7463_s10, 512 }
0x11bd   :  { %p5189_p5 = scmp.ne.s32.totalorder %s7463_s10, %s5188_s13  ;;  %p5192_p6 = scmp.lt.u32.totalorder %s5188_s13, %s7463_s10 }
0x11bf   :  { %p5194_p7 = pnand %p5192_p6, %p5189_p5 }
0x11c1   :  { %5197 = shalt.err (!%p5194_p7)
}
0x11c2   :  { %s5203_s17 = smov 128   ;;  %s5204_s1 = smov 8  }
0x11c3   :  { %3739 = dma.vmem_to_hbm [thread:$0]  %s3734_s30, 512, %s7463_s10, [#allocation3], %s5203_s17, %s5203_s17, %s5204_s1  }
0x11c4   :  { %5198 = dma.done.wait [#allocation3], 512  }
0x11c5   :  { %5199 = vsyncadd [#allocation3], 4294966784 }
0x11c6   :  { %3743 = vsyncpa [#allocation3], 1 }

</bundles_post_ra>
